<compile_context>
chip_gen: v6e
topology: v6e:2x2x1
jax: 0.10.0
libtpu: 0.0.40
codegen_flags: <defaults>
</compile_context>

<pallas_src>
import jax
import jax.numpy as jnp
from jax.experimental import pallas as pl
from jax.experimental.pallas import tpu as pltpu

CFG = [16, 'M', 32, 'M']      # conv channels / 'M' = maxpool 2x2 stride 2
NUM_CLASSES = 10
IN_CHANNELS = 3
IMG = 16                      # input spatial size -> 32 * 4 * 4 = 512 flat features
BN_EPS = 1e-5
HIDDEN = 512


# ----------------------------------------------------------------------------
# One-time weight preparation (BN folding, transposes, permutations).
# Batch-size independent.
# ----------------------------------------------------------------------------
def prepare_params(params):
    convs = [l for l in params['features'] if l['type'] == 'conv']

    def fold(layer):
        cout, cin = layer['w'].shape[0], layer['w'].shape[1]
        scale = layer['gamma'] / jnp.sqrt(layer['rv'] + BN_EPS)
        bias = layer['beta'] + (layer['b'] - layer['rm']) * scale
        # OIHW -> (tap*cin + ci, cout) with tap = kh*3 + kw (matches kernel tap order)
        w = jnp.transpose(layer['w'], (2, 3, 1, 0)).reshape(9 * cin, cout)
        return w, scale.reshape(1, cout), bias.reshape(1, cout)

    kp = {}
    kp['w1c'], kp['bn_s1'], kp['bn_b1'] = fold(convs[0])
    kp['w2c'], kp['bn_s2'], kp['bn_b2'] = fold(convs[1])

    c2 = convs[1]['w'].shape[0]
    s2 = (IMG // 4) ** 2
    din, dout = params['w1'].shape[1], params['w1'].shape[0]
    assert c2 * s2 == din, "flattened feature size must match classifier input"
    # Linear-1 consumes the kernel feature row (index = s*c2 + c);
    # PyTorch NCHW-flatten order is c*s2 + s.  Permute ONCE here.
    kp['w1k'] = params['w1'].T.reshape(c2, s2, dout).transpose(1, 0, 2).reshape(din, dout)
    kp['b1'] = params['b1'].reshape(1, -1)
    kp['w2t'] = params['w2'].T
    kp['b2'] = params['b2'].reshape(1, -1)
    kp['w3t'] = params['w3'].T
    kp['b3'] = params['b3'].reshape(1, -1)
    return kp


# ----------------------------------------------------------------------------
# Fully fused forward pass (single pallas_call, batch-parallel grid)
# ----------------------------------------------------------------------------
@jax.jit
def vgg_forward(x_nchw, kp):
    """Returns (logits, features) matching the PyTorch module's forward (eval mode)."""
    nb, c0, H, W = x_nchw.shape
    c1 = kp['w1c'].shape[1]          # conv1 out channels (16)
    c2 = kp['w2c'].shape[1]          # conv2 out channels (32)
    ncls = kp['w3t'].shape[1]
    S = H * W                        # conv1 output rows per sample (256)
    HP = H // 2                      # spatial size after pool1 (8)
    WPAD = HP + 2                    # padded conv2 slab width (10)
    A2 = (HP - 1) * WPAD + HP        # conv2 anchor rows (78; anchors with wo>=HP are junk)
    H2 = HP // 2                     # spatial size after pool2 (4)
    S2 = H2 * H2                     # pooled positions per sample (16)
    DFLAT = c2 * S2                  # flattened feature size (512)

    # Host glue: NCHW -> zero-padded NHWC -> im2col rows (n, h*W + w, tap*c0 + ci).
    xp = jnp.pad(jnp.transpose(x_nchw, (0, 2, 3, 1)).astype(jnp.float32),
                 ((0, 0), (1, 1), (1, 1), (0, 0)))
    t1 = jnp.concatenate(
        [xp[:, dh:dh + H, dw:dw + W, :] for dh in range(3) for dw in range(3)],
        axis=-1).reshape(nb, S, 9 * c0)

    def kernel(t1_ref, w1c_ref, s1_ref, b1_ref,
               w2c_ref, s2_ref, b2_ref,
               w1k_ref, cb1_ref, w2t_ref, cb2_ref, w3t_ref, cb3_ref,
               logits_ref, feats_ref, y1_scr, y2_scr):
        f32 = jnp.float32
        # ---- conv1 (3x3, pad 1) as ONE K=9*c0 matmul on host-im2col'd rows, + BN + ReLU
        y1 = jnp.dot(t1_ref[0], w1c_ref[...], preferred_element_type=f32)      # (S, c1)
        y1_scr[...] = jnp.maximum(y1 * s1_ref[...] + b1_ref[...], 0.0)
        # ---- maxpool1 2x2/2: stride-2 reads pool w-pairs, slice-pair max pools h-pairs
        zm1 = jnp.maximum(y1_scr[pl.ds(0, S // 2, stride=2), :],
                          y1_scr[pl.ds(1, S // 2, stride=2), :])                # (S//2, c1)
        p1 = jnp.concatenate(
            [jnp.maximum(zm1[(2 * a) * HP:(2 * a + 1) * HP, :],
                         zm1[(2 * a + 1) * HP:(2 * a + 2) * HP, :])
             for a in range(HP)], axis=0)                                       # (HP*HP, c1)
        # ---- zero-padded conv2 row slab (rows = hp*WPAD + wp) via sublane concatenation
        zlong = jnp.zeros((WPAD + 1, c1), f32)
        zmid = jnp.zeros((2, c1), f32)
        pieces = [zlong]
        for h in range(HP):
            pieces.append(p1[h * HP:(h + 1) * HP, :])
            pieces.append(zmid if h < HP - 1 else zlong)
        xp2 = jnp.concatenate(pieces, axis=0)                                   # (WPAD*WPAD, c1)
        # ---- conv2 (3x3, pad 1): 9-tap K=c1 MXU accumulate, + BN + ReLU
        acc = jnp.dot(xp2[0:A2, :], w2c_ref[0:c1, :], preferred_element_type=f32)
        for t in range(1, 9):
            o = (t // 3) * WPAD + (t % 3)
            acc = acc + jnp.dot(xp2[o:o + A2, :], w2c_ref[t * c1:(t + 1) * c1, :],
                                preferred_element_type=f32)
        y2_scr[...] = jnp.maximum(acc * s2_ref[...] + b2_ref[...], 0.0)         # (A2, c2)
        # ---- maxpool2 2x2/2 (junk anchor columns wo >= HP are never selected)
        zm2 = jnp.maximum(y2_scr[pl.ds(0, A2 // 2, stride=2), :],
                          y2_scr[pl.ds(1, A2 // 2, stride=2), :])               # (A2//2, c2)
        p2 = jnp.concatenate(
            [jnp.maximum(zm2[WPAD * a:WPAD * a + H2, :],
                         zm2[WPAD * a + WPAD // 2:WPAD * a + WPAD // 2 + H2, :])
             for a in range(H2)], axis=0)                                       # (S2, c2)
        # ---- flatten to one lane-dense (1, 512) feature row (order: s*c2 + c)
        frow = jnp.concatenate([p2[s:s + 1, :] for s in range(S2)], axis=1)
        feats_ref[0] = frow
        # ---- classifier: one full-K matmul per Linear (Dropout = identity, eval mode)
        h1 = jnp.maximum(
            jnp.dot(frow, w1k_ref[...], preferred_element_type=f32) + cb1_ref[...], 0.0)
        h2 = jnp.maximum(
            jnp.dot(h1, w2t_ref[...], preferred_element_type=f32) + cb2_ref[...], 0.0)
        logits_ref[0] = (jnp.dot(h2, w3t_ref[...], preferred_element_type=f32)
                         + cb3_ref[...])

    vmem = pltpu.MemorySpace.VMEM
    wspec = pl.BlockSpec(memory_space=vmem)   # whole array, VMEM-resident across the grid
    logits3, fk = pl.pallas_call(
        kernel,
        grid=(nb,),
        out_shape=(jax.ShapeDtypeStruct((nb, 1, ncls), jnp.float32),
                   jax.ShapeDtypeStruct((nb, 1, DFLAT), jnp.float32)),
        in_specs=[pl.BlockSpec((1, S, 9 * c0), lambda b: (b, 0, 0))] + [wspec] * 12,
        out_specs=(pl.BlockSpec((1, 1, ncls), lambda b: (b, 0, 0)),
                   pl.BlockSpec((1, 1, DFLAT), lambda b: (b, 0, 0))),
        scratch_shapes=[pltpu.VMEM((S, c1), jnp.float32),     # conv1 output slab
                        pltpu.VMEM((A2, c2), jnp.float32)],   # conv2 output slab
        compiler_params=pltpu.CompilerParams(
            dimension_semantics=("parallel",),
            vmem_limit_bytes=32 * 1024 * 1024),
    )(t1, kp['w1c'], kp['bn_s1'], kp['bn_b1'],
      kp['w2c'], kp['bn_s2'], kp['bn_b2'],
      kp['w1k'], kp['b1'], kp['w2t'], kp['b2'], kp['w3t'], kp['b3'])

    # Re-order compact features (s-major) to PyTorch NCHW-flatten order (tiny host op).
    logits = logits3.reshape(nb, ncls)
    feats = fk.reshape(nb, S2, c2).transpose(0, 2, 1).reshape(nb, DFLAT)
    return logits, feats


# ----------------------------------------------------------------------------
# Deterministic parameter init (synthetic; shapes follow the PyTorch module)
# ----------------------------------------------------------------------------
def init_params(key):
    keys = list(jax.random.split(key, 64))
    nxt = iter(keys)
    params = {'features': []}
    in_c = IN_CHANNELS
    for c in CFG:
        if c == 'M':
            params['features'].append({'type': 'pool'})
        else:
            fan_in = 3 * 3 * in_c
            params['features'].append({
                'type': 'conv',
                'w': jax.random.normal(next(nxt), (c, in_c, 3, 3), jnp.float32) / jnp.sqrt(fan_in),
                'b': 0.05 * jax.random.normal(next(nxt), (c,), jnp.float32),
                'gamma': 1.0 + 0.1 * jax.random.normal(next(nxt), (c,), jnp.float32),
                'beta': 0.1 * jax.random.normal(next(nxt), (c,), jnp.float32),
                'rm': jnp.zeros((c,), jnp.float32),
                'rv': jnp.ones((c,), jnp.float32),
            })
            in_c = c
    # classifier: Linear(512,512), Linear(512,512), Linear(512,num_classes); PyTorch (out,in)
    for idx, (o, i) in enumerate([(HIDDEN, HIDDEN), (HIDDEN, HIDDEN), (NUM_CLASSES, HIDDEN)], start=1):
        params[f'w{idx}'] = jax.random.normal(next(nxt), (o, i), jnp.float32) / jnp.sqrt(i)
        params[f'b{idx}'] = 0.05 * jax.random.normal(next(nxt), (o,), jnp.float32)
    return params


# ----------------------------------------------------------------------------
# Pure-JAX reference (for correctness check only)
# ----------------------------------------------------------------------------
def vgg_reference(x_nchw, params):
    x = x_nchw.astype(jnp.float32)
    for layer in params['features']:
        if layer['type'] == 'conv':
            x = jax.lax.conv_general_dilated(
                x, layer['w'], (1, 1), ((1, 1), (1, 1)),
                dimension_numbers=('NCHW', 'OIHW', 'NCHW'))
            x = x + layer['b'][None, :, None, None]
            scale = layer['gamma'] / jnp.sqrt(layer['rv'] + BN_EPS)
            x = (x - layer['rm'][None, :, None, None]) * scale[None, :, None, None] \
                + layer['beta'][None, :, None, None]
            x = jnp.maximum(x, 0.0)
        else:
            N, C, H, W = x.shape
            x = x.reshape(N, C, H // 2, 2, W // 2, 2).max(axis=(3, 5))
    feats = x.reshape(x.shape[0], -1)
    h = jnp.maximum(feats @ params['w1'].T + params['b1'], 0.0)
    h = jnp.maximum(h @ params['w2'].T + params['b2'], 0.0)
    logits = h @ params['w3'].T + params['b3']
    return logits, feats


if __name__ == "__main__":
    key = jax.random.PRNGKey(0)
    kx, kpk = jax.random.split(key)
    # Small input consistent with the module: NCHW, 16x16 spatial -> 512 flat features.
    x = jax.random.normal(kx, (2, IN_CHANNELS, IMG, IMG), jnp.float32)
    params = init_params(kpk)
    kparams = prepare_params(params)        # one-time, batch-independent weight prep

    logits, feats = vgg_forward(x, kparams)
    logits, feats = jax.block_until_ready((logits, feats))

    ref_logits, ref_feats = vgg_reference(x, params)
    assert logits.shape == (2, NUM_CLASSES) and feats.shape == (2, 512)
    assert jnp.allclose(feats, ref_feats, rtol=1e-4, atol=1e-4)
    assert jnp.allclose(logits, ref_logits, rtol=1e-4, atol=1e-4)

    print("KERNEL_OK")
</pallas_src>

<mosaic_0001>
module attributes {stable_mosaic.version = 11 : i64} {
  func.func @kernel(%arg0: i32, %arg1: memref<1x256x27xf32, #tpu.memory_space<vmem>>, %arg2: memref<27x16xf32, #tpu.memory_space<vmem>>, %arg3: memref<1x16xf32, #tpu.memory_space<vmem>>, %arg4: memref<1x16xf32, #tpu.memory_space<vmem>>, %arg5: memref<144x32xf32, #tpu.memory_space<vmem>>, %arg6: memref<1x32xf32, #tpu.memory_space<vmem>>, %arg7: memref<1x32xf32, #tpu.memory_space<vmem>>, %arg8: memref<512x512xf32, #tpu.memory_space<vmem>>, %arg9: memref<1x512xf32, #tpu.memory_space<vmem>>, %arg10: memref<512x512xf32, #tpu.memory_space<vmem>>, %arg11: memref<1x512xf32, #tpu.memory_space<vmem>>, %arg12: memref<512x10xf32, #tpu.memory_space<vmem>>, %arg13: memref<1x10xf32, #tpu.memory_space<vmem>>, %arg14: memref<1x1x10xf32, #tpu.memory_space<vmem>>, %arg15: memref<1x1x512xf32, #tpu.memory_space<vmem>>, %arg16: memref<256x16xf32, #tpu.memory_space<vmem>>, %arg17: memref<78x32xf32, #tpu.memory_space<vmem>>) attributes {dimension_semantics = [#tpu.dimension_semantics<parallel>], iteration_bounds = array<i64: 2>, scalar_prefetch = 0 : i64, scratch_operands = 2 : i64, tpu.core_type = #tpu.core_type<tc>, window_params = [{transform_indices = @transform_0, window_bounds = array<i64: 1, 256, 27>}, {pipeline_mode = #tpu.pipeline_mode<synchronous>, transform_indices = @transform_1, window_bounds = array<i64: 27, 16>}, {pipeline_mode = #tpu.pipeline_mode<synchronous>, transform_indices = @transform_2, window_bounds = array<i64: 1, 16>}, {pipeline_mode = #tpu.pipeline_mode<synchronous>, transform_indices = @transform_3, window_bounds = array<i64: 1, 16>}, {pipeline_mode = #tpu.pipeline_mode<synchronous>, transform_indices = @transform_4, window_bounds = array<i64: 144, 32>}, {pipeline_mode = #tpu.pipeline_mode<synchronous>, transform_indices = @transform_5, window_bounds = array<i64: 1, 32>}, {pipeline_mode = #tpu.pipeline_mode<synchronous>, transform_indices = @transform_6, window_bounds = array<i64: 1, 32>}, {pipeline_mode = #tpu.pipeline_mode<synchronous>, transform_indices = @transform_7, window_bounds = array<i64: 512, 512>}, {pipeline_mode = #tpu.pipeline_mode<synchronous>, transform_indices = @transform_8, window_bounds = array<i64: 1, 512>}, {pipeline_mode = #tpu.pipeline_mode<synchronous>, transform_indices = @transform_9, window_bounds = array<i64: 512, 512>}, {pipeline_mode = #tpu.pipeline_mode<synchronous>, transform_indices = @transform_10, window_bounds = array<i64: 1, 512>}, {pipeline_mode = #tpu.pipeline_mode<synchronous>, transform_indices = @transform_11, window_bounds = array<i64: 512, 10>}, {pipeline_mode = #tpu.pipeline_mode<synchronous>, transform_indices = @transform_12, window_bounds = array<i64: 1, 10>}, {transform_indices = @transform_13, window_bounds = array<i64: 1, 1, 10>}, {transform_indices = @transform_14, window_bounds = array<i64: 1, 1, 512>}]} {
    %c0 = arith.constant 0 : index
    %c0_0 = arith.constant 0 : index
    %c0_1 = arith.constant 0 : index
    %0 = vector.load %arg1[%c0, %c0_0, %c0_1] : memref<1x256x27xf32, #tpu.memory_space<vmem>>, vector<1x256x27xf32>
    %1 = vector.shape_cast %0 : vector<1x256x27xf32> to vector<256x27xf32>
    %c0_2 = arith.constant 0 : index
    %c0_3 = arith.constant 0 : index
    %2 = vector.load %arg2[%c0_2, %c0_3] : memref<27x16xf32, #tpu.memory_space<vmem>>, vector<27x16xf32>
    %cst = arith.constant dense<0.000000e+00> : vector<256x16xf32>
    %3 = tpu.matmul %1, %2, %cst {dimension_numbers = #tpu.dot_dimension_numbers<[1], [0], [0], [1], [0, 0, 1, 1], [], []>} : vector<256x27xf32>, vector<27x16xf32>, vector<256x16xf32> -> vector<256x16xf32>
    %c0_4 = arith.constant 0 : index
    %c0_5 = arith.constant 0 : index
    %4 = vector.load %arg3[%c0_4, %c0_5] : memref<1x16xf32, #tpu.memory_space<vmem>>, vector<1x16xf32>
    %5 = vector.broadcast %4 : vector<1x16xf32> to vector<256x16xf32>
    %6 = arith.mulf %3, %5 : vector<256x16xf32>
    %c0_6 = arith.constant 0 : index
    %c0_7 = arith.constant 0 : index
    %7 = vector.load %arg4[%c0_6, %c0_7] : memref<1x16xf32, #tpu.memory_space<vmem>>, vector<1x16xf32>
    %8 = vector.broadcast %7 : vector<1x16xf32> to vector<256x16xf32>
    %9 = arith.addf %6, %8 : vector<256x16xf32>
    %cst_8 = arith.constant 0.000000e+00 : f32
    %10 = vector.broadcast %cst_8 : f32 to vector<256x16xf32>
    %11 = arith.maximumf %9, %10 : vector<256x16xf32>
    %c0_9 = arith.constant 0 : index
    %c0_10 = arith.constant 0 : index
    %12 = vector.load %arg16[%c0_9, %c0_10] : memref<256x16xf32, #tpu.memory_space<vmem>>, vector<256x16xf32>
    tpu.vector_store %arg16[%c0_9, %c0_10], %11 {strides = array<i32>} : memref<256x16xf32, #tpu.memory_space<vmem>>, vector<256x16xf32>,
    %c0_11 = arith.constant 0 : index
    %c0_12 = arith.constant 0 : index
    %13 = tpu.strided_load %arg16[%c0_11, %c0_12] {strides = array<i32: 2, 1>} : memref<256x16xf32, #tpu.memory_space<vmem>>, vector<128x16xf32>
    %c1 = arith.constant 1 : index
    %c0_13 = arith.constant 0 : index
    %14 = tpu.strided_load %arg16[%c1, %c0_13] {strides = array<i32: 2, 1>} : memref<256x16xf32, #tpu.memory_space<vmem>>, vector<128x16xf32>
    %15 = arith.maximumf %13, %14 : vector<128x16xf32>
    %16 = vector.extract_strided_slice %15 {offsets = [0, 0], sizes = [8, 16], strides = [1, 1]} : vector<128x16xf32> to vector<8x16xf32>
    %17 = vector.extract_strided_slice %15 {offsets = [8, 0], sizes = [8, 16], strides = [1, 1]} : vector<128x16xf32> to vector<8x16xf32>
    %18 = arith.maximumf %16, %17 : vector<8x16xf32>
    %19 = vector.extract_strided_slice %15 {offsets = [16, 0], sizes = [8, 16], strides = [1, 1]} : vector<128x16xf32> to vector<8x16xf32>
    %20 = vector.extract_strided_slice %15 {offsets = [24, 0], sizes = [8, 16], strides = [1, 1]} : vector<128x16xf32> to vector<8x16xf32>
    %21 = arith.maximumf %19, %20 : vector<8x16xf32>
    %22 = vector.extract_strided_slice %15 {offsets = [32, 0], sizes = [8, 16], strides = [1, 1]} : vector<128x16xf32> to vector<8x16xf32>
    %23 = vector.extract_strided_slice %15 {offsets = [40, 0], sizes = [8, 16], strides = [1, 1]} : vector<128x16xf32> to vector<8x16xf32>
    %24 = arith.maximumf %22, %23 : vector<8x16xf32>
    %25 = vector.extract_strided_slice %15 {offsets = [48, 0], sizes = [8, 16], strides = [1, 1]} : vector<128x16xf32> to vector<8x16xf32>
    %26 = vector.extract_strided_slice %15 {offsets = [56, 0], sizes = [8, 16], strides = [1, 1]} : vector<128x16xf32> to vector<8x16xf32>
    %27 = arith.maximumf %25, %26 : vector<8x16xf32>
    %28 = vector.extract_strided_slice %15 {offsets = [64, 0], sizes = [8, 16], strides = [1, 1]} : vector<128x16xf32> to vector<8x16xf32>
    %29 = vector.extract_strided_slice %15 {offsets = [72, 0], sizes = [8, 16], strides = [1, 1]} : vector<128x16xf32> to vector<8x16xf32>
    %30 = arith.maximumf %28, %29 : vector<8x16xf32>
    %31 = vector.extract_strided_slice %15 {offsets = [80, 0], sizes = [8, 16], strides = [1, 1]} : vector<128x16xf32> to vector<8x16xf32>
    %32 = vector.extract_strided_slice %15 {offsets = [88, 0], sizes = [8, 16], strides = [1, 1]} : vector<128x16xf32> to vector<8x16xf32>
    %33 = arith.maximumf %31, %32 : vector<8x16xf32>
    %34 = vector.extract_strided_slice %15 {offsets = [96, 0], sizes = [8, 16], strides = [1, 1]} : vector<128x16xf32> to vector<8x16xf32>
    %35 = vector.extract_strided_slice %15 {offsets = [104, 0], sizes = [8, 16], strides = [1, 1]} : vector<128x16xf32> to vector<8x16xf32>
    %36 = arith.maximumf %34, %35 : vector<8x16xf32>
    %37 = vector.extract_strided_slice %15 {offsets = [112, 0], sizes = [8, 16], strides = [1, 1]} : vector<128x16xf32> to vector<8x16xf32>
    %38 = vector.extract_strided_slice %15 {offsets = [120, 0], sizes = [8, 16], strides = [1, 1]} : vector<128x16xf32> to vector<8x16xf32>
    %39 = arith.maximumf %37, %38 : vector<8x16xf32>
    %40 = tpu.concatenate %18, %21, %24, %27, %30, %33, %36, %39 in 0 : vector<8x16xf32>, vector<8x16xf32>, vector<8x16xf32>, vector<8x16xf32>, vector<8x16xf32>, vector<8x16xf32>, vector<8x16xf32>, vector<8x16xf32> -> vector<64x16xf32>
    %cst_14 = arith.constant 0.000000e+00 : f32
    %41 = vector.broadcast %cst_14 : f32 to vector<11x16xf32>
    %cst_15 = arith.constant 0.000000e+00 : f32
    %42 = vector.broadcast %cst_15 : f32 to vector<2x16xf32>
    %43 = vector.extract_strided_slice %40 {offsets = [0, 0], sizes = [8, 16], strides = [1, 1]} : vector<64x16xf32> to vector<8x16xf32>
    %44 = vector.extract_strided_slice %40 {offsets = [8, 0], sizes = [8, 16], strides = [1, 1]} : vector<64x16xf32> to vector<8x16xf32>
    %45 = vector.extract_strided_slice %40 {offsets = [16, 0], sizes = [8, 16], strides = [1, 1]} : vector<64x16xf32> to vector<8x16xf32>
    %46 = vector.extract_strided_slice %40 {offsets = [24, 0], sizes = [8, 16], strides = [1, 1]} : vector<64x16xf32> to vector<8x16xf32>
    %47 = vector.extract_strided_slice %40 {offsets = [32, 0], sizes = [8, 16], strides = [1, 1]} : vector<64x16xf32> to vector<8x16xf32>
    %48 = vector.extract_strided_slice %40 {offsets = [40, 0], sizes = [8, 16], strides = [1, 1]} : vector<64x16xf32> to vector<8x16xf32>
    %49 = vector.extract_strided_slice %40 {offsets = [48, 0], sizes = [8, 16], strides = [1, 1]} : vector<64x16xf32> to vector<8x16xf32>
    %50 = vector.extract_strided_slice %40 {offsets = [56, 0], sizes = [8, 16], strides = [1, 1]} : vector<64x16xf32> to vector<8x16xf32>
    %51 = tpu.concatenate %41, %43, %42, %44, %42, %45, %42, %46, %42, %47, %42, %48, %42, %49, %42, %50 in 0 : vector<11x16xf32>, vector<8x16xf32>, vector<2x16xf32>, vector<8x16xf32>, vector<2x16xf32>, vector<8x16xf32>, vector<2x16xf32>, vector<8x16xf32>, vector<2x16xf32>, vector<8x16xf32>, vector<2x16xf32>, vector<8x16xf32>, vector<2x16xf32>, vector<8x16xf32>, vector<2x16xf32>, vector<8x16xf32> -> vector<89x16xf32>
    %52 = tpu.concatenate %51, %41 in 0 : vector<89x16xf32>, vector<11x16xf32> -> vector<100x16xf32>
    %53 = vector.extract_strided_slice %52 {offsets = [0, 0], sizes = [78, 16], strides = [1, 1]} : vector<100x16xf32> to vector<78x16xf32>
    %c0_16 = arith.constant 0 : index
    %c0_17 = arith.constant 0 : index
    %54 = vector.load %arg5[%c0_16, %c0_17] : memref<144x32xf32, #tpu.memory_space<vmem>>, vector<16x32xf32>
    %cst_18 = arith.constant dense<0.000000e+00> : vector<78x32xf32>
    %55 = tpu.matmul %53, %54, %cst_18 {dimension_numbers = #tpu.dot_dimension_numbers<[1], [0], [0], [1], [0, 0, 1, 1], [], []>} : vector<78x16xf32>, vector<16x32xf32>, vector<78x32xf32> -> vector<78x32xf32>
    %56 = vector.extract_strided_slice %52 {offsets = [1, 0], sizes = [78, 16], strides = [1, 1]} : vector<100x16xf32> to vector<78x16xf32>
    %c16 = arith.constant 16 : index
    %c0_19 = arith.constant 0 : index
    %57 = vector.load %arg5[%c16, %c0_19] : memref<144x32xf32, #tpu.memory_space<vmem>>, vector<16x32xf32>
    %cst_20 = arith.constant dense<0.000000e+00> : vector<78x32xf32>
    %58 = tpu.matmul %56, %57, %cst_20 {dimension_numbers = #tpu.dot_dimension_numbers<[1], [0], [0], [1], [0, 0, 1, 1], [], []>} : vector<78x16xf32>, vector<16x32xf32>, vector<78x32xf32> -> vector<78x32xf32>
    %59 = arith.addf %55, %58 : vector<78x32xf32>
    %60 = vector.extract_strided_slice %52 {offsets = [2, 0], sizes = [78, 16], strides = [1, 1]} : vector<100x16xf32> to vector<78x16xf32>
    %c32 = arith.constant 32 : index
    %c0_21 = arith.constant 0 : index
    %61 = vector.load %arg5[%c32, %c0_21] : memref<144x32xf32, #tpu.memory_space<vmem>>, vector<16x32xf32>
    %cst_22 = arith.constant dense<0.000000e+00> : vector<78x32xf32>
    %62 = tpu.matmul %60, %61, %cst_22 {dimension_numbers = #tpu.dot_dimension_numbers<[1], [0], [0], [1], [0, 0, 1, 1], [], []>} : vector<78x16xf32>, vector<16x32xf32>, vector<78x32xf32> -> vector<78x32xf32>
    %63 = arith.addf %59, %62 : vector<78x32xf32>
    %64 = vector.extract_strided_slice %52 {offsets = [10, 0], sizes = [78, 16], strides = [1, 1]} : vector<100x16xf32> to vector<78x16xf32>
    %c48 = arith.constant 48 : index
    %c0_23 = arith.constant 0 : index
    %65 = vector.load %arg5[%c48, %c0_23] : memref<144x32xf32, #tpu.memory_space<vmem>>, vector<16x32xf32>
    %cst_24 = arith.constant dense<0.000000e+00> : vector<78x32xf32>
    %66 = tpu.matmul %64, %65, %cst_24 {dimension_numbers = #tpu.dot_dimension_numbers<[1], [0], [0], [1], [0, 0, 1, 1], [], []>} : vector<78x16xf32>, vector<16x32xf32>, vector<78x32xf32> -> vector<78x32xf32>
    %67 = arith.addf %63, %66 : vector<78x32xf32>
    %68 = vector.extract_strided_slice %52 {offsets = [11, 0], sizes = [78, 16], strides = [1, 1]} : vector<100x16xf32> to vector<78x16xf32>
    %c64 = arith.constant 64 : index
    %c0_25 = arith.constant 0 : index
    %69 = vector.load %arg5[%c64, %c0_25] : memref<144x32xf32, #tpu.memory_space<vmem>>, vector<16x32xf32>
    %cst_26 = arith.constant dense<0.000000e+00> : vector<78x32xf32>
    %70 = tpu.matmul %68, %69, %cst_26 {dimension_numbers = #tpu.dot_dimension_numbers<[1], [0], [0], [1], [0, 0, 1, 1], [], []>} : vector<78x16xf32>, vector<16x32xf32>, vector<78x32xf32> -> vector<78x32xf32>
    %71 = arith.addf %67, %70 : vector<78x32xf32>
    %72 = vector.extract_strided_slice %52 {offsets = [12, 0], sizes = [78, 16], strides = [1, 1]} : vector<100x16xf32> to vector<78x16xf32>
    %c80 = arith.constant 80 : index
    %c0_27 = arith.constant 0 : index
    %73 = vector.load %arg5[%c80, %c0_27] : memref<144x32xf32, #tpu.memory_space<vmem>>, vector<16x32xf32>
    %cst_28 = arith.constant dense<0.000000e+00> : vector<78x32xf32>
    %74 = tpu.matmul %72, %73, %cst_28 {dimension_numbers = #tpu.dot_dimension_numbers<[1], [0], [0], [1], [0, 0, 1, 1], [], []>} : vector<78x16xf32>, vector<16x32xf32>, vector<78x32xf32> -> vector<78x32xf32>
    %75 = arith.addf %71, %74 : vector<78x32xf32>
    %76 = vector.extract_strided_slice %52 {offsets = [20, 0], sizes = [78, 16], strides = [1, 1]} : vector<100x16xf32> to vector<78x16xf32>
    %c96 = arith.constant 96 : index
    %c0_29 = arith.constant 0 : index
    %77 = vector.load %arg5[%c96, %c0_29] : memref<144x32xf32, #tpu.memory_space<vmem>>, vector<16x32xf32>
    %cst_30 = arith.constant dense<0.000000e+00> : vector<78x32xf32>
    %78 = tpu.matmul %76, %77, %cst_30 {dimension_numbers = #tpu.dot_dimension_numbers<[1], [0], [0], [1], [0, 0, 1, 1], [], []>} : vector<78x16xf32>, vector<16x32xf32>, vector<78x32xf32> -> vector<78x32xf32>
    %79 = arith.addf %75, %78 : vector<78x32xf32>
    %80 = vector.extract_strided_slice %52 {offsets = [21, 0], sizes = [78, 16], strides = [1, 1]} : vector<100x16xf32> to vector<78x16xf32>
    %c112 = arith.constant 112 : index
    %c0_31 = arith.constant 0 : index
    %81 = vector.load %arg5[%c112, %c0_31] : memref<144x32xf32, #tpu.memory_space<vmem>>, vector<16x32xf32>
    %cst_32 = arith.constant dense<0.000000e+00> : vector<78x32xf32>
    %82 = tpu.matmul %80, %81, %cst_32 {dimension_numbers = #tpu.dot_dimension_numbers<[1], [0], [0], [1], [0, 0, 1, 1], [], []>} : vector<78x16xf32>, vector<16x32xf32>, vector<78x32xf32> -> vector<78x32xf32>
    %83 = arith.addf %79, %82 : vector<78x32xf32>
    %84 = vector.extract_strided_slice %52 {offsets = [22, 0], sizes = [78, 16], strides = [1, 1]} : vector<100x16xf32> to vector<78x16xf32>
    %c128 = arith.constant 128 : index
    %c0_33 = arith.constant 0 : index
    %85 = vector.load %arg5[%c128, %c0_33] : memref<144x32xf32, #tpu.memory_space<vmem>>, vector<16x32xf32>
    %cst_34 = arith.constant dense<0.000000e+00> : vector<78x32xf32>
    %86 = tpu.matmul %84, %85, %cst_34 {dimension_numbers = #tpu.dot_dimension_numbers<[1], [0], [0], [1], [0, 0, 1, 1], [], []>} : vector<78x16xf32>, vector<16x32xf32>, vector<78x32xf32> -> vector<78x32xf32>
    %87 = arith.addf %83, %86 : vector<78x32xf32>
    %c0_35 = arith.constant 0 : index
    %c0_36 = arith.constant 0 : index
    %88 = vector.load %arg6[%c0_35, %c0_36] : memref<1x32xf32, #tpu.memory_space<vmem>>, vector<1x32xf32>
    %89 = vector.broadcast %88 : vector<1x32xf32> to vector<78x32xf32>
    %90 = arith.mulf %87, %89 : vector<78x32xf32>
    %c0_37 = arith.constant 0 : index
    %c0_38 = arith.constant 0 : index
    %91 = vector.load %arg7[%c0_37, %c0_38] : memref<1x32xf32, #tpu.memory_space<vmem>>, vector<1x32xf32>
    %92 = vector.broadcast %91 : vector<1x32xf32> to vector<78x32xf32>
    %93 = arith.addf %90, %92 : vector<78x32xf32>
    %cst_39 = arith.constant 0.000000e+00 : f32
    %94 = vector.broadcast %cst_39 : f32 to vector<78x32xf32>
    %95 = arith.maximumf %93, %94 : vector<78x32xf32>
    %c0_40 = arith.constant 0 : index
    %c0_41 = arith.constant 0 : index
    %96 = vector.load %arg17[%c0_40, %c0_41] : memref<78x32xf32, #tpu.memory_space<vmem>>, vector<78x32xf32>
    tpu.vector_store %arg17[%c0_40, %c0_41], %95 {strides = array<i32>} : memref<78x32xf32, #tpu.memory_space<vmem>>, vector<78x32xf32>,
    %c0_42 = arith.constant 0 : index
    %c0_43 = arith.constant 0 : index
    %97 = tpu.strided_load %arg17[%c0_42, %c0_43] {strides = array<i32: 2, 1>} : memref<78x32xf32, #tpu.memory_space<vmem>>, vector<39x32xf32>
    %c1_44 = arith.constant 1 : index
    %c0_45 = arith.constant 0 : index
    %98 = tpu.strided_load %arg17[%c1_44, %c0_45] {strides = array<i32: 2, 1>} : memref<78x32xf32, #tpu.memory_space<vmem>>, vector<39x32xf32>
    %99 = arith.maximumf %97, %98 : vector<39x32xf32>
    %100 = vector.extract_strided_slice %99 {offsets = [0, 0], sizes = [4, 32], strides = [1, 1]} : vector<39x32xf32> to vector<4x32xf32>
    %101 = vector.extract_strided_slice %99 {offsets = [5, 0], sizes = [4, 32], strides = [1, 1]} : vector<39x32xf32> to vector<4x32xf32>
    %102 = arith.maximumf %100, %101 : vector<4x32xf32>
    %103 = vector.extract_strided_slice %99 {offsets = [10, 0], sizes = [4, 32], strides = [1, 1]} : vector<39x32xf32> to vector<4x32xf32>
    %104 = vector.extract_strided_slice %99 {offsets = [15, 0], sizes = [4, 32], strides = [1, 1]} : vector<39x32xf32> to vector<4x32xf32>
    %105 = arith.maximumf %103, %104 : vector<4x32xf32>
    %106 = vector.extract_strided_slice %99 {offsets = [20, 0], sizes = [4, 32], strides = [1, 1]} : vector<39x32xf32> to vector<4x32xf32>
    %107 = vector.extract_strided_slice %99 {offsets = [25, 0], sizes = [4, 32], strides = [1, 1]} : vector<39x32xf32> to vector<4x32xf32>
    %108 = arith.maximumf %106, %107 : vector<4x32xf32>
    %109 = vector.extract_strided_slice %99 {offsets = [30, 0], sizes = [4, 32], strides = [1, 1]} : vector<39x32xf32> to vector<4x32xf32>
    %110 = vector.extract_strided_slice %99 {offsets = [35, 0], sizes = [4, 32], strides = [1, 1]} : vector<39x32xf32> to vector<4x32xf32>
    %111 = arith.maximumf %109, %110 : vector<4x32xf32>
    %112 = tpu.concatenate %102, %105, %108, %111 in 0 : vector<4x32xf32>, vector<4x32xf32>, vector<4x32xf32>, vector<4x32xf32> -> vector<16x32xf32>
    %113 = vector.extract_strided_slice %112 {offsets = [0, 0], sizes = [1, 32], strides = [1, 1]} : vector<16x32xf32> to vector<1x32xf32>
    %114 = vector.extract_strided_slice %112 {offsets = [1, 0], sizes = [1, 32], strides = [1, 1]} : vector<16x32xf32> to vector<1x32xf32>
    %115 = vector.extract_strided_slice %112 {offsets = [2, 0], sizes = [1, 32], strides = [1, 1]} : vector<16x32xf32> to vector<1x32xf32>
    %116 = vector.extract_strided_slice %112 {offsets = [3, 0], sizes = [1, 32], strides = [1, 1]} : vector<16x32xf32> to vector<1x32xf32>
    %117 = vector.extract_strided_slice %112 {offsets = [4, 0], sizes = [1, 32], strides = [1, 1]} : vector<16x32xf32> to vector<1x32xf32>
    %118 = vector.extract_strided_slice %112 {offsets = [5, 0], sizes = [1, 32], strides = [1, 1]} : vector<16x32xf32> to vector<1x32xf32>
    %119 = vector.extract_strided_slice %112 {offsets = [6, 0], sizes = [1, 32], strides = [1, 1]} : vector<16x32xf32> to vector<1x32xf32>
    %120 = vector.extract_strided_slice %112 {offsets = [7, 0], sizes = [1, 32], strides = [1, 1]} : vector<16x32xf32> to vector<1x32xf32>
    %121 = vector.extract_strided_slice %112 {offsets = [8, 0], sizes = [1, 32], strides = [1, 1]} : vector<16x32xf32> to vector<1x32xf32>
    %122 = vector.extract_strided_slice %112 {offsets = [9, 0], sizes = [1, 32], strides = [1, 1]} : vector<16x32xf32> to vector<1x32xf32>
    %123 = vector.extract_strided_slice %112 {offsets = [10, 0], sizes = [1, 32], strides = [1, 1]} : vector<16x32xf32> to vector<1x32xf32>
    %124 = vector.extract_strided_slice %112 {offsets = [11, 0], sizes = [1, 32], strides = [1, 1]} : vector<16x32xf32> to vector<1x32xf32>
    %125 = vector.extract_strided_slice %112 {offsets = [12, 0], sizes = [1, 32], strides = [1, 1]} : vector<16x32xf32> to vector<1x32xf32>
    %126 = vector.extract_strided_slice %112 {offsets = [13, 0], sizes = [1, 32], strides = [1, 1]} : vector<16x32xf32> to vector<1x32xf32>
    %127 = vector.extract_strided_slice %112 {offsets = [14, 0], sizes = [1, 32], strides = [1, 1]} : vector<16x32xf32> to vector<1x32xf32>
    %128 = vector.extract_strided_slice %112 {offsets = [15, 0], sizes = [1, 32], strides = [1, 1]} : vector<16x32xf32> to vector<1x32xf32>
    %129 = tpu.concatenate %113, %114, %115, %116, %117, %118, %119, %120, %121, %122, %123, %124, %125, %126, %127, %128 in 1 : vector<1x32xf32>, vector<1x32xf32>, vector<1x32xf32>, vector<1x32xf32>, vector<1x32xf32>, vector<1x32xf32>, vector<1x32xf32>, vector<1x32xf32>, vector<1x32xf32>, vector<1x32xf32>, vector<1x32xf32>, vector<1x32xf32>, vector<1x32xf32>, vector<1x32xf32>, vector<1x32xf32>, vector<1x32xf32> -> vector<1x512xf32>
    %c0_46 = arith.constant 0 : index
    %c0_47 = arith.constant 0 : index
    %c0_48 = arith.constant 0 : index
    %130 = vector.load %arg15[%c0_46, %c0_47, %c0_48] : memref<1x1x512xf32, #tpu.memory_space<vmem>>, vector<1x1x512xf32>
    %131 = vector.shape_cast %130 : vector<1x1x512xf32> to vector<1x512xf32>
    %132 = vector.shape_cast %129 : vector<1x512xf32> to vector<1x1x512xf32>
    tpu.vector_store %arg15[%c0_46, %c0_47, %c0_48], %132 {strides = array<i32>} : memref<1x1x512xf32, #tpu.memory_space<vmem>>, vector<1x1x512xf32>,
    %c0_49 = arith.constant 0 : index
    %c0_50 = arith.constant 0 : index
    %133 = vector.load %arg8[%c0_49, %c0_50] : memref<512x512xf32, #tpu.memory_space<vmem>>, vector<512x512xf32>
    %cst_51 = arith.constant dense<0.000000e+00> : vector<1x512xf32>
    %134 = tpu.matmul %129, %133, %cst_51 {dimension_numbers = #tpu.dot_dimension_numbers<[1], [0], [0], [1], [0, 0, 1, 1], [], []>} : vector<1x512xf32>, vector<512x512xf32>, vector<1x512xf32> -> vector<1x512xf32>
    %c0_52 = arith.constant 0 : index
    %c0_53 = arith.constant 0 : index
    %135 = vector.load %arg9[%c0_52, %c0_53] : memref<1x512xf32, #tpu.memory_space<vmem>>, vector<1x512xf32>
    %136 = arith.addf %134, %135 : vector<1x512xf32>
    %cst_54 = arith.constant 0.000000e+00 : f32
    %137 = vector.broadcast %cst_54 : f32 to vector<1x512xf32>
    %138 = arith.maximumf %136, %137 : vector<1x512xf32>
    %c0_55 = arith.constant 0 : index
    %c0_56 = arith.constant 0 : index
    %139 = vector.load %arg10[%c0_55, %c0_56] : memref<512x512xf32, #tpu.memory_space<vmem>>, vector<512x512xf32>
    %cst_57 = arith.constant dense<0.000000e+00> : vector<1x512xf32>
    %140 = tpu.matmul %138, %139, %cst_57 {dimension_numbers = #tpu.dot_dimension_numbers<[1], [0], [0], [1], [0, 0, 1, 1], [], []>} : vector<1x512xf32>, vector<512x512xf32>, vector<1x512xf32> -> vector<1x512xf32>
    %c0_58 = arith.constant 0 : index
    %c0_59 = arith.constant 0 : index
    %141 = vector.load %arg11[%c0_58, %c0_59] : memref<1x512xf32, #tpu.memory_space<vmem>>, vector<1x512xf32>
    %142 = arith.addf %140, %141 : vector<1x512xf32>
    %cst_60 = arith.constant 0.000000e+00 : f32
    %143 = vector.broadcast %cst_60 : f32 to vector<1x512xf32>
    %144 = arith.maximumf %142, %143 : vector<1x512xf32>
    %c0_61 = arith.constant 0 : index
    %c0_62 = arith.constant 0 : index
    %145 = vector.load %arg12[%c0_61, %c0_62] : memref<512x10xf32, #tpu.memory_space<vmem>>, vector<512x10xf32>
    %cst_63 = arith.constant dense<0.000000e+00> : vector<1x10xf32>
    %146 = tpu.matmul %144, %145, %cst_63 {dimension_numbers = #tpu.dot_dimension_numbers<[1], [0], [0], [1], [0, 0, 1, 1], [], []>} : vector<1x512xf32>, vector<512x10xf32>, vector<1x10xf32> -> vector<1x10xf32>
    %c0_64 = arith.constant 0 : index
    %c0_65 = arith.constant 0 : index
    %147 = vector.load %arg13[%c0_64, %c0_65] : memref<1x10xf32, #tpu.memory_space<vmem>>, vector<1x10xf32>
    %148 = arith.addf %146, %147 : vector<1x10xf32>
    %c0_66 = arith.constant 0 : index
    %c0_67 = arith.constant 0 : index
    %c0_68 = arith.constant 0 : index
    %149 = vector.load %arg14[%c0_66, %c0_67, %c0_68] : memref<1x1x10xf32, #tpu.memory_space<vmem>>, vector<1x1x10xf32>
    %150 = vector.shape_cast %149 : vector<1x1x10xf32> to vector<1x10xf32>
    %151 = vector.shape_cast %148 : vector<1x10xf32> to vector<1x1x10xf32>
    tpu.vector_store %arg14[%c0_66, %c0_67, %c0_68], %151 {strides = array<i32>} : memref<1x1x10xf32, #tpu.memory_space<vmem>>, vector<1x1x10xf32>,
    return
  }
  func.func @transform_0(%arg0: i32) -> (i32, i32, i32) {
    %c0_i32 = arith.constant 0 : i32
    %c0_i32_0 = arith.constant 0 : i32
    %c0_i32_1 = arith.constant 0 : i32
    return %arg0, %c0_i32, %c0_i32_0 : i32, i32, i32
  }
  func.func @transform_1(%arg0: i32) -> (i32, i32) {
    %c0_i32 = arith.constant 0 : i32
    %c0_i32_0 = arith.constant 0 : i32
    %c0_i32_1 = arith.constant 0 : i32
    return %c0_i32, %c0_i32_0 : i32, i32
  }
  func.func @transform_2(%arg0: i32) -> (i32, i32) {
    %c0_i32 = arith.constant 0 : i32
    %c0_i32_0 = arith.constant 0 : i32
    %c0_i32_1 = arith.constant 0 : i32
    return %c0_i32, %c0_i32_0 : i32, i32
  }
  func.func @transform_3(%arg0: i32) -> (i32, i32) {
    %c0_i32 = arith.constant 0 : i32
    %c0_i32_0 = arith.constant 0 : i32
    %c0_i32_1 = arith.constant 0 : i32
    return %c0_i32, %c0_i32_0 : i32, i32
  }
  func.func @transform_4(%arg0: i32) -> (i32, i32) {
    %c0_i32 = arith.constant 0 : i32
    %c0_i32_0 = arith.constant 0 : i32
    %c0_i32_1 = arith.constant 0 : i32
    return %c0_i32, %c0_i32_0 : i32, i32
  }
  func.func @transform_5(%arg0: i32) -> (i32, i32) {
    %c0_i32 = arith.constant 0 : i32
    %c0_i32_0 = arith.constant 0 : i32
    %c0_i32_1 = arith.constant 0 : i32
    return %c0_i32, %c0_i32_0 : i32, i32
  }
  func.func @transform_6(%arg0: i32) -> (i32, i32) {
    %c0_i32 = arith.constant 0 : i32
    %c0_i32_0 = arith.constant 0 : i32
    %c0_i32_1 = arith.constant 0 : i32
    return %c0_i32, %c0_i32_0 : i32, i32
  }
  func.func @transform_7(%arg0: i32) -> (i32, i32) {
    %c0_i32 = arith.constant 0 : i32
    %c0_i32_0 = arith.constant 0 : i32
    %c0_i32_1 = arith.constant 0 : i32
    return %c0_i32, %c0_i32_0 : i32, i32
  }
  func.func @transform_8(%arg0: i32) -> (i32, i32) {
    %c0_i32 = arith.constant 0 : i32
    %c0_i32_0 = arith.constant 0 : i32
    %c0_i32_1 = arith.constant 0 : i32
    return %c0_i32, %c0_i32_0 : i32, i32
  }
  func.func @transform_9(%arg0: i32) -> (i32, i32) {
    %c0_i32 = arith.constant 0 : i32
    %c0_i32_0 = arith.constant 0 : i32
    %c0_i32_1 = arith.constant 0 : i32
    return %c0_i32, %c0_i32_0 : i32, i32
  }
  func.func @transform_10(%arg0: i32) -> (i32, i32) {
    %c0_i32 = arith.constant 0 : i32
    %c0_i32_0 = arith.constant 0 : i32
    %c0_i32_1 = arith.constant 0 : i32
    return %c0_i32, %c0_i32_0 : i32, i32
  }
  func.func @transform_11(%arg0: i32) -> (i32, i32) {
    %c0_i32 = arith.constant 0 : i32
    %c0_i32_0 = arith.constant 0 : i32
    %c0_i32_1 = arith.constant 0 : i32
    return %c0_i32, %c0_i32_0 : i32, i32
  }
  func.func @transform_12(%arg0: i32) -> (i32, i32) {
    %c0_i32 = arith.constant 0 : i32
    %c0_i32_0 = arith.constant 0 : i32
    %c0_i32_1 = arith.constant 0 : i32
    return %c0_i32, %c0_i32_0 : i32, i32
  }
  func.func @transform_13(%arg0: i32) -> (i32, i32, i32) {
    %c0_i32 = arith.constant 0 : i32
    %c0_i32_0 = arith.constant 0 : i32
    %c0_i32_1 = arith.constant 0 : i32
    return %arg0, %c0_i32, %c0_i32_0 : i32, i32, i32
  }
  func.func @transform_14(%arg0: i32) -> (i32, i32, i32) {
    %c0_i32 = arith.constant 0 : i32
    %c0_i32_0 = arith.constant 0 : i32
    %c0_i32_1 = arith.constant 0 : i32
    return %arg0, %c0_i32, %c0_i32_0 : i32, i32, i32
  }
}

</mosaic_0001>

<bundles_post_ra>
// kernel: vgg_forward.1
= control target key start
LH: loop header
LB: loop body
LE: loop exit
PB: predicated region body
PF: predicated region fallthrough
CT: control target
= control target key end

     0   :  { %s7021_s0 = inlined_call_operand.vmem [shape: f32[2,256,27], index: 0, kind: input, shape index: {}]   ;;  %s7022_s1 = inlined_call_operand.vmem [shape: f32[27,16], index: 1, kind: input, shape index: {}]   ;;  %s7023_s2 = inlined_call_operand.vmem [shape: f32[1,16], index: 2, kind: input, shape index: {}]   ;;  %s7024_s3 = inlined_call_operand.vmem [shape: f32[1,16], index: 3, kind: input, shape index: {}]   ;;  %s7025_s4 = inlined_call_operand.vmem [shape: f32[144,32], index: 4, kind: input, shape index: {}]   ;;  %s7026_s5 = inlined_call_operand.vmem [shape: f32[1,32], index: 5, kind: input, shape index: {}]   ;;  %s7027_s6 = inlined_call_operand.vmem [shape: f32[1,32], index: 6, kind: input, shape index: {}]   ;;  %s7028_s7 = inlined_call_operand.vmem [shape: f32[512,512], index: 7, kind: input, shape index: {}]   ;;  %s7029_s8 = inlined_call_operand.vmem [shape: f32[1,512], index: 8, kind: input, shape index: {}]   ;;  %s7030_s9 = inlined_call_operand.hbm [shape: f32[512,512], index: 9, kind: input, shape index: {}]   ;;  %s7031_s10 = inlined_call_operand.vmem [shape: f32[1,512], index: 10, kind: input, shape index: {}]   ;;  %s7032_s11 = inlined_call_operand.vmem [shape: f32[512,10], index: 11, kind: input, shape index: {}]   ;;  %s7033_s12 = inlined_call_operand.vmem [shape: f32[1,10], index: 12, kind: input, shape index: {}]   ;;  %s7034_s13 = inlined_call_operand.hbm [shape: f32[2,1,10], index: 13, kind: output, shape index: {0}]   ;;  %s7035_s14 = inlined_call_operand.vmem [shape: f32[2,1,512], index: 14, kind: output, shape index: {1}]  }
   0x1   :  { %7037 = sst [smem:[#allocation15_spill]] %s7021_s0 }
   0x2   :  { %7038 = sst [smem:[#allocation16_spill]] %s7022_s1 }
   0x3   :  { %7039 = sst [smem:[#allocation17_spill]] %s7023_s2 }
   0x4   :  { %20 = vsyncpa [#allocation5], 0 }
   0x5   :  { %21 = vsyncpa [#allocation6], 0 }
   0x6   :  { %23 = vsyncpa [#allocation6 + $0x1], 0  ;;  %s5020_s29 = smov 0   ;;  %s5022_s30 = smov 0  }
   0x7   :  { %s5024_s15 = smov 0   ;;  %s5026_s16 = smov 0  }
   0x8 LB: > { %7040 = sst [smem:[#allocation10_spill]] %s4930_s15  ;;  %s5041_s17 = sadd.s32 4294967295, %s4934_s16   ;;  %s4934_s16 = sphi %s5026_s16, %s7059_s16   ;;  %s4930_s15 = sphi %s5024_s15, %s7056_s15   ;;  %s4926_s30 = sphi %s5022_s30, %s7058_s30   ;;  %s4922_s29 = sphi %s5020_s29, %s7057_s29  }
   0x9   : > { %s4203_s18 = sadd.s32 4294967294, %s4934_s16   ;;  %s5045_s19 = sadd.s32 1, %s4934_s16  }
   0xa   : > { %s314_s20 = sadd.s32 1, %s4930_s15  ;;  %s311_s21 = ssub.s32 %s4934_s16, %s5045_s19 }
   0xb   : > { %p324_p0 = scmp.ne.s32.totalorder %s4930_s15, %s4926_s30  ;;  %p312_p1 = scmp.eq.s32.totalorder %s311_s21, 0 }
   0xc   : > { %p325_p2 = scmp.eq.s32.totalorder %s5041_s17, 1  ;;  %p330_p3 = scmp.ne.s32.totalorder %s4926_s30, %s4922_s29 }
   0xd   : > { %p331_p4 = scmp.eq.s32.totalorder %s4203_s18, 1  ;;  %p4204_p7 = scmp.ge.s32.totalorder %s4934_s16, 1 }
   0xe   : > { %s5056_s22 = scalar_select %p312_p1, %s4930_s15, %s314_s20  }
   0xf   : > { %p5058_p5 = por %p325_p2, %p324_p0  ;;  %p5062_p6 = por %p331_p4, %p330_p3 }
  0x10   : > { %7041 = sst [smem:[#allocation11_spill]] %s5056_s22  ;;  %p364_p8 = scmp.lt.s32.totalorder %s4934_s16, 3 }
  0x11   : > { %s7043_s24 = scalar_select %p5062_p6, 1, 0 }
  0x12   : > { %p4801_p9 = scmp.eq.s32.totalorder %s5041_s17, 0  ;;  %p5069_p10 = pnand %p4204_p7, %p364_p8 }
  0x13   : > { %s4936_s26 = smov [#allocation4]  }
  0x14   : > { %s400_s27 = sshll.u32 %s4936_s26, 4  ;;  %p4793_p11 = pneg %p5069_p10  ;;  %s401_s27 = int_to_ptr.vmem [resolvable:$true] %s400_s27 }
  0x15   : > { %s4855_s28 = scalar_lea.vmem %s401_s27, 32768  ;;  %p4863_p3 = scmp.lt.s32.totalorder %s401_s27, %s401_s27 }
  0x16   : > { %p4794_p12 = pnand %p4801_p9, %p4793_p11  ;;  %p4856_p0 = scmp.ne.s32.totalorder %s401_s27, %s4855_s28 }
  0x17   : > { %p4864_p4 = scmp.lt.s32.totalorder %s4855_s28, %s4855_s28 }
  0x18   : > { %p4846_p13 = pneg %p4794_p12 }
  0x19   : > { %p4865_p6 = por %p4864_p4, %p4863_p3 }
  0x1a   : > { %p4858_p1 = pnand %p4856_p0, %p4846_p13 }
  0x1c   : > { %p4859_p2 = pneg %p4858_p1 }
  0x1e   : > { %p4866_p7 = pnand %p4865_p6, %p4859_p2 }
  0x20   : > { %4869 = shalt.err (!%p4866_p7)
}
  0x21   : > { %s4937_s18 = smov 512   ;;  %s4938_s20 = smov 32  }
  0x22   : > { %4796 = dma.hbm_to_vmem [thread:$0]  (!%p4794_p12), %s7030_s9, 32768, %s401_s27, [#allocation5], %s4937_s18, %s4937_s18, %s4938_s20  }
  0x23   : > { %433 = sbr.rel (%p5069_p10) target bundleno = 1531 (0x5fb), region = 72 }
  0x28   : > { %4913 = dma.done.wait (%p4801_p9), [#allocation5], 32768  }
  0x29   : > { %4915 = vsyncadd (%p4801_p9), [#allocation5], 4294934528  ;;  %p482_p8 = scmp.lt.s32.totalorder %s5041_s17, 1  ;;  %vm624_vm0 = vcmask 1042432   ;;  %s7045_s0 = sld [smem:[#allocation15_spill]]  ;;  %vm527_vm1 = vcmask 220160  }
  0x2a   : > { %s7046_s1 = sld [smem:[#allocation16_spill]]  ;;  %v1129_v36 = vld [vmem:[%s7025_s4 + $0x18] sm:$0xff]  ;;  %v1128_v37 = vld [vmem:[%s7025_s4 + $0x10] sm:$0xff]  ;;  %v5183_v38 = vld [vmem:[%s7025_s4 + $0x48] sm:$0xff]  ;;  %vm963_vm2 = vcmask 130048   ;;  %vm1112_vm3 = vcmask 1046528  }
  0x2b   : > { %s5088_s26 = scalar_select %p482_p8, %s5041_s17, 1  ;;  %4612 = vmatprep.subr.mxu1 %v1129_v36  ;;  %v5190_v39 = vld [vmem:[%s7025_s4 + $0x40] sm:$0xff]  ;;  %v5197_v40 = vld [vmem:[%s7025_s4 + $0x8] sm:$0xff]  ;;  %vm1109_vm4 = vcmask 1044480   ;;  %vm1901_vm5 = vcmask 1043456   ;;  %vm1431_vm6 = vcmask 1045504  }
  0x2c   : > { %4613 = vmatpush3.msra.mxu1 %v1129_v36  ;;  %v5203_v41 = vld [vmem:[%s7025_s4 + $0x68] sm:$0xff]  ;;  %s7047_s2 = sld [smem:[#allocation17_spill]]  ;;  %v5214_v44 = vld [vmem:[%s7024_s3] ss:$0 sm:$0xff]  ;;  %vm1115_vm7 = vcmask 1040384   ;;  %vm2369_vm8 = vcmask 1041408  }
  0x2d   : > { %s4341_s28 = sshll.u32 %s5088_s26, 8  ;;  %4614 = vmatprep.subr.mxu1 %v1128_v37  ;;  %vm2580_vm9 = vcmask 261120   ;;  %vm2590_vm10 = vcmask 259072   ;;  %s4940_s21 = smov 64   ;;  %vm2706_vm11 = vcmask 523264   ;;  %vm2708_vm12 = vcmask 785408  }
  0x2e   : > { %4615 = vmatpush3.msra.mxu1 %v1128_v37  ;;  %s4941_s15 = smov 32   ;;  %s4211_s22 = sshll.u32 %s5088_s26, 2  ;;  %vm4090_vm14 = vcmask 73728  }
  0x2f   : > { %s5094_s27 = scalar_lea.vmem %s7045_s0, %s4341_s28  ;;  %4631 = vmatprep.subr.mxu1 %v5197_v40  ;;  %s490_s18 = scalar_lea.vmem %s7035_s14, %s4211_s22 }
  0x30   : > { %v526_v0 = vld [vmem:[%s7046_s1 + $0x18] sm:$0x7]  ;;  %v525_v1 = vld [vmem:[%s7046_s1 + $0x10] sm:$0xff]  ;;  %v491_v2 = vld [vmem:[%s5094_s27] sm:$0xff]  ;;  %s4338_s25 = sshll.u32 %s5041_s17, 4  ;;  %s4944_s26 = smov [#allocation7]  }
  0x31   : > { %4556 = vmatprep.subr.msk.mxu0 %vm624_vm0, %v526_v0  ;;  %v524_v3 = vld [vmem:[%s7046_s1 + $0x8] sm:$0xff]  ;;  %4564 = vmatprep.mubr.msk.f32.mxu0 %vm527_vm1, %v491_v2  ;;  %v523_v4 = vld [vmem:[%s7046_s1] sm:$0xff]  ;;  %v493_v6 = vld [vmem:[%s5094_s27 + $0x10] sm:$0xff]  ;;  %s4107_s20 = scalar_lea.hbm %s7034_s13, %s4338_s25  ;;  %s4874_s17 = sshll.u32 %s4944_s26, 4  ;;  %s4875_s17 = int_to_ptr.vmem [resolvable:$false] %s4874_s17 }
  0x32   : > { %4557 = vmatpush3.msk.msra.mxu0 %vm624_vm0, %v526_v0  ;;  %v492_v5 = vld [vmem:[%s5094_s27 + $0x8] sm:$0xff]  ;;  %v494_v7 = vld [vmem:[%s5094_s27 + $0x18] sm:$0xff]  ;;  %v495_v8 = vld [vmem:[%s5094_s27 + $0x20] sm:$0xff]  ;;  %s4876_s22 = scalar_lea.vmem %s4875_s17, 32 }
  0x33   : > { %4558 = vmatprep.subr.mxu0 %v525_v1  ;;  %v496_v9 = vld [vmem:[%s5094_s27 + $0x28] sm:$0xff]  ;;  %v497_v10 = vld [vmem:[%s5094_s27 + $0x30] sm:$0xff]  ;;  %v498_v11 = vld [vmem:[%s5094_s27 + $0x38] sm:$0xff] }
  0x34   : > { %4559 = vmatpush3.msra.mxu0 %v525_v1  ;;  %v499_v12 = vld [vmem:[%s5094_s27 + $0x40] sm:$0xff]  ;;  %v500_v13 = vld [vmem:[%s5094_s27 + $0x48] sm:$0xff]  ;;  %v501_v14 = vld [vmem:[%s5094_s27 + $0x50] sm:$0xff] }
  0x35   : > { %4560 = vmatprep.subr.mxu0 %v524_v3  ;;  %v502_v15 = vld [vmem:[%s5094_s27 + $0x58] sm:$0xff]  ;;  %v503_v16 = vld [vmem:[%s5094_s27 + $0x60] sm:$0xff]  ;;  %v504_v17 = vld [vmem:[%s5094_s27 + $0x68] sm:$0xff] }
  0x36   : > { %4561 = vmatpush3.msra.mxu0 %v524_v3  ;;  %v505_v18 = vld [vmem:[%s5094_s27 + $0x70] sm:$0xff]  ;;  %v506_v19 = vld [vmem:[%s5094_s27 + $0x78] sm:$0xff]  ;;  %v507_v20 = vld [vmem:[%s5094_s27 + $0x80] sm:$0xff] }
  0x37   : > { %4562 = vmatprep.subr.mxu0 %v523_v4  ;;  %v508_v21 = vld [vmem:[%s5094_s27 + $0x88] sm:$0xff]  ;;  %v509_v22 = vld [vmem:[%s5094_s27 + $0x90] sm:$0xff]  ;;  %v510_v23 = vld [vmem:[%s5094_s27 + $0x98] sm:$0xff] }
  0x38   : > { %4563 = vmatpush3.msra.mxu0 %v523_v4  ;;  %v511_v24 = vld [vmem:[%s5094_s27 + $0xa0] sm:$0xff]  ;;  %v512_v25 = vld [vmem:[%s5094_s27 + $0xa8] sm:$0xff]  ;;  %v513_v26 = vld [vmem:[%s5094_s27 + $0xb0] sm:$0xff] }
  0x39   : > { %4565 = vmatmul.mubr.msk.f32.vlgmr.msra.gmra.mxu0 %vm527_vm1, %v492_v5  ;;  %v514_v27 = vld [vmem:[%s5094_s27 + $0xb8] sm:$0xff]  ;;  %v515_v28 = vld [vmem:[%s5094_s27 + $0xc0] sm:$0xff]  ;;  %v516_v29 = vld [vmem:[%s5094_s27 + $0xc8] sm:$0xff]  ;;  %4688 = vmatprep.subr.mxu0 %v5183_v38 }
  0x3a   : > { %4567 = vmatprep.mubr.msk.f32.mxu0 %vm527_vm1, %v493_v6  ;;  %v517_v30 = vld [vmem:[%s5094_s27 + $0xd0] sm:$0xff]  ;;  %v518_v31 = vld [vmem:[%s5094_s27 + $0xd8] sm:$0xff]  ;;  %v519_v32 = vld [vmem:[%s5094_s27 + $0xe0] sm:$0xff]  ;;  %4689 = vmatpush3.msra.mxu0 %v5183_v38 }
  0x3b   : > { %v520_v33 = vld [vmem:[%s5094_s27 + $0xe8] sm:$0xff]  ;;  %v521_v34 = vld [vmem:[%s5094_s27 + $0xf0] sm:$0xff]  ;;  %v522_v35 = vld [vmem:[%s5094_s27 + $0xf8] sm:$0xff]  ;;  %4690 = vmatprep.subr.mxu0 %v5190_v39  ;;  %s4942_s27 = smov 96  }
  0x3c   : > { %4691 = vmatpush3.msra.mxu0 %v5190_v39  ;;  %v5209_v42 = vld [vmem:[%s7047_s2] ss:$0 sm:$0xff] }
  0x3d   : > { %4568 = vmatmul.mubr.msk.f32.gmra.mxu0 %vm527_vm1, %v494_v7  ;;  %4726 = vmatprep.subr.mxu0 %v5203_v41 }
  0x3e   : > { %4570 = vmatprep.mubr.msk.f32.mxu0 %vm527_vm1, %v495_v8 }
  0x41   : > { %4571 = vmatmul.mubr.msk.f32.gmra.mxu0 %vm527_vm1, %v496_v9 }
  0x42   : > { %4573 = vmatprep.mubr.msk.f32.mxu0 %vm527_vm1, %v497_v10 }
  0x45   : > { %4574 = vmatmul.mubr.msk.f32.gmra.mxu0 %vm527_vm1, %v498_v11 }
  0x46   : > { %4576 = vmatprep.mubr.msk.f32.mxu0 %vm527_vm1, %v499_v12 }
  0x49   : > { %4577 = vmatmul.mubr.msk.f32.gmra.mxu0 %vm527_vm1, %v500_v13 }
  0x4a   : > { %4579 = vmatprep.mubr.msk.f32.mxu0 %vm527_vm1, %v501_v14 }
  0x4d   : > { %4580 = vmatmul.mubr.msk.f32.gmra.mxu0 %vm527_vm1, %v502_v15 }
  0x4e   : > { %4582 = vmatprep.mubr.msk.f32.mxu0 %vm527_vm1, %v503_v16 }
  0x51   : > { %4583 = vmatmul.mubr.msk.f32.gmra.mxu0 %vm527_vm1, %v504_v17 }
  0x52   : > { %4585 = vmatprep.mubr.msk.f32.mxu0 %vm527_vm1, %v505_v18 }
  0x55   : > { %4586 = vmatmul.mubr.msk.f32.gmra.mxu0 %vm527_vm1, %v506_v19 }
  0x56   : > { %4588 = vmatprep.mubr.msk.f32.mxu0 %vm527_vm1, %v507_v20 }
  0x59   : > { %4589 = vmatmul.mubr.msk.f32.gmra.mxu0 %vm527_vm1, %v508_v21 }
  0x5a   : > { %4591 = vmatprep.mubr.msk.f32.mxu0 %vm527_vm1, %v509_v22 }
  0x5d   : > { %4592 = vmatmul.mubr.msk.f32.gmra.mxu0 %vm527_vm1, %v510_v23 }
  0x5e   : > { %4594 = vmatprep.mubr.msk.f32.mxu0 %vm527_vm1, %v511_v24 }
  0x61   : > { %4595 = vmatmul.mubr.msk.f32.gmra.mxu0 %vm527_vm1, %v512_v25 }
  0x62   : > { %4597 = vmatprep.mubr.msk.f32.mxu0 %vm527_vm1, %v513_v26 }
  0x65   : > { %4598 = vmatmul.mubr.msk.f32.gmra.mxu0 %vm527_vm1, %v514_v27 }
  0x66   : > { %4600 = vmatprep.mubr.msk.f32.mxu0 %vm527_vm1, %v515_v28 }
  0x69   : > { %4601 = vmatmul.mubr.msk.f32.gmra.mxu0 %vm527_vm1, %v516_v29 }
  0x6a   : > { %4603 = vmatprep.mubr.msk.f32.mxu0 %vm527_vm1, %v517_v30 }
  0x6d   : > { %4604 = vmatmul.mubr.msk.f32.gmra.mxu0 %vm527_vm1, %v518_v31 }
  0x6e   : > { %4606 = vmatprep.mubr.msk.f32.mxu0 %vm527_vm1, %v519_v32 }
  0x71   : > { %4607 = vmatmul.mubr.msk.f32.gmra.mxu0 %vm527_vm1, %v520_v33 }
  0x72   : > { %4609 = vmatprep.mubr.msk.f32.mxu0 %vm527_vm1, %v521_v34 }
  0x75   : > { %4610 = vmatmul.mubr.msk.f32.gmra.mxu0 %vm527_vm1, %v522_v35 }
  0xf9   : > { %v4566_v43 = vpop.f32.mrf.mxu0 }
  0xfa   : > { %v861_v45 = vmul.f32 %v4566_v43, %v5209_v42 }
  0xfb   : > { %v694_v46 = vpop.f32.mrf.mxu0 }
  0xfc   : > { %v900_v47 = vadd.f32 %v5214_v44, %v861_v45  ;;  %v860_v48 = vmul.f32 %v5209_v42, %v694_v46 }
  0xfd   : > { %v4569_v49 = vpop.f32.mrf.mxu0 }
  0xfe   : > { %v932_v50 = vmax.f32 %v900_v47, 0.0  ;;  %v899_v51 = vadd.f32 %v5214_v44, %v860_v48  ;;  %v863_v52 = vmul.f32 %v4569_v49, %v5209_v42  ;;  %v4939_v49 = vmov 0.0  }
  0xff   : > { %v704_v53 = vpop.f32.mrf.mxu0 }
 0x100   : > { %965 = vst.msk [vmem:[#allocation2 + $0x8] sm:$0xff] %vm963_vm2, %v932_v50  ;;  %v931_v54 = vmax.f32 %v899_v51, 0.0  ;;  %v902_v55 = vadd.f32 %v5214_v44, %v863_v52  ;;  %v862_v56 = vmul.f32 %v5209_v42, %v704_v53  ;;  %v1140_v50 = vrot.slane %v4939_v49, 1 }
 0x101   : > { %v4572_v57 = vpop.f32.mrf.mxu0 }
 0x102   : > { %964 = vst.msk [vmem:[#allocation2] sm:$0xff] %vm963_vm2, %v931_v54  ;;  %v934_v58 = vmax.f32 %v902_v55, 0.0  ;;  %v901_v59 = vadd.f32 %v5214_v44, %v862_v56  ;;  %v865_v60 = vmul.f32 %v4572_v57, %v5209_v42 }
 0x103   : > { %v714_v61 = vpop.f32.mrf.mxu0 }
 0x104   : > { %967 = vst.msk [vmem:[#allocation2 + $0x18] sm:$0xff] %vm963_vm2, %v934_v58  ;;  %v933_v62 = vmax.f32 %v901_v59, 0.0  ;;  %v904_v63 = vadd.f32 %v5214_v44, %v865_v60  ;;  %v864_v0 = vmul.f32 %v5209_v42, %v714_v61 }
 0x105   : > { %v4575_v1 = vpop.f32.mrf.mxu0 }
 0x106   : > { %966 = vst.msk [vmem:[#allocation2 + $0x10] sm:$0xff] %vm963_vm2, %v933_v62  ;;  %v936_v2 = vmax.f32 %v904_v63, 0.0  ;;  %v903_v3 = vadd.f32 %v5214_v44, %v864_v0  ;;  %v867_v4 = vmul.f32 %v4575_v1, %v5209_v42 }
 0x107   : > { %v724_v5 = vpop.f32.mrf.mxu0 }
 0x108   : > { %969 = vst.msk [vmem:[#allocation2 + $0x28] sm:$0xff] %vm963_vm2, %v936_v2  ;;  %v935_v6 = vmax.f32 %v903_v3, 0.0  ;;  %v906_v7 = vadd.f32 %v5214_v44, %v867_v4  ;;  %v866_v8 = vmul.f32 %v5209_v42, %v724_v5 }
 0x109   : > { %v4578_v9 = vpop.f32.mrf.mxu0  ;;  %v996_v13 = vld [vmem:[#allocation2] ss:$2 sm:$0xff]  ;;  %v1028_v14 = vld [vmem:[#allocation2 + $0x1] ss:$2 sm:$0xff] }
 0x10a   : > { %968 = vst.msk [vmem:[#allocation2 + $0x20] sm:$0xff] %vm963_vm2, %v935_v6  ;;  %v938_v10 = vmax.f32 %v906_v7, 0.0  ;;  %v905_v11 = vadd.f32 %v5214_v44, %v866_v8  ;;  %v869_v12 = vmul.f32 %v4578_v9, %v5209_v42  ;;  %v1059_v22 = vmax.f32 %v996_v13, %v1028_v14 }
 0x10b   : > { %v734_v15 = vpop.f32.mrf.mxu0 }
 0x10c   : > { %971 = vst.msk [vmem:[#allocation2 + $0x38] sm:$0xff] %vm963_vm2, %v938_v10  ;;  %v937_v16 = vmax.f32 %v905_v11, 0.0  ;;  %v908_v17 = vadd.f32 %v5214_v44, %v869_v12  ;;  %v868_v18 = vmul.f32 %v5209_v42, %v734_v15 }
 0x10d   : > { %v4581_v19 = vpop.f32.mrf.mxu0  ;;  %v998_v20 = vld [vmem:[#allocation2 + $0x10] ss:$2 sm:$0xff]  ;;  %v1030_v21 = vld [vmem:[#allocation2 + $0x11] ss:$2 sm:$0xff] }
 0x10e   : > { %970 = vst.msk [vmem:[#allocation2 + $0x30] sm:$0xff] %vm963_vm2, %v937_v16  ;;  %v940_v23 = vmax.f32 %v908_v17, 0.0  ;;  %v907_v24 = vadd.f32 %v5214_v44, %v868_v18  ;;  %v871_v25 = vmul.f32 %v4581_v19, %v5209_v42  ;;  %v1060_v26 = vmax.f32 %v998_v20, %v1030_v21 }
 0x10f   : > { %v744_v27 = vpop.f32.mrf.mxu0 }
 0x110   : > { %973 = vst.msk [vmem:[#allocation2 + $0x48] sm:$0xff] %vm963_vm2, %v940_v23  ;;  %v939_v28 = vmax.f32 %v907_v24, 0.0  ;;  %v910_v29 = vadd.f32 %v5214_v44, %v871_v25  ;;  %v870_v30 = vmul.f32 %v5209_v42, %v744_v27  ;;  %v1075_v31 = vmax.f32 %v1059_v22, %v1060_v26 }
 0x111   : > { %v4584_v32 = vpop.f32.mrf.mxu0  ;;  %v1000_v36 = vld [vmem:[#allocation2 + $0x20] ss:$2 sm:$0xff]  ;;  %v1032_v37 = vld [vmem:[#allocation2 + $0x21] ss:$2 sm:$0xff] }
 0x112   : > { %972 = vst.msk [vmem:[#allocation2 + $0x40] sm:$0xff] %vm963_vm2, %v939_v28  ;;  %v942_v33 = vmax.f32 %v910_v29, 0.0  ;;  %v909_v34 = vadd.f32 %v5214_v44, %v870_v30  ;;  %v873_v35 = vmul.f32 %v4584_v32, %v5209_v42  ;;  %v1084_v45 = vrot.slane %v1075_v31, 5  ;;  %v1126_v30 = vld [vmem:[%s7025_s4] sm:$0xff] }
 0x113   : > { %v754_v43 = vpop.f32.mrf.mxu0  ;;  %v1061_v54 = vmax.f32 %v1000_v36, %v1032_v37 }
 0x114   : > { %975 = vst.msk [vmem:[#allocation2 + $0x58] sm:$0xff] %vm963_vm2, %v942_v33  ;;  %v941_v46 = vmax.f32 %v909_v34, 0.0  ;;  %v912_v47 = vadd.f32 %v5214_v44, %v873_v35  ;;  %v872_v48 = vmul.f32 %v5209_v42, %v754_v43  ;;  %v5256_v55 = vsel %vm624_vm0, 0.0, %v1084_v45  ;;  %v5299_v43 = vld [vmem:[%s7025_s4 + $0x28] sm:$0xff] }
 0x115   : > { %v4587_v51 = vpop.f32.mrf.mxu0  ;;  %v1002_v52 = vld [vmem:[#allocation2 + $0x30] ss:$2 sm:$0xff]  ;;  %v1034_v53 = vld [vmem:[#allocation2 + $0x31] ss:$2 sm:$0xff]  ;;  %v1141_v61 = vrot.slane %v5256_v55, 1  ;;  %v1108_v10 = vsel %vm624_vm0, %v1084_v45, 0.0 }
 0x116   : > { %974 = vst.msk [vmem:[#allocation2 + $0x50] sm:$0xff] %vm963_vm2, %v941_v46  ;;  %v944_v56 = vmax.f32 %v912_v47, 0.0  ;;  %v911_v57 = vadd.f32 %v5214_v44, %v872_v48  ;;  %v875_v58 = vmul.f32 %v4587_v51, %v5209_v42  ;;  %v1062_v59 = vmax.f32 %v1002_v52, %v1034_v53 }
 0x117   : > { %v764_v60 = vpop.f32.mrf.mxu0  ;;  %v1142_v2 = vsel %vm1112_vm3, %v1140_v50, %v1141_v61  ;;  %v1733_v12 = vrot.slane %v5256_v55, 3  ;;  %v1902_v32 = vrot.slane %v5256_v55, 4  ;;  %v1433_v45 = vrot.slane %v5256_v55, 2 }
 0x118   : > { %977 = vst.msk [vmem:[#allocation2 + $0x68] sm:$0xff] %vm963_vm2, %v944_v56  ;;  %v943_v62 = vmax.f32 %v911_v57, 0.0  ;;  %v914_v63 = vadd.f32 %v5214_v44, %v875_v58  ;;  %v874_v0 = vmul.f32 %v5209_v42, %v764_v60  ;;  %v1076_v1 = vmax.f32 %v1061_v54, %v1062_v59  ;;  %4616 = vmatprep.mubr.msk.f32.mxu1 %vm963_vm2, %v1142_v2 }
 0x119   : > { %v4590_v3 = vpop.f32.mrf.mxu0  ;;  %v1004_v8 = vld [vmem:[#allocation2 + $0x40] ss:$2 sm:$0xff]  ;;  %v1036_v9 = vld [vmem:[#allocation2 + $0x41] ss:$2 sm:$0xff] }
 0x11a   : > { %976 = vst.msk [vmem:[#allocation2 + $0x60] sm:$0xff] %vm963_vm2, %v943_v62  ;;  %v946_v4 = vmax.f32 %v914_v63, 0.0  ;;  %v913_v5 = vadd.f32 %v5214_v44, %v874_v0  ;;  %v1087_v6 = vrot.slane %v1076_v1, 3  ;;  %v877_v7 = vmul.f32 %v4590_v3, %v5209_v42 }
 0x11b   : > { %v774_v11 = vpop.f32.mrf.mxu0  ;;  %v1063_v22 = vmax.f32 %v1004_v8, %v1036_v9 }
 0x11c   : > { %979 = vst.msk [vmem:[#allocation2 + $0x78] sm:$0xff] %vm963_vm2, %v946_v4  ;;  %v945_v13 = vmax.f32 %v913_v5, 0.0  ;;  %v5274_v14 = vsel %vm1109_vm4, %v1108_v10, %v1087_v6  ;;  %v916_v15 = vadd.f32 %v5214_v44, %v877_v7  ;;  %v876_v16 = vmul.f32 %v5209_v42, %v774_v11 }
 0x11d   : > { %v4593_v17 = vpop.f32.mrf.mxu0  ;;  %v1143_v18 = vrot.slane %v5274_v14, 1  ;;  %v1734_v19 = vrot.slane %v5274_v14, 3  ;;  %v1006_v20 = vld [vmem:[#allocation2 + $0x50] ss:$2 sm:$0xff]  ;;  %v1038_v21 = vld [vmem:[#allocation2 + $0x51] ss:$2 sm:$0xff] }
 0x11e   : > { %978 = vst.msk [vmem:[#allocation2 + $0x70] sm:$0xff] %vm963_vm2, %v945_v13  ;;  %v948_v23 = vmax.f32 %v916_v15, 0.0  ;;  %v915_v24 = vadd.f32 %v5214_v44, %v876_v16  ;;  %v879_v25 = vmul.f32 %v4593_v17, %v5209_v42  ;;  %v1064_v26 = vmax.f32 %v1006_v20, %v1038_v21  ;;  %v2068_v15 = vld [vmem:[%s7025_s4 + $0x60] sm:$0xff] }
 0x11f   : > { %v784_v27 = vpop.f32.mrf.mxu0  ;;  %v1144_v28 = vsel %vm1112_vm3, %v1141_v61, %v1143_v18  ;;  %v1735_v29 = vsel %vm1109_vm4, %v1733_v12, %v1734_v19  ;;  %v1903_v31 = vrot.slane %v5274_v14, 4  ;;  %v1435_v46 = vrot.slane %v5274_v14, 2 }
 0x120   : > { %981 = vst.msk [vmem:[#allocation2 + $0x88] sm:$0xff] %vm963_vm2, %v948_v23  ;;  %v947_v33 = vmax.f32 %v915_v24, 0.0  ;;  %v918_v34 = vadd.f32 %v5214_v44, %v879_v25  ;;  %v878_v35 = vmul.f32 %v5209_v42, %v784_v27  ;;  %4617 = vmatmul.mubr.msk.f32.vlgmr.msra.gmra.mxu1 %vm963_vm2, %v1144_v28  ;;  %4692 = vmatprep.mubr.msk.f32.mxu0 %vm963_vm2, %v1735_v29  ;;  %v1111_v56 = vsel %vm1109_vm4, %v1087_v6, 0.0  ;;  %v5353_v23 = vld [vmem:[%s7025_s4 + $0x88] sm:$0xff] }
 0x121   : > { %v1077_v36 = vmax.f32 %v1063_v22, %v1064_v26  ;;  %v4596_v37 = vpop.f32.mrf.mxu0  ;;  %4632 = vmatpush3.msra.mxu1 %v5197_v40  ;;  %v5306_v47 = vsel %vm1901_vm5, %v1902_v32, %v1903_v31  ;;  %v1008_v52 = vld [vmem:[#allocation2 + $0x60] ss:$2 sm:$0xff]  ;;  %v1040_v53 = vld [vmem:[#allocation2 + $0x61] ss:$2 sm:$0xff]  ;;  %v5317_v57 = vsel %vm1431_vm6, %v1433_v45, %v1435_v46 }
 0x122   : > { %980 = vst.msk [vmem:[#allocation2 + $0x80] sm:$0xff] %vm963_vm2, %v947_v33  ;;  %v950_v48 = vmax.f32 %v918_v34, 0.0  ;;  %v917_v40 = vadd.f32 %v5214_v44, %v878_v35  ;;  %v881_v50 = vmul.f32 %v4596_v37, %v5209_v42  ;;  %4633 = vmatprep.subr.mxu1 %v1126_v30  ;;  %v1065_v3 = vmax.f32 %v1008_v52, %v1040_v53 }
 0x123   : > { %v1090_v51 = vrot.slane %v1077_v36, 1  ;;  %v794_v54 = vpop.f32.mrf.mxu0  ;;  %4634 = vmatpush3.msra.mxu1 %v1126_v30 }
 0x124   : > { %983 = vst.msk [vmem:[#allocation2 + $0x98] sm:$0xff] %vm963_vm2, %v950_v48  ;;  %v949_v58 = vmax.f32 %v917_v40, 0.0  ;;  %v920_v59 = vadd.f32 %v5214_v44, %v881_v50  ;;  %v880_v60 = vmul.f32 %v5209_v42, %v794_v54  ;;  %4650 = vmatprep.subr.mxu1 %v5299_v43 }
 0x125   : > { %v5323_v61 = vsel %vm1112_vm3, %v1111_v56, %v1090_v51  ;;  %v4599_v62 = vpop.f32.mrf.mxu0  ;;  %v5329_v1 = vsel %vm1112_vm3, %v1090_v51, 0.0  ;;  %v1010_v2 = vld [vmem:[#allocation2 + $0x70] ss:$2 sm:$0xff]  ;;  %v1042_v8 = vld [vmem:[#allocation2 + $0x71] ss:$2 sm:$0xff] }
 0x126   : > { %v1145_v63 = vrot.slane %v5323_v61, 1  ;;  %v1736_v0 = vrot.slane %v5323_v61, 3  ;;  %982 = vst.msk [vmem:[#allocation2 + $0x90] sm:$0xff] %vm963_vm2, %v949_v58  ;;  %v952_v4 = vmax.f32 %v920_v59, 0.0  ;;  %v919_v5 = vadd.f32 %v5214_v44, %v880_v60 }
 0x127   : > { %v883_v6 = vmul.f32 %v4599_v62, %v5209_v42  ;;  %v1147_v7 = vrot.slane %v5329_v1, 1  ;;  %v804_v9 = vpop.f32.mrf.mxu0  ;;  %v1738_v12 = vrot.slane %v5329_v1, 3  ;;  %v1066_v13 = vmax.f32 %v1010_v2, %v1042_v8 }
 0x128   : > { %v1146_v10 = vsel %vm1112_vm3, %v1143_v18, %v1145_v63  ;;  %v1737_v11 = vsel %vm1109_vm4, %v1734_v19, %v1736_v0  ;;  %985 = vst.msk [vmem:[#allocation2 + $0xa8] sm:$0xff] %vm963_vm2, %v952_v4  ;;  %v951_v16 = vmax.f32 %v919_v5, 0.0  ;;  %v882_v20 = vmul.f32 %v5209_v42, %v804_v9 }
 0x129   : > { %v922_v17 = vadd.f32 %v5214_v44, %v883_v6  ;;  %4619 = vmatprep.mubr.msk.f32.mxu1 %vm963_vm2, %v1146_v10  ;;  %4693 = vmatmul.mubr.msk.f32.vlgmr.msra.gmra.mxu0 %vm963_vm2, %v1737_v11  ;;  %v1148_v18 = vsel %vm1112_vm3, %v1145_v63, %v1147_v7  ;;  %v4602_v19 = vpop.f32.mrf.mxu0  ;;  %v1739_v21 = vsel %vm1109_vm4, %v1736_v0, %v1738_v12  ;;  %v1012_v32 = vld [vmem:[#allocation2 + $0x80] ss:$2 sm:$0xff]  ;;  %v1044_v33 = vld [vmem:[#allocation2 + $0x81] ss:$2 sm:$0xff] }
 0x12a   : > { %4620 = vmatmul.mubr.msk.f32.gmra.mxu1 %vm963_vm2, %v1148_v18  ;;  %v1078_v22 = vmax.f32 %v1065_v3, %v1066_v13  ;;  %4727 = vmatpush3.msra.mxu0 %v5203_v41  ;;  %984 = vst.msk [vmem:[#allocation2 + $0xa0] sm:$0xff] %vm963_vm2, %v951_v16  ;;  %v921_v25 = vadd.f32 %v5214_v44, %v882_v20 }
 0x12b   : > { %v954_v24 = vmax.f32 %v922_v17, 0.0  ;;  %v885_v26 = vmul.f32 %v4602_v19, %v5209_v42  ;;  %4695 = vmatprep.mubr.msk.f32.mxu0 %vm963_vm2, %v1739_v21  ;;  %4728 = vmatprep.subr.mxu0 %v2068_v15  ;;  %v814_v27 = vpop.f32.mrf.mxu0  ;;  %v1067_v54 = vmax.f32 %v1012_v32, %v1044_v33 }
 0x12c   : > { %v1093_v28 = vrot.slane %v1078_v22, 7  ;;  %4729 = vmatpush3.msra.mxu0 %v2068_v15  ;;  %v953_v41 = vmax.f32 %v921_v25, 0.0  ;;  %v884_v30 = vmul.f32 %v5209_v42, %v814_v27 }
 0x12d   : > { %987 = vst.msk [vmem:[#allocation2 + $0xb8] sm:$0xff] %vm963_vm2, %v954_v24  ;;  %v924_v29 = vadd.f32 %v5214_v44, %v885_v26  ;;  %4764 = vmatprep.subr.mxu0 %v5353_v23  ;;  %v4605_v34 = vpop.f32.mrf.mxu0  ;;  %v1014_v36 = vld [vmem:[#allocation2 + $0x90] ss:$2 sm:$0xff]  ;;  %v1046_v37 = vld [vmem:[#allocation2 + $0x91] ss:$2 sm:$0xff] }
 0x12e   : > { %v5364_v35 = vsel %vm1115_vm7, 0.0, %v1093_v28  ;;  %986 = vst.msk [vmem:[#allocation2 + $0xb0] sm:$0xff] %vm963_vm2, %v953_v41  ;;  %v923_v40 = vadd.f32 %v5214_v44, %v884_v30  ;;  %v887_v50 = vmul.f32 %v4605_v34, %v5209_v42  ;;  %v1068_v56 = vmax.f32 %v1014_v36, %v1046_v37 }
 0x12f   : > { %v956_v48 = vmax.f32 %v924_v29, 0.0  ;;  %v1149_v51 = vrot.slane %v5364_v35, 1  ;;  %v824_v52 = vpop.f32.mrf.mxu0  ;;  %v1740_v53 = vrot.slane %v5364_v35, 3  ;;  %v1117_v11 = vsel %vm1115_vm7, %v1093_v28, 0.0 }
 0x130   : > { %v955_v58 = vmax.f32 %v923_v40, 0.0  ;;  %v926_v59 = vadd.f32 %v5214_v44, %v887_v50  ;;  %v886_v60 = vmul.f32 %v5209_v42, %v824_v52  ;;  %v1079_v2 = vmax.f32 %v1067_v54, %v1068_v56 }
 0x131   : > { %989 = vst.msk [vmem:[#allocation2 + $0xc8] sm:$0xff] %vm963_vm2, %v956_v48  ;;  %v1150_v62 = vsel %vm1112_vm3, %v1147_v7, %v1149_v51  ;;  %v1741_v63 = vsel %vm1109_vm4, %v1738_v12, %v1740_v53  ;;  %v4608_v0 = vpop.f32.mrf.mxu0  ;;  %v1016_v12 = vld [vmem:[#allocation2 + $0xa0] ss:$2 sm:$0xff]  ;;  %v1048_v13 = vld [vmem:[#allocation2 + $0xa1] ss:$2 sm:$0xff]  ;;  %v2202_v28 = vrot.slane %v5323_v61, 5 }
 0x132   : > { %4622 = vmatprep.mubr.msk.f32.mxu1 %vm963_vm2, %v1150_v62  ;;  %988 = vst.msk [vmem:[#allocation2 + $0xc0] sm:$0xff] %vm963_vm2, %v955_v58  ;;  %v958_v3 = vmax.f32 %v926_v59, 0.0  ;;  %v925_v4 = vadd.f32 %v5214_v44, %v886_v60  ;;  %4696 = vmatmul.mubr.msk.f32.gmra.mxu0 %vm963_vm2, %v1741_v63  ;;  %v889_v5 = vmul.f32 %v4608_v0, %v5209_v42  ;;  %v1096_v8 = vrot.slane %v1079_v2, 5 }
 0x133   : > { %v834_v6 = vpop.f32.mrf.mxu0  ;;  %v1069_v26 = vmax.f32 %v1016_v12, %v1048_v13  ;;  %v2201_v36 = vrot.slane %v5274_v14, 5 }
 0x134   : > { %991 = vst.msk [vmem:[#allocation2 + $0xd8] sm:$0xff] %vm963_vm2, %v958_v3  ;;  %v957_v7 = vmax.f32 %v925_v4, 0.0  ;;  %v928_v9 = vadd.f32 %v5214_v44, %v889_v5  ;;  %v888_v10 = vmul.f32 %v5209_v42, %v834_v6  ;;  %v5386_v16 = vsel %vm624_vm0, %v1117_v11, %v1096_v8 }
 0x135   : > { %v4611_v15 = vpop.f32.mrf.mxu0  ;;  %v1018_v17 = vld [vmem:[#allocation2 + $0xb0] ss:$2 sm:$0xff]  ;;  %v1050_v20 = vld [vmem:[#allocation2 + $0xb1] ss:$2 sm:$0xff]  ;;  %v1151_v22 = vrot.slane %v5386_v16, 1  ;;  %v1742_v25 = vrot.slane %v5386_v16, 3 }
 0x136   : > { %990 = vst.msk [vmem:[#allocation2 + $0xd0] sm:$0xff] %vm963_vm2, %v957_v7  ;;  %v960_v18 = vmax.f32 %v928_v9, 0.0  ;;  %v927_v19 = vadd.f32 %v5214_v44, %v888_v10  ;;  %v891_v21 = vmul.f32 %v4611_v15, %v5209_v42  ;;  %v1070_v27 = vmax.f32 %v1018_v17, %v1050_v20 }
 0x137   : > { %v844_v24 = vpop.f32.mrf.mxu0  ;;  %v1152_v32 = vsel %vm1112_vm3, %v1149_v51, %v1151_v22  ;;  %v1743_v33 = vsel %vm1109_vm4, %v1740_v53, %v1742_v25  ;;  %v2204_v51 = vrot.slane %v5329_v1, 5  ;;  %v2206_v53 = vrot.slane %v5364_v35, 5 }
 0x138   : > { %993 = vst.msk [vmem:[#allocation2 + $0xe8] sm:$0xff] %vm963_vm2, %v960_v18  ;;  %v959_v41 = vmax.f32 %v927_v19, 0.0  ;;  %v930_v29 = vadd.f32 %v5214_v44, %v891_v21  ;;  %v890_v30 = vmul.f32 %v5209_v42, %v844_v24  ;;  %4623 = vmatmul.mubr.msk.f32.gmra.mxu1 %vm963_vm2, %v1152_v32  ;;  %v1080_v34 = vmax.f32 %v1069_v26, %v1070_v27 }
 0x139   : > { %4698 = vmatprep.mubr.msk.f32.mxu0 %vm963_vm2, %v1743_v33  ;;  %v1020_v40 = vld [vmem:[#allocation2 + $0xc0] ss:$2 sm:$0xff]  ;;  %v1052_v52 = vld [vmem:[#allocation2 + $0xc1] ss:$2 sm:$0xff]  ;;  %v5405_v42 = vsel %vm624_vm0, %v2201_v36, %v2202_v28  ;;  %v1119_v56 = vsel %vm624_vm0, %v1096_v8, 0.0  ;;  %v2208_v58 = vrot.slane %v5386_v16, 5  ;;  %v5416_v62 = vsel %vm624_vm0, %v2202_v28, %v2204_v51 }
 0x13a   : > { %992 = vst.msk [vmem:[#allocation2 + $0xe0] sm:$0xff] %vm963_vm2, %v959_v41  ;;  %v962_v37 = vmax.f32 %v930_v29, 0.0  ;;  %v929_v48 = vadd.f32 %v5214_v44, %v890_v30  ;;  %v1099_v50 = vrot.slane %v1080_v34, 3  ;;  %v5419_v63 = vsel %vm624_vm0, %v2204_v51, %v2206_v53  ;;  %v2367_v51 = vld [vmem:[%s7025_s4 + $0x80] sm:$0xff] }
 0x13b   : > { %v1071_v3 = vmax.f32 %v1020_v40, %v1052_v52  ;;  %v5425_v5 = vsel %vm624_vm0, %v2206_v53, %v2208_v58  ;;  %v1905_v18 = vrot.slane %v5323_v61, 4  ;;  %v1907_v32 = vrot.slane %v5329_v1, 4 }
 0x13c   : > { %995 = vst.msk [vmem:[#allocation2 + $0xf8] sm:$0xff] %vm963_vm2, %v962_v37  ;;  %v961_v54 = vmax.f32 %v929_v48, 0.0  ;;  %v5413_v44 = vsel %vm1109_vm4, %v1119_v56, %v1099_v50  ;;  %v1121_v12 = vsel %vm1109_vm4, %v1099_v50, 0.0  ;;  %v1909_v36 = vrot.slane %v5364_v35, 4 }
 0x13d   : > { %v1022_v59 = vld [vmem:[#allocation2 + $0xd0] ss:$2 sm:$0xff]  ;;  %v1054_v60 = vld [vmem:[#allocation2 + $0xd1] ss:$2 sm:$0xff]  ;;  %v1153_v0 = vrot.slane %v5413_v44, 1  ;;  %v1744_v2 = vrot.slane %v5413_v44, 3  ;;  %v5459_v34 = vsel %vm1901_vm5, %v1903_v31, %v1905_v18  ;;  %v5471_v52 = vsel %vm1901_vm5, %v1905_v18, %v1907_v32 }
 0x13e   : > { %994 = vst.msk [vmem:[#allocation2 + $0xf0] sm:$0xff] %vm963_vm2, %v961_v54  ;;  %v1072_v4 = vmax.f32 %v1022_v59, %v1054_v60  ;;  %v2210_v6 = vrot.slane %v5413_v44, 5  ;;  %v5482_v54 = vsel %vm1901_vm5, %v1907_v32, %v1909_v36  ;;  %v1911_v56 = vrot.slane %v5386_v16, 4  ;;  %v1429_v60 = vld [vmem:[%s7025_s4 + $0x20] sm:$0xff] }
 0x13f   : > { %v1154_v8 = vsel %vm1112_vm3, %v1151_v22, %v1153_v0  ;;  %v1745_v7 = vsel %vm1109_vm4, %v1742_v25, %v1744_v2 }
 0x140   : > { %v1081_v9 = vmax.f32 %v1071_v3, %v1072_v4  ;;  %4625 = vmatprep.mubr.msk.f32.mxu1 %vm963_vm2, %v1154_v8  ;;  %4699 = vmatmul.mubr.msk.f32.gmra.mxu0 %vm963_vm2, %v1745_v7  ;;  %v5433_v10 = vsel %vm624_vm0, %v2208_v58, %v2210_v6  ;;  %v1913_v58 = vrot.slane %v5413_v44, 4 }
 0x141   : > { %v1024_v13 = vld [vmem:[#allocation2 + $0xe0] ss:$2 sm:$0xff]  ;;  %v1056_v15 = vld [vmem:[#allocation2 + $0xe1] ss:$2 sm:$0xff] }
 0x142   : > { %v1102_v11 = vrot.slane %v1081_v9, 1  ;;  %v1073_v27 = vmax.f32 %v1024_v13, %v1056_v15  ;;  %v5517_v7 = vsel %vm1901_vm5, %v1911_v56, %v1913_v58 }
 0x144   : > { %v5437_v17 = vsel %vm1112_vm3, %v1121_v12, %v1102_v11  ;;  %v5440_v20 = vsel %vm1112_vm3, %v1102_v11, 0.0 }
 0x145   : > { %v1155_v19 = vrot.slane %v5437_v17, 1  ;;  %v1746_v21 = vrot.slane %v5437_v17, 3  ;;  %v1157_v22 = vrot.slane %v5440_v20, 1  ;;  %v1748_v24 = vrot.slane %v5440_v20, 3  ;;  %v1026_v25 = vld [vmem:[#allocation2 + $0xf0] ss:$2 sm:$0xff] }
 0x146   : > { %v1058_v26 = vld [vmem:[#allocation2 + $0xf1] ss:$2 sm:$0xff]  ;;  %v2212_v37 = vrot.slane %v5437_v17, 5  ;;  %v2214_v40 = vrot.slane %v5440_v20, 5  ;;  %v1915_v4 = vrot.slane %v5437_v17, 4 }
 0x147   : > { %v1156_v28 = vsel %vm1112_vm3, %v1153_v0, %v1155_v19  ;;  %v1747_v41 = vsel %vm1109_vm4, %v1744_v2, %v1746_v21  ;;  %v1158_v29 = vsel %vm1112_vm3, %v1155_v19, %v1157_v22  ;;  %v1749_v30 = vsel %vm1109_vm4, %v1746_v21, %v1748_v24 }
 0x148   : > { %4626 = vmatmul.mubr.msk.f32.gmra.mxu1 %vm963_vm2, %v1156_v28  ;;  %4701 = vmatprep.mubr.msk.f32.mxu0 %vm963_vm2, %v1747_v41  ;;  %v1074_v33 = vmax.f32 %v1026_v25, %v1058_v26  ;;  %v5467_v50 = vsel %vm624_vm0, %v2210_v6, %v2212_v37  ;;  %v5477_v53 = vsel %vm624_vm0, %v2212_v37, %v2214_v40  ;;  %v1597_v6 = vld [vmem:[%s7025_s4 + $0x38] sm:$0xff]  ;;  %v2070_v21 = vrot.slane %v4939_v49, 4 }
 0x149   : > { %4628 = vmatprep.mubr.msk.f32.mxu1 %vm963_vm2, %v1158_v29  ;;  %4702 = vmatmul.mubr.msk.f32.gmra.mxu0 %vm963_vm2, %v1749_v30  ;;  %v5541_v15 = vsel %vm1901_vm5, %v1913_v58, %v1915_v4  ;;  %v2371_v25 = vrot.slane %v5323_v61, 6  ;;  %v1432_v28 = vrot.slane %v4939_v49, 2  ;;  %v2373_v41 = vrot.slane %v5329_v1, 6 }
 0x14a   : > { %4730 = vmatprep.mubr.msk.f32.mxu0 %vm963_vm2, %v5459_v34  ;;  %v1082_v48 = vmax.f32 %v1073_v27, %v1074_v33  ;;  %v2370_v27 = vrot.slane %v5274_v14, 6  ;;  %v2375_v30 = vrot.slane %v5364_v35, 6  ;;  %v1437_v33 = vrot.slane %v5323_v61, 2 }
 0x14b   : > { %v1434_v32 = vsel %vm1431_vm6, %v1432_v28, %v1433_v45  ;;  %v2377_v37 = vrot.slane %v5386_v16, 6  ;;  %v1596_v45 = vld [vmem:[%s7025_s4 + $0x30] sm:$0xff]  ;;  %v2383_v58 = vrot.slane %v5440_v20, 6 }
 0x14c   : > { %4629 = vmatmul.mubr.msk.f32.gmra.mxu1 %vm963_vm2, %v1157_v22  ;;  %v1105_v31 = vrot.slane %v1082_v48, 7  ;;  %v2372_v29 = vsel %vm2369_vm8, %v2370_v27, %v2371_v25  ;;  %v2376_v48 = vsel %vm2369_vm8, %v2373_v41, %v2375_v30 }
 0x14d   : > { %4731 = vmatmul.mubr.msk.f32.vlgmr.msra.gmra.mxu0 %vm963_vm2, %v5471_v52  ;;  %4635 = vmatprep.mubr.f32.mxu1 %v4939_v49 }
 0x14e   : > { %4733 = vmatprep.mubr.msk.f32.mxu0 %vm963_vm2, %v5482_v54  ;;  %v5490_v59 = vsel %vm1115_vm7, 0.0, %v1105_v31  ;;  %4765 = vmatpush3.msra.mxu0 %v5353_v23  ;;  %v5499_v0 = vsel %vm1115_vm7, %v1105_v31, 0.0  ;;  %v5507_v23 = vsel %vm1901_vm5, %v1909_v36, %v1911_v56  ;;  %v2374_v36 = vsel %vm2369_vm8, %v2371_v25, %v2373_v41 }
 0x14f   : > { %4766 = vmatprep.subr.mxu0 %v2367_v51  ;;  %v1750_v2 = vrot.slane %v5490_v59, 3  ;;  %v2216_v3 = vrot.slane %v5490_v59, 5  ;;  %v2218_v8 = vrot.slane %v5499_v0, 5  ;;  %v1921_v11 = vrot.slane %v5499_v0, 4 }
 0x150   : > { %4636 = vmatmul.mubr.msk.f32.vlgmr.msra.gmra.mxu1 %vm963_vm2, %v5256_v55  ;;  %4767 = vmatpush3.msra.mxu0 %v2367_v51  ;;  %v1919_v18 = vrot.slane %v5490_v59, 4  ;;  %v1439_v55 = vrot.slane %v5329_v1, 2  ;;  %v1441_v31 = vrot.slane %v5364_v35, 2  ;;  %v2378_v51 = vsel %vm2369_vm8, %v2375_v30, %v2377_v37  ;;  %v2200_v30 = vld [vmem:[%s7025_s4 + $0x78] sm:$0xff] }
 0x151   : > { %4651 = vmatpush3.msra.mxu1 %v5299_v43  ;;  %4638 = vmatprep.mubr.msk.f32.mxu1 %vm963_vm2, %v5274_v14  ;;  %v1917_v43 = vrot.slane %v5440_v20, 4  ;;  %v5525_v9 = vsel %vm1109_vm4, %v1748_v24, %v1750_v2  ;;  %v5531_v12 = vsel %vm624_vm0, %v2214_v40, %v2216_v3  ;;  %v5536_v13 = vsel %vm624_vm0, %v2216_v3, %v2218_v8 }
 0x152   : > { %4734 = vmatmul.mubr.msk.f32.gmra.mxu0 %vm963_vm2, %v5507_v23  ;;  %4652 = vmatprep.subr.mxu1 %v1429_v60  ;;  %v5555_v22 = vsel %vm1901_vm5, %v1919_v18, %v1921_v11  ;;  %v2071_v26 = vsel %vm1901_vm5, %v1921_v11, %v2070_v21  ;;  %v2379_v40 = vrot.slane %v5413_v44, 6  ;;  %v1440_v14 = vsel %vm1431_vm6, %v1437_v33, %v1439_v55 }
 0x153   : > { %4736 = vmatprep.mubr.msk.f32.mxu0 %vm963_vm2, %v5517_v7  ;;  %4653 = vmatpush3.msra.mxu1 %v1429_v60  ;;  %v5547_v19 = vsel %vm1901_vm5, %v1915_v4, %v1917_v43  ;;  %v5560_v24 = vsel %vm1901_vm5, %v1917_v43, %v1919_v18  ;;  %v1445_v60 = vrot.slane %v5413_v44, 2  ;;  %v2387_v3 = vrot.slane %v5499_v0, 6 }
 0x154   : > { %4639 = vmatmul.mubr.msk.f32.gmra.mxu1 %vm963_vm2, %v5323_v61  ;;  %4669 = vmatprep.subr.mxu1 %v1597_v6  ;;  %v1438_v61 = vsel %vm1431_vm6, %v1435_v46, %v1437_v33  ;;  %v2380_v56 = vsel %vm2369_vm8, %v2377_v37, %v2379_v40  ;;  %v1443_v46 = vrot.slane %v5386_v16, 2  ;;  %v2389_v11 = vrot.slane %v4939_v49, 6 }
 0x155   : > { %4641 = vmatprep.mubr.msk.f32.mxu1 %vm963_vm2, %v5329_v1  ;;  %v2381_v1 = vrot.slane %v5437_v17, 6  ;;  %v1449_v21 = vrot.slane %v5440_v20, 2  ;;  %v1752_v41 = vrot.slane %v5499_v0, 3 }
 0x156   : > { %4737 = vmatmul.mubr.msk.f32.gmra.mxu0 %vm963_vm2, %v5541_v15  ;;  %v1444_v43 = vsel %vm1431_vm6, %v1441_v31, %v1443_v46  ;;  %v1446_v18 = vsel %vm1431_vm6, %v1443_v46, %v1445_v60 }
 0x157   : > { %4739 = vmatprep.mubr.msk.f32.mxu0 %vm963_vm2, %v5547_v19  ;;  %v2382_v4 = vsel %vm2369_vm8, %v2379_v40, %v2381_v1 }
 0x158   : > { %4642 = vmatmul.mubr.msk.f32.gmra.mxu1 %vm963_vm2, %v5364_v35  ;;  %v1442_v35 = vsel %vm1431_vm6, %v1439_v55, %v1441_v31 }
 0x159   : > { %4644 = vmatprep.mubr.msk.f32.mxu1 %vm963_vm2, %v5386_v16  ;;  %v2384_v16 = vsel %vm2369_vm8, %v2381_v1, %v2383_v58 }
 0x15a   : > { %4740 = vmatmul.mubr.msk.f32.gmra.mxu0 %vm963_vm2, %v5560_v24 }
 0x15b   : > { %4742 = vmatprep.mubr.msk.f32.mxu0 %vm963_vm2, %v5555_v22 }
 0x15c   : > { %4645 = vmatmul.mubr.msk.f32.gmra.mxu1 %vm963_vm2, %v5413_v44  ;;  %v1447_v44 = vrot.slane %v5437_v17, 2 }
 0x15d   : > { %4647 = vmatprep.mubr.msk.f32.mxu1 %vm963_vm2, %v5437_v17  ;;  %v2390_v17 = vsel %vm2369_vm8, %v2387_v3, %v2389_v11  ;;  %v2941_v11 = vld [vmem:[%s7028_s7 + $0x5e0] sm:$0xff] }
 0x15e   : > { %4743 = vmatmul.mubr.msk.f32.gmra.mxu0 %vm963_vm2, %v2071_v26  ;;  %v1448_v27 = vsel %vm1431_vm6, %v1445_v60, %v1447_v44  ;;  %v1450_v28 = vsel %vm1431_vm6, %v1447_v44, %v1449_v21  ;;  %v2802_v44 = vld [vmem:[%s7028_s7 + $0x188] sm:$0xff] }
 0x15f   : > { %4768 = vmatprep.mubr.msk.f32.mxu0 %vm963_vm2, %v2372_v29  ;;  %v1899_v29 = vld [vmem:[%s7025_s4 + $0x50] sm:$0xff] }
 0x160   : > { %4648 = vmatmul.mubr.msk.f32.gmra.mxu1 %vm963_vm2, %v5440_v20  ;;  %v1900_v20 = vld [vmem:[%s7025_s4 + $0x58] sm:$0xff] }
 0x161   : > { %4654 = vmatprep.mubr.msk.f32.mxu1 %vm963_vm2, %v1434_v32 }
 0x162   : > { %4769 = vmatmul.mubr.msk.f32.vlgmr.msra.gmra.mxu0 %vm963_vm2, %v2374_v36 }
 0x163   : > { %4771 = vmatprep.mubr.msk.f32.mxu0 %vm963_vm2, %v2376_v48 }
 0x164   : > { %4655 = vmatmul.mubr.msk.f32.vlgmr.msra.gmra.mxu1 %vm963_vm2, %v5317_v57 }
 0x165   : > { %4670 = vmatpush3.msra.mxu1 %v1597_v6  ;;  %4657 = vmatprep.mubr.msk.f32.mxu1 %vm963_vm2, %v1438_v61  ;;  %v2385_v6 = vrot.slane %v5490_v59, 6 }
 0x166   : > { %4772 = vmatmul.mubr.msk.f32.gmra.mxu0 %vm963_vm2, %v2378_v51  ;;  %4671 = vmatprep.subr.mxu1 %v1596_v45 }
 0x167   : > { %4774 = vmatprep.mubr.msk.f32.mxu0 %vm963_vm2, %v2380_v56  ;;  %4672 = vmatpush3.msra.mxu1 %v1596_v45  ;;  %v2388_v25 = vsel %vm2369_vm8, %v2385_v6, %v2387_v3  ;;  %v2386_v26 = vsel %vm2369_vm8, %v2383_v58, %v2385_v6  ;;  %v2814_v56 = vld [vmem:[%s7028_s7 + $0x1e8] sm:$0xff]  ;;  %v2813_v58 = vld [vmem:[%s7028_s7 + $0x1e0] sm:$0xff] }
 0x168   : > { %4658 = vmatmul.mubr.msk.f32.gmra.mxu1 %vm963_vm2, %v1440_v14  ;;  %4783 = vmatprep.subr.mxu1 %v5183_v38  ;;  %v2806_v3 = vld [vmem:[%s7028_s7 + $0x1a8] sm:$0xff]  ;;  %v2805_v6 = vld [vmem:[%s7028_s7 + $0x1a0] sm:$0xff] }
 0x169   : > { %4660 = vmatprep.mubr.msk.f32.mxu1 %vm963_vm2, %v1442_v35 }
 0x16a   : > { %4775 = vmatmul.mubr.msk.f32.gmra.mxu0 %vm963_vm2, %v2382_v4 }
 0x16b   : > { %4777 = vmatprep.mubr.msk.f32.mxu0 %vm963_vm2, %v2384_v16  ;;  %v2942_v16 = vld [vmem:[%s7028_s7 + $0x5e8] sm:$0xff] }
 0x16c   : > { %4661 = vmatmul.mubr.msk.f32.gmra.mxu1 %vm963_vm2, %v1444_v43  ;;  %3102 = vmatprep.subr.mxu0 %v2942_v16 }
 0x16d   : > { %4663 = vmatprep.mubr.msk.f32.mxu1 %vm963_vm2, %v1446_v18  ;;  %3103 = vmatpush1.msra.mxu0 %v2941_v11  ;;  %v2905_v11 = vld [vmem:[%s7028_s7 + $0x4c0] sm:$0xff] }
 0x16e   : > { %4778 = vmatmul.mubr.msk.f32.gmra.mxu0 %vm963_vm2, %v2386_v26  ;;  %v2937_v26 = vld [vmem:[%s7028_s7 + $0x5c0] sm:$0xff] }
 0x16f   : > { %4780 = vmatprep.mubr.msk.f32.mxu0 %vm963_vm2, %v2388_v25  ;;  %v2801_v25 = vld [vmem:[%s7028_s7 + $0x180] sm:$0xff] }
 0x170   : > { %4664 = vmatmul.mubr.msk.f32.gmra.mxu1 %vm963_vm2, %v1448_v27 }
 0x171   : > { %4666 = vmatprep.mubr.msk.f32.mxu1 %vm963_vm2, %v1450_v28 }
 0x172   : > { %4781 = vmatmul.mubr.msk.f32.gmra.mxu0 %vm963_vm2, %v2390_v17  ;;  %v2798_v17 = vld [vmem:[%s7028_s7 + $0x168] sm:$0xff] }
 0x174   : > { %4667 = vmatmul.mubr.msk.f32.gmra.mxu1 %vm963_vm2, %v1449_v21 }
 0x175   : > { %4673 = vmatprep.mubr.msk.f32.mxu1 %vm963_vm2, %v5317_v57  ;;  %v1599_v57 = vrot.slane %v5490_v59, 2  ;;  %v2199_v59 = vld [vmem:[%s7025_s4 + $0x70] sm:$0xff] }
 0x178   : > { %4674 = vmatmul.mubr.msk.f32.vlgmr.msra.gmra.mxu1 %vm963_vm2, %v1438_v61 }
 0x179   : > { %4785 = vmatpush3.msra.mxu1 %v5183_v38  ;;  %4676 = vmatprep.mubr.msk.f32.mxu1 %vm963_vm2, %v1440_v14  ;;  %v1600_v38 = vsel %vm1431_vm6, %v1449_v21, %v1599_v57  ;;  %v2810_v14 = vld [vmem:[%s7028_s7 + $0x1c8] sm:$0xff] }
 0x17a   : > { %4784 = vmatprep.subr.mxu1 %v5190_v39 }
 0x17b   : > { %4786 = vmatpush3.msra.mxu1 %v5190_v39  ;;  %v1753_v39 = vsel %vm1109_vm4, %v1750_v2, %v1752_v41 }
 0x17c   : > { %4677 = vmatmul.mubr.msk.f32.gmra.mxu1 %vm963_vm2, %v1442_v35  ;;  %4707 = vmatprep.subr.mxu1 %v1900_v20  ;;  %v2809_v35 = vld [vmem:[%s7028_s7 + $0x1c0] sm:$0xff] }
 0x17d   : > { %4679 = vmatprep.mubr.msk.f32.mxu1 %vm963_vm2, %v1444_v43 }
 0x180   : > { %4680 = vmatmul.mubr.msk.f32.gmra.mxu1 %vm963_vm2, %v1446_v18  ;;  %v2938_v18 = vld [vmem:[%s7028_s7 + $0x5c8] sm:$0xff] }
 0x181   : > { %4682 = vmatprep.mubr.msk.f32.mxu1 %vm963_vm2, %v1448_v27  ;;  %3104 = vmatprep.subr.mxu0 %v2938_v18 }
 0x182   : > { %3105 = vmatpush1.msra.mxu0 %v2937_v26  ;;  %v2902_v26 = vld [vmem:[%s7028_s7 + $0x4a8] sm:$0xff] }
 0x184   : > { %4683 = vmatmul.mubr.msk.f32.gmra.mxu1 %vm963_vm2, %v1450_v28  ;;  %v2934_v28 = vld [vmem:[%s7028_s7 + $0x5a8] sm:$0xff] }
 0x185   : > { %4685 = vmatprep.mubr.msk.f32.mxu1 %vm963_vm2, %v1600_v38  ;;  %v2930_v38 = vld [vmem:[%s7028_s7 + $0x588] sm:$0xff]  ;;  %3106 = vmatprep.subr.mxu0 %v2934_v28 }
 0x186   : > { %v2766_v28 = vld [vmem:[%s7028_s7 + $0x68] sm:$0xff] }
 0x188   : > { %4686 = vmatmul.mubr.msk.f32.gmra.mxu1 %vm963_vm2, %v1599_v57  ;;  %v2797_v57 = vld [vmem:[%s7028_s7 + $0x160] sm:$0xff] }
 0x189   : > { %4704 = vmatprep.mubr.msk.f32.mxu1 %vm963_vm2, %v5525_v9 }
 0x18c   : > { %4705 = vmatmul.mubr.msk.f32.vlgmr.msra.gmra.mxu1 %vm963_vm2, %v1753_v39  ;;  %v2794_v39 = vld [vmem:[%s7028_s7 + $0x148] sm:$0xff] }
 0x18d   : > { %4708 = vmatpush3.msra.mxu1 %v1900_v20  ;;  %4711 = vmatprep.mubr.msk.f32.mxu1 %vm963_vm2, %v5306_v47  ;;  %v2220_v47 = vrot.slane %v4939_v49, 5  ;;  %v2933_v20 = vld [vmem:[%s7028_s7 + $0x5a0] sm:$0xff] }
 0x18e   : > { %4709 = vmatprep.subr.mxu1 %v1899_v29  ;;  %3107 = vmatpush1.msra.mxu0 %v2933_v20  ;;  %v2901_v20 = vld [vmem:[%s7028_s7 + $0x4a0] sm:$0xff] }
 0x18f   : > { %4710 = vmatpush3.msra.mxu1 %v1899_v29  ;;  %v2929_v29 = vld [vmem:[%s7028_s7 + $0x580] sm:$0xff]  ;;  %3108 = vmatprep.subr.mxu0 %v2930_v38  ;;  %v2898_v38 = vld [vmem:[%s7028_s7 + $0x488] sm:$0xff] }
 0x190   : > { %4745 = vmatprep.subr.mxu1 %v2200_v30  ;;  %4712 = vmatmul.mubr.msk.f32.vlgmr.msra.gmra.mxu1 %vm963_vm2, %v5459_v34 }
 0x191   : > { %4746 = vmatpush3.msra.mxu1 %v2200_v30  ;;  %4714 = vmatprep.mubr.msk.f32.mxu1 %vm963_vm2, %v5471_v52 }
 0x192   : > { %4747 = vmatprep.subr.mxu1 %v2199_v59  ;;  %3109 = vmatpush1.msra.mxu0 %v2929_v29  ;;  %v2762_v29 = vld [vmem:[%s7028_s7 + $0x48] sm:$0xff] }
 0x193   : > { %4748 = vmatpush3.msra.mxu1 %v2199_v59  ;;  %v2793_v59 = vld [vmem:[%s7028_s7 + $0x140] sm:$0xff] }
 0x194   : > { %4715 = vmatmul.mubr.msk.f32.gmra.mxu1 %vm963_vm2, %v5482_v54  ;;  %3031 = vmatprep.subr.mxu1 %v2814_v56  ;;  %v2910_v56 = vld [vmem:[%s7028_s7 + $0x4e8] sm:$0xff] }
 0x195   : > { %4717 = vmatprep.mubr.msk.f32.mxu1 %vm963_vm2, %v5507_v23 }
 0x198   : > { %4718 = vmatmul.mubr.msk.f32.gmra.mxu1 %vm963_vm2, %v5517_v7 }
 0x199   : > { %4720 = vmatprep.mubr.msk.f32.mxu1 %vm963_vm2, %v5541_v15 }
 0x19c   : > { %4721 = vmatmul.mubr.msk.f32.gmra.mxu1 %vm963_vm2, %v5547_v19 }
 0x19d   : > { %4723 = vmatprep.mubr.msk.f32.mxu1 %vm963_vm2, %v5560_v24 }
 0x1a0   : > { %4724 = vmatmul.mubr.msk.f32.gmra.mxu1 %vm963_vm2, %v5555_v22 }
 0x1a1   : > { %4749 = vmatprep.mubr.msk.f32.mxu1 %vm963_vm2, %v5405_v42  ;;  %v2221_v42 = vsel %vm624_vm0, %v2218_v8, %v2220_v47  ;;  %v2926_v47 = vld [vmem:[%s7028_s7 + $0x568] sm:$0xff] }
 0x1a2   : > { %3110 = vmatprep.subr.mxu0 %v2926_v47 }
 0x1a4   : > { %4750 = vmatmul.mubr.msk.f32.vlgmr.msra.gmra.mxu1 %vm963_vm2, %v5416_v62 }
 0x1a5   : > { %4752 = vmatprep.mubr.msk.f32.mxu1 %vm963_vm2, %v5419_v63  ;;  %3032 = vmatpush1.msra.mxu1 %v2813_v58 }
 0x1a6   : > { %3033 = vmatprep.subr.mxu1 %v2810_v14  ;;  %v2774_v14 = vld [vmem:[%s7028_s7 + $0xa8] sm:$0xff] }
 0x1a7   : > { %3034 = vmatpush1.msra.mxu1 %v2809_v35  ;;  %v2909_v35 = vld [vmem:[%s7028_s7 + $0x4e0] sm:$0xff] }
 0x1a8   : > { %4753 = vmatmul.mubr.msk.f32.gmra.mxu1 %vm963_vm2, %v5425_v5  ;;  %3035 = vmatprep.subr.mxu1 %v2806_v3  ;;  %v2773_v3 = vld [vmem:[%s7028_s7 + $0xa0] sm:$0xff] }
 0x1a9   : > { %4755 = vmatprep.mubr.msk.f32.mxu1 %vm963_vm2, %v5433_v10  ;;  %3036 = vmatpush1.msra.mxu1 %v2805_v6  ;;  %v2906_v6 = vld [vmem:[%s7028_s7 + $0x4c8] sm:$0xff] }
 0x1aa   : > { %3037 = vmatprep.subr.mxu1 %v2802_v44  ;;  %v2770_v44 = vld [vmem:[%s7028_s7 + $0x88] sm:$0xff] }
 0x1ab   : > { %3038 = vmatpush1.msra.mxu1 %v2801_v25  ;;  %v2769_v25 = vld [vmem:[%s7028_s7 + $0x80] sm:$0xff] }
 0x1ac   : > { %4756 = vmatmul.mubr.msk.f32.gmra.mxu1 %vm963_vm2, %v5467_v50  ;;  %3039 = vmatprep.subr.mxu1 %v2798_v17 }
 0x1ad   : > { %4758 = vmatprep.mubr.msk.f32.mxu1 %vm963_vm2, %v5477_v53  ;;  %3040 = vmatpush1.msra.mxu1 %v2797_v57  ;;  %v2765_v57 = vld [vmem:[%s7028_s7 + $0x60] sm:$0xff] }
 0x1ae   : > { %3041 = vmatprep.subr.mxu1 %v2794_v39 }
 0x1af   : > { %3042 = vmatpush1.msra.mxu1 %v2793_v59  ;;  %v2897_v59 = vld [vmem:[%s7028_s7 + $0x480] sm:$0xff] }
 0x1b0   : > { %4759 = vmatmul.mubr.msk.f32.gmra.mxu1 %vm963_vm2, %v5531_v12 }
 0x1b1   : > { %4761 = vmatprep.mubr.msk.f32.mxu1 %vm963_vm2, %v5536_v13 }
 0x1b4   : > { %4762 = vmatmul.mubr.msk.f32.gmra.mxu1 %vm963_vm2, %v2221_v42 }
 0x1e0   : > { %v4618_v62 = vpop.f32.mrf.mxu1 }
 0x1e2   : > { %v1245_v63 = vpop.f32.mrf.mxu1 }
 0x1e9   : > { %v5722_v8 = vpop.f32.mrf.mxu0 }
 0x1ea   : > { %v4621_v5 = vpop.f32.mrf.mxu1 }
 0x1eb   : > { %v5728_v22 = vpop.f32.mrf.mxu0 }
 0x1ec   : > { %v1255_v10 = vpop.f32.mrf.mxu1 }
 0x1f2   : > { %v5732_v33 = vpop.f32.mrf.mxu0 }
 0x1f4   : > { %v5738_v55 = vpop.f32.mrf.mxu0 }
 0x1f8   : > { %v4624_v34 = vpop.f32.mrf.mxu1 }
 0x1fa   : > { %v1265_v50 = vpop.f32.mrf.mxu1 }
 0x200   : > { %v5742_v31 = vpop.f32.mrf.mxu0 }
 0x202   : > { %v5765_v4 = vpop.f32.mrf.mxu0 }
 0x208   : > { %v4627_v52 = vpop.f32.mrf.mxu1 }
 0x209   : > { %v5784_v21 = vpop.f32.mrf.mxu0 }
 0x20a   : > { %v1275_v49 = vpop.f32.mrf.mxu1 }
 0x20b   : > { %v5817_v30 = vpop.f32.mrf.mxu0 }
 0x20c   : > { %v4630_v53 = vpop.f32.mrf.mxu1 }
 0x20e   : > { %v1285_v54 = vpop.f32.mrf.mxu1 }
 0x210   : > { %v4637_v2 = vpop.f32.mrf.mxu1 }
 0x211   : > { %v5718_v23 = vadd.f32 %v4637_v2, %v4618_v62  ;;  %v2790_v62 = vld [vmem:[%s7028_s7 + $0x128] sm:$0xff] }
 0x212   : > { %v1380_v7 = vpop.f32.mrf.mxu1  ;;  %3043 = vmatprep.subr.mxu1 %v2790_v62  ;;  %v2761_v62 = vld [vmem:[%s7028_s7 + $0x40] sm:$0xff] }
 0x213   : > { %v5720_v9 = vadd.f32 %v1380_v7, %v1245_v63  ;;  %v2925_v63 = vld [vmem:[%s7028_s7 + $0x560] sm:$0xff]  ;;  %v2782_v7 = vld [vmem:[%s7028_s7 + $0xe8] sm:$0xff] }
 0x214   : > { %v4640_v0 = vpop.f32.mrf.mxu1  ;;  %3111 = vmatpush1.msra.mxu0 %v2925_v63  ;;  %v2894_v63 = vld [vmem:[%s7028_s7 + $0x468] sm:$0xff] }
 0x215   : > { %v5724_v12 = vadd.f32 %v4640_v0, %v4621_v5  ;;  %v2789_v5 = vld [vmem:[%s7028_s7 + $0x120] sm:$0xff] }
 0x216   : > { %v1390_v13 = vpop.f32.mrf.mxu1  ;;  %3044 = vmatpush1.msra.mxu1 %v2789_v5  ;;  %v2917_v0 = vld [vmem:[%s7028_s7 + $0x520] sm:$0xff] }
 0x217   : > { %v5726_v15 = vadd.f32 %v1390_v13, %v1255_v10  ;;  %v2922_v10 = vld [vmem:[%s7028_s7 + $0x548] sm:$0xff]  ;;  %v2781_v13 = vld [vmem:[%s7028_s7 + $0xe0] sm:$0xff] }
 0x218   : > { %v4643_v19 = vpop.f32.mrf.mxu1  ;;  %3112 = vmatprep.subr.mxu0 %v2922_v10  ;;  %v2758_v10 = vld [vmem:[%s7028_s7 + $0x28] sm:$0xff] }
 0x219   : > { %v5730_v24 = vadd.f32 %v4643_v19, %v4624_v34  ;;  %v2914_v19 = vld [vmem:[%s7028_s7 + $0x508] sm:$0xff] }
 0x21a   : > { %v1400_v32 = vpop.f32.mrf.mxu1 }
 0x21b   : > { %v5734_v36 = vadd.f32 %v1400_v32, %v1265_v50  ;;  %v2786_v50 = vld [vmem:[%s7028_s7 + $0x108] sm:$0xff] }
 0x21c   : > { %v4646_v37 = vpop.f32.mrf.mxu1  ;;  %3045 = vmatprep.subr.mxu1 %v2786_v50  ;;  %v2893_v50 = vld [vmem:[%s7028_s7 + $0x460] sm:$0xff] }
 0x21d   : > { %v5736_v48 = vadd.f32 %v4646_v37, %v4627_v52  ;;  %v2921_v52 = vld [vmem:[%s7028_s7 + $0x540] sm:$0xff]  ;;  %v2778_v37 = vld [vmem:[%s7028_s7 + $0xc8] sm:$0xff] }
 0x21e   : > { %v1410_v40 = vpop.f32.mrf.mxu1  ;;  %3113 = vmatpush1.msra.mxu0 %v2921_v52  ;;  %v2757_v52 = vld [vmem:[%s7028_s7 + $0x20] sm:$0xff] }
 0x21f   : > { %v5740_v45 = vadd.f32 %v1410_v40, %v1275_v49  ;;  %v5847_v49 = vpop.f32.mrf.mxu0  ;;  %v2913_v40 = vld [vmem:[%s7028_s7 + $0x500] sm:$0xff] }
 0x220   : > { %v4649_v61 = vpop.f32.mrf.mxu1 }
 0x221   : > { %v5744_v51 = vadd.f32 %v4649_v61, %v4630_v53  ;;  %v2785_v53 = vld [vmem:[%s7028_s7 + $0x100] sm:$0xff]  ;;  %v5877_v61 = vpop.f32.mrf.mxu0 }
 0x222   : > { %v1420_v1 = vpop.f32.mrf.mxu1  ;;  %3046 = vmatpush1.msra.mxu1 %v2785_v53  ;;  %v2890_v53 = vld [vmem:[%s7028_s7 + $0x448] sm:$0xff] }
 0x223   : > { %v5755_v46 = vadd.f32 %v1420_v1, %v1285_v54  ;;  %v2918_v54 = vld [vmem:[%s7028_s7 + $0x528] sm:$0xff]  ;;  %3047 = vmatprep.subr.mxu1 %v2782_v7  ;;  %v2777_v1 = vld [vmem:[%s7028_s7 + $0xc0] sm:$0xff]  ;;  %v5907_v18 = vpop.f32.mrf.mxu0 }
 0x224   : > { %v5760_v60 = vpop.f32.mrf.mxu1  ;;  %3114 = vmatprep.subr.mxu0 %v2918_v54  ;;  %3048 = vmatpush1.msra.mxu1 %v2781_v13  ;;  %v2754_v7 = vld [vmem:[%s7028_s7 + $0x8] sm:$0xff] }
 0x225   : > { %3115 = vmatpush1.msra.mxu0 %v2917_v0  ;;  %3049 = vmatprep.subr.mxu1 %v2778_v37  ;;  %v5937_v47 = vpop.f32.mrf.mxu0  ;;  %v2889_v0 = vld [vmem:[%s7028_s7 + $0x440] sm:$0xff]  ;;  %v2886_v37 = vld [vmem:[%s7028_s7 + $0x428] sm:$0xff] }
 0x226   : > { %v5773_v43 = vpop.f32.mrf.mxu1  ;;  %3116 = vmatprep.subr.mxu0 %v2914_v19  ;;  %3050 = vmatpush1.msra.mxu1 %v2777_v1  ;;  %v2753_v19 = vld [vmem:[%s7028_s7] sm:$0xff]  ;;  %v2878_v1 = vld [vmem:[%s7028_s7 + $0x3e8] sm:$0xff] }
 0x227   : > { %3117 = vmatpush1.msra.mxu0 %v2913_v40  ;;  %3051 = vmatprep.subr.mxu1 %v2774_v14  ;;  %v5967_v13 = vpop.f32.mrf.mxu0  ;;  %v2877_v14 = vld [vmem:[%s7028_s7 + $0x3e0] sm:$0xff] }
 0x228   : > { %v5792_v27 = vpop.f32.mrf.mxu1  ;;  %3118 = vmatprep.subr.mxu0 %v2910_v56  ;;  %3052 = vmatpush1.msra.mxu1 %v2773_v3  ;;  %v2885_v56 = vld [vmem:[%s7028_s7 + $0x420] sm:$0xff] }
 0x229   : > { %3119 = vmatpush1.msra.mxu0 %v2909_v35  ;;  %3053 = vmatprep.subr.mxu1 %v2770_v44  ;;  %v2882_v35 = vld [vmem:[%s7028_s7 + $0x408] sm:$0xff]  ;;  %v2881_v44 = vld [vmem:[%s7028_s7 + $0x400] sm:$0xff] }
 0x22a   : > { %v5809_v41 = vpop.f32.mrf.mxu1  ;;  %3120 = vmatprep.subr.mxu0 %v2906_v6  ;;  %3054 = vmatpush1.msra.mxu1 %v2769_v25  ;;  %v2874_v6 = vld [vmem:[%s7028_s7 + $0x3c8] sm:$0xff]  ;;  %v2873_v25 = vld [vmem:[%s7028_s7 + $0x3c0] sm:$0xff] }
 0x22b   : > { %3121 = vmatpush1.msra.mxu0 %v2905_v11  ;;  %3055 = vmatprep.subr.mxu1 %v2766_v28  ;;  %v5997_v11 = vpop.f32.mrf.mxu0 }
 0x22c   : > { %v5825_v42 = vpop.f32.mrf.mxu1  ;;  %3122 = vmatprep.subr.mxu0 %v2902_v26  ;;  %3056 = vmatpush1.msra.mxu1 %v2765_v57  ;;  %v3006_v26 = vld [vmem:[%s7028_s7 + $0x7e8] sm:$0xff]  ;;  %v3005_v57 = vld [vmem:[%s7028_s7 + $0x7e0] sm:$0xff] }
 0x22d   : > { %3123 = vmatpush1.msra.mxu0 %v2901_v20  ;;  %3057 = vmatprep.subr.mxu1 %v2762_v29  ;;  %v2870_v20 = vld [vmem:[%s7028_s7 + $0x3a8] sm:$0xff] }
 0x22e   : > { %v5839_v34 = vpop.f32.mrf.mxu1  ;;  %3124 = vmatprep.subr.mxu0 %v2898_v38  ;;  %3058 = vmatpush1.msra.mxu1 %v2761_v62  ;;  %v2869_v38 = vld [vmem:[%s7028_s7 + $0x3a0] sm:$0xff]  ;;  %v3002_v29 = vld [vmem:[%s7028_s7 + $0x7c8] sm:$0xff] }
 0x22f   : > { %3125 = vmatpush1.msra.mxu0 %v2897_v59  ;;  %3059 = vmatprep.subr.mxu1 %v2758_v10  ;;  %v2866_v62 = vld [vmem:[%s7028_s7 + $0x388] sm:$0xff]  ;;  %v6027_v10 = vpop.f32.mrf.mxu0 }
 0x230   : > { %v5855_v2 = vpop.f32.mrf.mxu1  ;;  %3126 = vmatprep.subr.mxu0 %v2894_v63  ;;  %3060 = vmatpush1.msra.mxu1 %v2757_v52  ;;  %v3001_v63 = vld [vmem:[%s7028_s7 + $0x7c0] sm:$0xff]  ;;  %v2998_v52 = vld [vmem:[%s7028_s7 + $0x7a8] sm:$0xff] }
 0x231   : > { %3127 = vmatpush1.msra.mxu0 %v2893_v50  ;;  %3061 = vmatprep.subr.mxu1 %v2754_v7  ;;  %v2865_v50 = vld [vmem:[%s7028_s7 + $0x380] sm:$0xff]  ;;  %v2862_v7 = vld [vmem:[%s7028_s7 + $0x368] sm:$0xff] }
 0x232   : > { %v5869_v32 = vpop.f32.mrf.mxu1  ;;  %3128 = vmatprep.subr.mxu0 %v2890_v53  ;;  %3062 = vmatpush1.msra.mxu1 %v2753_v19  ;;  %v2861_v19 = vld [vmem:[%s7028_s7 + $0x360] sm:$0xff] }
 0x233   : > { %3129 = vmatpush1.msra.mxu0 %v2889_v0  ;;  %3063 = vmatprep.subr.mxu1 %v2878_v1  ;;  %v2997_v0 = vld [vmem:[%s7028_s7 + $0x7a0] sm:$0xff] }
 0x234   : > { %v5885_v58 = vpop.f32.mrf.mxu1  ;;  %3130 = vmatprep.subr.mxu0 %v2886_v37  ;;  %3064 = vmatpush2.msra.mxu1 %v2877_v14  ;;  %v2994_v37 = vld [vmem:[%s7028_s7 + $0x788] sm:$0xff]  ;;  %v2993_v14 = vld [vmem:[%s7028_s7 + $0x780] sm:$0xff] }
 0x235   : > { %3131 = vmatpush1.msra.mxu0 %v2885_v56  ;;  %3065 = vmatprep.subr.mxu1 %v2874_v6  ;;  %v2858_v56 = vld [vmem:[%s7028_s7 + $0x348] sm:$0xff]  ;;  %v2857_v6 = vld [vmem:[%s7028_s7 + $0x340] sm:$0xff] }
 0x236   : > { %v5899_v16 = vpop.f32.mrf.mxu1  ;;  %3132 = vmatprep.subr.mxu0 %v2882_v35  ;;  %3066 = vmatpush2.msra.mxu1 %v2873_v25  ;;  %v6057_v35 = vpop.f32.mrf.mxu0 }
 0x237   : > { %3133 = vmatpush1.msra.mxu0 %v2881_v44  ;;  %3067 = vmatprep.subr.mxu1 %v2870_v20  ;;  %7048 = vst [vmem:[#allocation12_spill] sm:$0xff] %v6057_v35  ;;  %v2990_v44 = vld [vmem:[%s7028_s7 + $0x768] sm:$0xff]  ;;  %v2989_v20 = vld [vmem:[%s7028_s7 + $0x760] sm:$0xff] }
 0x238   : > { %v5915_v17 = vpop.f32.mrf.mxu1  ;;  %3134 = vmatprep.subr.mxu0 %v3006_v26  ;;  %3068 = vmatpush2.msra.mxu1 %v2869_v38  ;;  %v2854_v26 = vld [vmem:[%s7028_s7 + $0x328] sm:$0xff] }
 0x239   : > { %3135 = vmatpush2.msra.mxu0 %v3005_v57  ;;  %3069 = vmatprep.subr.mxu1 %v2866_v62  ;;  %v2853_v57 = vld [vmem:[%s7028_s7 + $0x320] sm:$0xff]  ;;  %v2986_v38 = vld [vmem:[%s7028_s7 + $0x748] sm:$0xff] }
 0x23a   : > { %v5929_v39 = vpop.f32.mrf.mxu1  ;;  %3136 = vmatprep.subr.mxu0 %v3002_v29  ;;  %3070 = vmatpush2.msra.mxu1 %v2865_v50  ;;  %v2850_v62 = vld [vmem:[%s7028_s7 + $0x308] sm:$0xff]  ;;  %v2849_v50 = vld [vmem:[%s7028_s7 + $0x300] sm:$0xff] }
 0x23b   : > { %3137 = vmatpush2.msra.mxu0 %v3001_v63  ;;  %3071 = vmatprep.subr.mxu1 %v2862_v7  ;;  %v6084_v63 = vpop.f32.mrf.mxu0  ;;  %v2846_v7 = vld [vmem:[%s7028_s7 + $0x2e8] sm:$0xff] }
 0x23c   : > { %v5945_v5 = vpop.f32.mrf.mxu1  ;;  %3138 = vmatprep.subr.mxu0 %v2998_v52  ;;  %3072 = vmatpush2.msra.mxu1 %v2861_v19  ;;  %7049 = vst [vmem:[#allocation13_spill] sm:$0xff] %v6084_v63 }
 0x23d   : > { %3139 = vmatpush2.msra.mxu0 %v2997_v0  ;;  %3073 = vmatprep.subr.mxu1 %v2858_v56  ;;  %v2845_v0 = vld [vmem:[%s7028_s7 + $0x2e0] sm:$0xff]  ;;  %v6098_v56 = vpop.f32.mrf.mxu0 }
 0x23e   : > { %v5959_v54 = vpop.f32.mrf.mxu1  ;;  %3140 = vmatprep.subr.mxu0 %v2994_v37  ;;  %3074 = vmatpush2.msra.mxu1 %v2857_v6  ;;  %v2842_v37 = vld [vmem:[%s7028_s7 + $0x2c8] sm:$0xff]  ;;  %7050 = vst [vmem:[#allocation14_spill] sm:$0xff] %v6098_v56  ;;  %v1589_v56 = vadd.f32 %v5792_v27, %v5724_v12  ;;  %v1591_v12 = vadd.f32 %v5825_v42, %v5730_v24 }
 0x23f   : > { %3141 = vmatpush2.msra.mxu0 %v2993_v14  ;;  %3075 = vmatprep.subr.mxu1 %v2854_v26  ;;  %v2841_v14 = vld [vmem:[%s7028_s7 + $0x2c0] sm:$0xff]  ;;  %v4770_v26 = vpop.f32.mrf.mxu0  ;;  %v1590_v27 = vadd.f32 %v5839_v34, %v5734_v36  ;;  %v1592_v36 = vadd.f32 %v5869_v32, %v5740_v45 }
 0x240   : > { %v5975_v40 = vpop.f32.mrf.mxu1  ;;  %3142 = vmatprep.subr.mxu0 %v2990_v44  ;;  %3076 = vmatpush2.msra.mxu1 %v2853_v57  ;;  %v1723_v63 = vadd.f32 %v5945_v5, %v1589_v56 }
 0x241   : > { %3143 = vmatpush2.msra.mxu0 %v2989_v20  ;;  %3077 = vmatprep.subr.mxu1 %v2850_v62  ;;  %v1587_v20 = vadd.f32 %v5760_v60, %v5718_v23 }
 0x242   : > { %v5989_v3 = vpop.f32.mrf.mxu1  ;;  %3144 = vmatprep.subr.mxu0 %v2986_v38  ;;  %3078 = vmatpush2.msra.mxu1 %v2849_v50  ;;  %v1586_v38 = vadd.f32 %v5773_v43, %v5720_v9 }
 0x243   : > { %3079 = vmatprep.subr.mxu1 %v2846_v7  ;;  %v1721_v62 = vadd.f32 %v5915_v17, %v1587_v20  ;;  %v2477_v7 = vpop.f32.mrf.mxu0  ;;  %v1724_v5 = vadd.f32 %v5989_v3, %v1590_v27 }
 0x244   : > { %v6005_v28 = vpop.f32.mrf.mxu1  ;;  %3080 = vmatpush2.msra.mxu1 %v2845_v0  ;;  %v1720_v0 = vadd.f32 %v5929_v39, %v1586_v38 }
 0x245   : > { %3081 = vmatprep.subr.mxu1 %v2842_v37  ;;  %v1890_v23 = vadd.f32 %v5722_v8, %v1721_v62  ;;  %v4773_v35 = vpop.f32.mrf.mxu0  ;;  %v1593_v8 = vadd.f32 %v5855_v2, %v5736_v48 }
 0x246   : > { %v6019_v59 = vpop.f32.mrf.mxu1  ;;  %3082 = vmatpush2.msra.mxu1 %v2841_v14  ;;  %v1588_v14 = vadd.f32 %v5809_v41, %v5726_v15  ;;  %v1889_v17 = vadd.f32 %v5728_v22, %v1720_v0  ;;  %v1892_v15 = vadd.f32 %v5732_v33, %v1723_v63  ;;  %v1725_v41 = vadd.f32 %v5975_v40, %v1591_v12 }
 0x247   : > { %v2487_v22 = vpop.f32.mrf.mxu0  ;;  %v1727_v33 = vadd.f32 %v6005_v28, %v1593_v8  ;;  %v1726_v40 = vadd.f32 %v6019_v59, %v1592_v36 }
 0x248   : > { %v6035_v53 = vpop.f32.mrf.mxu1  ;;  %v1722_v9 = vadd.f32 %v5959_v54, %v1588_v14  ;;  %v1894_v3 = vadd.f32 %v5742_v31, %v1725_v41 }
 0x249   : > { %v4776_v45 = vpop.f32.mrf.mxu0  ;;  %v1896_v31 = vadd.f32 %v5784_v21, %v1727_v33  ;;  %v1895_v21 = vadd.f32 %v5817_v30, %v1726_v40 }
 0x24a   : > { %v6049_v1 = vpop.f32.mrf.mxu1  ;;  %v1891_v24 = vadd.f32 %v5738_v55, %v1722_v9  ;;  %v6140_v55 = vld [vmem:[%s7026_s5] ss:$0 sm:$0xff] }
 0x24c   : > { %v6065_v25 = vpop.f32.mrf.mxu1 }
 0x24e   : > { %v6079_v29 = vpop.f32.mrf.mxu1 }
 0x250   : > { %v4713_v52 = vpop.f32.mrf.mxu1 }
 0x251   : > { %v2059_v43 = vadd.f32 %v4713_v52, %v1890_v23 }
 0x252   : > { %v2009_v19 = vpop.f32.mrf.mxu1 }
 0x253   : > { %v2058_v20 = vadd.f32 %v2009_v19, %v1889_v17  ;;  %v2190_v42 = vadd.f32 %v5847_v49, %v2059_v43  ;;  %v1893_v19 = vadd.f32 %v5765_v4, %v1724_v5  ;;  %v6149_v4 = vld [vmem:[%s7027_s6] ss:$0 sm:$0xff] }
 0x254   : > { %v4716_v6 = vpop.f32.mrf.mxu1 }
 0x255   : > { %v2061_v52 = vadd.f32 %v4716_v6, %v1892_v15  ;;  %v2189_v2 = vadd.f32 %v5877_v61, %v2058_v20  ;;  %v1595_v61 = vadd.f32 %v5885_v58, %v5744_v51 }
 0x256   : > { %v2019_v44 = vpop.f32.mrf.mxu1 }
 0x257   : > { %v2060_v63 = vadd.f32 %v2019_v44, %v1891_v24  ;;  %v2192_v56 = vadd.f32 %v5907_v18, %v2061_v52  ;;  %v1594_v18 = vadd.f32 %v5899_v16, %v5755_v46  ;;  %v1729_v51 = vadd.f32 %v6035_v53, %v1595_v61  ;;  %v7051_v24 = vld [vmem:[#allocation12_spill] sm:$0xff] }
 0x258   : > { %v4719_v57 = vpop.f32.mrf.mxu1 }
 0x259   : > { %v2063_v59 = vadd.f32 %v4719_v57, %v1894_v3  ;;  %v2191_v0 = vadd.f32 %v5937_v47, %v2060_v63  ;;  %v1728_v27 = vadd.f32 %v6049_v1, %v1594_v18 }
 0x25a   : > { %v2029_v50 = vpop.f32.mrf.mxu1 }
 0x25b   : > { %v2062_v6 = vadd.f32 %v2029_v50, %v1893_v19  ;;  %v2497_v50 = vpop.f32.mrf.mxu0  ;;  %v2194_v47 = vadd.f32 %v5967_v13, %v2063_v59  ;;  %v1897_v5 = vadd.f32 %v6079_v29, %v1728_v27 }
 0x25c   : > { %v4722_v37 = vpop.f32.mrf.mxu1 }
 0x25d   : > { %v2065_v58 = vadd.f32 %v4722_v37, %v1896_v31  ;;  %v2193_v46 = vadd.f32 %v5997_v11, %v2062_v6  ;;  %v7053_v31 = vld [vmem:[#allocation14_spill] sm:$0xff] }
 0x25e   : > { %v2039_v60 = vpop.f32.mrf.mxu1 }
 0x25f   : > { %v2064_v17 = vadd.f32 %v2039_v60, %v1895_v21  ;;  %v2196_v8 = vadd.f32 %v6027_v10, %v2065_v58 }
 0x260   : > { %v4725_v39 = vpop.f32.mrf.mxu1 }
 0x261   : > { %v2195_v1 = vadd.f32 %v7051_v24, %v2064_v17 }
 0x262   : > { %v6126_v54 = vpop.f32.mrf.mxu1 }
 0x263   : > { %v2066_v33 = vadd.f32 %v6126_v54, %v1897_v5 }
 0x264   : > { %v4751_v34 = vpop.f32.mrf.mxu1 }
 0x265   : > { %v2358_v48 = vadd.f32 %v4751_v34, %v2190_v42 }
 0x266   : > { %v2308_v49 = vpop.f32.mrf.mxu1 }
 0x267   : > { %v2527_v32 = vadd.f32 %v4770_v26, %v2358_v48  ;;  %v2357_v28 = vadd.f32 %v2308_v49, %v2189_v2  ;;  %v7052_v48 = vld [vmem:[#allocation13_spill] sm:$0xff] }
 0x268   : > { %v4754_v44 = vpop.f32.mrf.mxu1 }
 0x269   : > { %v2544_v38 = vmul.f32 %v6140_v55, %v2527_v32  ;;  %v2526_v26 = vadd.f32 %v2477_v7, %v2357_v28  ;;  %v2360_v62 = vadd.f32 %v4754_v44, %v2192_v56  ;;  %v1898_v7 = vadd.f32 %v6065_v25, %v1729_v51  ;;  %v4779_v25 = vpop.f32.mrf.mxu0 }
 0x26a   : > { %v2318_v57 = vpop.f32.mrf.mxu1  ;;  %v2197_v44 = vadd.f32 %v7053_v31, %v2066_v33  ;;  %v2829_v33 = vld [vmem:[%s7028_s7 + $0x260] sm:$0xff] }
 0x26b   : > { %v2561_v14 = vadd.f32 %v6149_v4, %v2544_v38  ;;  %v2543_v23 = vmul.f32 %v6140_v55, %v2526_v26  ;;  %v2529_v9 = vadd.f32 %v4773_v35, %v2360_v62  ;;  %v2359_v43 = vadd.f32 %v2318_v57, %v2191_v0  ;;  %v2507_v40 = vpop.f32.mrf.mxu0 }
 0x26c   : > { %v4757_v12 = vpop.f32.mrf.mxu1  ;;  %v2067_v20 = vadd.f32 %v4725_v39, %v1898_v7 }
 0x26d   : > { %v2571_v16 = vmax.f32 %v2561_v14, 0.0  ;;  %v2560_v53 = vadd.f32 %v6149_v4, %v2543_v23  ;;  %v2546_v30 = vmul.f32 %v6140_v55, %v2529_v9  ;;  %v2528_v37 = vadd.f32 %v2487_v22, %v2359_v43  ;;  %v4782_v28 = vpop.f32.mrf.mxu0 }
 0x26e   : > { %v2362_v15 = vadd.f32 %v4757_v12, %v2194_v47  ;;  %v2328_v35 = vpop.f32.mrf.mxu1  ;;  %v2198_v2 = vadd.f32 %v7052_v48, %v2067_v20  ;;  %v2826_v48 = vld [vmem:[%s7028_s7 + $0x248] sm:$0xff] }
 0x26f   : > { %2582 = vst.msk [vmem:[#allocation3 + $0x8] sm:$0xff] %vm2580_vm9, %v2571_v16  ;;  %v2570_v13 = vmax.f32 %v2560_v53, 0.0  ;;  %v2563_v60 = vadd.f32 %v6149_v4, %v2546_v30  ;;  %v2545_v11 = vmul.f32 %v6140_v55, %v2528_v37  ;;  %v2361_v41 = vadd.f32 %v2328_v35, %v2193_v46  ;;  %v2517_v58 = vpop.f32.mrf.mxu0 }
 0x270   : > { %v2531_v52 = vadd.f32 %v4776_v45, %v2362_v15  ;;  %v4760_v22 = vpop.f32.mrf.mxu1  ;;  %v2838_v15 = vld [vmem:[%s7028_s7 + $0x2a8] sm:$0xff] }
 0x271   : > { %2581 = vst.msk [vmem:[#allocation3] sm:$0xff] %vm2580_vm9, %v2570_v13  ;;  %v2573_v39 = vmax.f32 %v2563_v60, 0.0  ;;  %v2562_v10 = vadd.f32 %v6149_v4, %v2545_v11  ;;  %v2530_v42 = vadd.f32 %v2497_v50, %v2361_v41  ;;  %v2364_v36 = vadd.f32 %v4760_v22, %v2196_v8  ;;  %3083 = vmatprep.subr.mxu1 %v2838_v15  ;;  %v2985_v8 = vld [vmem:[%s7028_s7 + $0x740] sm:$0xff]  ;;  %v2834_v13 = vld [vmem:[%s7028_s7 + $0x288] sm:$0xff] }
 0x272   : > { %v2548_v34 = vmul.f32 %v6140_v55, %v2531_v52  ;;  %v2338_v63 = vpop.f32.mrf.mxu1  ;;  %3145 = vmatpush2.msra.mxu0 %v2985_v8  ;;  %v2981_v60 = vld [vmem:[%s7028_s7 + $0x720] sm:$0xff]  ;;  %v2978_v52 = vld [vmem:[%s7028_s7 + $0x708] sm:$0xff] }
 0x273   : > { %2584 = vst.msk [vmem:[#allocation3 + $0x18] sm:$0xff] %vm2580_vm9, %v2573_v39  ;;  %v2572_v29 = vmax.f32 %v2562_v10, 0.0  ;;  %v2547_v3 = vmul.f32 %v6140_v55, %v2530_v42  ;;  %v2533_v19 = vadd.f32 %v4779_v25, %v2364_v36  ;;  %v2363_v49 = vadd.f32 %v2338_v63, %v2195_v1  ;;  %v2982_v25 = vld [vmem:[%s7028_s7 + $0x728] sm:$0xff]  ;;  %v2833_v11 = vld [vmem:[%s7028_s7 + $0x280] sm:$0xff] }
 0x274   : > { %v2565_v45 = vadd.f32 %v6149_v4, %v2548_v34  ;;  %v4763_v32 = vpop.f32.mrf.mxu1  ;;  %3146 = vmatprep.subr.mxu0 %v2982_v25  ;;  %v2830_v1 = vld [vmem:[%s7028_s7 + $0x268] sm:$0xff]  ;;  %v2977_v36 = vld [vmem:[%s7028_s7 + $0x700] sm:$0xff] }
 0x275   : > { %2583 = vst.msk [vmem:[#allocation3 + $0x10] sm:$0xff] %vm2580_vm9, %v2572_v29  ;;  %v2564_v54 = vadd.f32 %v6149_v4, %v2547_v3  ;;  %v2550_v56 = vmul.f32 %v6140_v55, %v2533_v19  ;;  %v2532_v61 = vadd.f32 %v2507_v40, %v2363_v49  ;;  %v2366_v59 = vadd.f32 %v4763_v32, %v2198_v2  ;;  %v2974_v34 = vld [vmem:[%s7028_s7 + $0x6e8] sm:$0xff]  ;;  %v2973_v2 = vld [vmem:[%s7028_s7 + $0x6e0] sm:$0xff] }
 0x276   : > { %v2575_v6 = vmax.f32 %v2565_v45, 0.0  ;;  %v2348_v38 = vpop.f32.mrf.mxu1  ;;  %3147 = vmatpush2.msra.mxu0 %v2981_v60  ;;  %v2825_v40 = vld [vmem:[%s7028_s7 + $0x240] sm:$0xff]  ;;  %v2970_v29 = vld [vmem:[%s7028_s7 + $0x6c8] sm:$0xff] }
 0x277   : > { %v2574_v26 = vmax.f32 %v2564_v54, 0.0  ;;  %v2567_v62 = vadd.f32 %v6149_v4, %v2550_v56  ;;  %v2549_v0 = vmul.f32 %v6140_v55, %v2532_v61  ;;  %v2535_v18 = vadd.f32 %v4782_v28, %v2366_v59  ;;  %3148 = vmatprep.subr.mxu0 %v2978_v52  ;;  %v2822_v56 = vld [vmem:[%s7028_s7 + $0x228] sm:$0xff]  ;;  %v2969_v61 = vld [vmem:[%s7028_s7 + $0x6c0] sm:$0xff] }
 0x278   : > { %2586 = vst.msk [vmem:[#allocation3 + $0x28] sm:$0xff] %vm2580_vm9, %v2575_v6  ;;  %v2365_v51 = vadd.f32 %v2348_v38, %v2197_v44  ;;  %v2592_v43 = vld [vmem:[#allocation3] ss:$2 sm:$0xff]  ;;  %v2602_v47 = vld [vmem:[#allocation3 + $0x1] ss:$2 sm:$0xff]  ;;  %3149 = vmatpush2.msra.mxu0 %v2977_v36 }
 0x279   : > { %2585 = vst.msk [vmem:[#allocation3 + $0x20] sm:$0xff] %vm2580_vm9, %v2574_v26  ;;  %v2577_v21 = vmax.f32 %v2567_v62, 0.0  ;;  %v2566_v57 = vadd.f32 %v6149_v4, %v2549_v0  ;;  %v2552_v50 = vmul.f32 %v6140_v55, %v2535_v18  ;;  %v2611_v30 = vmax.f32 %v2592_v43, %v2602_v47  ;;  %3150 = vmatprep.subr.mxu0 %v2974_v34  ;;  %v2821_v59 = vld [vmem:[%s7028_s7 + $0x220] sm:$0xff]  ;;  %v2966_v44 = vld [vmem:[%s7028_s7 + $0x6a8] sm:$0xff] }
 0x27a   : > { %v2534_v14 = vadd.f32 %v2517_v58, %v2365_v51  ;;  %3151 = vmatpush2.msra.mxu0 %v2973_v2  ;;  %v2818_v38 = vld [vmem:[%s7028_s7 + $0x208] sm:$0xff]  ;;  %v2965_v62 = vld [vmem:[%s7028_s7 + $0x6a0] sm:$0xff]  ;;  %v4943_v2 = vmov 1966171168  }
 0x27b   : > { %2588 = vst.msk [vmem:[#allocation3 + $0x38] sm:$0xff] %vm2580_vm9, %v2577_v21  ;;  %v2576_v23 = vmax.f32 %v2566_v57, 0.0  ;;  %v2569_v9 = vadd.f32 %v6149_v4, %v2552_v50  ;;  %v2618_v41 = vrot.slane %v2611_v30, 5  ;;  %3152 = vmatprep.subr.mxu0 %v2970_v29  ;;  %v2817_v0 = vld [vmem:[%s7028_s7 + $0x200] sm:$0xff]  ;;  %v2962_v51 = vld [vmem:[%s7028_s7 + $0x688] sm:$0xff]  ;;  %v2728_v29 = vlaneseq }
 0x27c   : > { %v2551_v7 = vmul.f32 %v6140_v55, %v2534_v14  ;;  %v2594_v17 = vld [vmem:[#allocation3 + $0x10] ss:$2 sm:$0xff]  ;;  %v2604_v12 = vld [vmem:[#allocation3 + $0x11] ss:$2 sm:$0xff]  ;;  %3153 = vmatpush2.msra.mxu0 %v2969_v61  ;;  %v2961_v14 = vld [vmem:[%s7028_s7 + $0x680] sm:$0xff] }
 0x27d   : > { %2587 = vst.msk [vmem:[#allocation3 + $0x30] sm:$0xff] %vm2580_vm9, %v2576_v23  ;;  %v2579_v46 = vmax.f32 %v2569_v9, 0.0  ;;  %v2612_v16 = vmax.f32 %v2594_v17, %v2604_v12  ;;  %3154 = vmatprep.subr.mxu0 %v2966_v44  ;;  %v2816_v23 = vld [vmem:[%s7028_s7 + $0x1f8] sm:$0xff]  ;;  %v2958_v9 = vld [vmem:[%s7028_s7 + $0x668] sm:$0xff]  ;;  %v2957_v17 = vld [vmem:[%s7028_s7 + $0x660] sm:$0xff]  ;;  %vm2750_vm13 = vcmp.lt.s32.totalorder %v2728_v29, 512 }
 0x27e   : > { %v2568_v53 = vadd.f32 %v6149_v4, %v2551_v7  ;;  %v2837_v4 = vld [vmem:[%s7028_s7 + $0x2a0] sm:$0xff]  ;;  %3155 = vmatpush2.msra.mxu0 %v2965_v62  ;;  %v2954_v12 = vld [vmem:[%s7028_s7 + $0x648] sm:$0xff]  ;;  %v2803_v44 = vld [vmem:[%s7028_s7 + $0x190] sm:$0xff] }
 0x27f   : > { %2591 = vst.msk [vmem:[#allocation3 + $0x48] sm:$0x3f] %vm2590_vm10, %v2579_v46  ;;  %v2619_v55 = vrot.slane %v2612_v16, 5  ;;  %3084 = vmatpush2.msra.mxu1 %v2837_v4  ;;  %3156 = vmatprep.subr.mxu0 %v2962_v51  ;;  %v2946_v15 = vld [vmem:[%s7028_s7 + $0x608] sm:$0xff]  ;;  %v2799_v51 = vld [vmem:[%s7028_s7 + $0x170] sm:$0xff] }
 0x280   : > { %v2578_v37 = vmax.f32 %v2568_v53, 0.0  ;;  %v2596_v27 = vld [vmem:[#allocation3 + $0x20] ss:$2 sm:$0xff]  ;;  %v2606_v20 = vld [vmem:[#allocation3 + $0x21] ss:$2 sm:$0xff]  ;;  %3085 = vmatprep.subr.mxu1 %v2834_v13  ;;  %3157 = vmatpush2.msra.mxu0 %v2961_v14  ;;  %v2944_v13 = vld [vmem:[%s7028_s7 + $0x5f8] sm:$0xff] }
 0x281   : > { %v6197_v35 = vmax.f32 %v2596_v27, %v2606_v20  ;;  %3086 = vmatpush2.msra.mxu1 %v2833_v11  ;;  %v2620_v39 = vsel %vm624_vm0, %v2618_v41, %v2619_v55  ;;  %3158 = vmatprep.subr.mxu0 %v2958_v9  ;;  %v2949_v20 = vld [vmem:[%s7028_s7 + $0x620] sm:$0xff]  ;;  %v2943_v9 = vld [vmem:[%s7028_s7 + $0x5f0] sm:$0xff] }
 0x282   : > { %2589 = vst.msk [vmem:[#allocation3 + $0x40] sm:$0xff] %vm2580_vm9, %v2578_v37  ;;  %3087 = vmatprep.subr.mxu1 %v2830_v1  ;;  %v2622_v3 = vmax.f32 %v2611_v30, %v2620_v39  ;;  %3159 = vmatpush2.msra.mxu0 %v2957_v17  ;;  %v2950_v37 = vld [vmem:[%s7028_s7 + $0x628] sm:$0xff]  ;;  %v2940_v17 = vld [vmem:[%s7028_s7 + $0x5d8] sm:$0xff] }
 0x283   : > { %v2624_v5 = vrot.slane %v6197_v35, 5  ;;  %3088 = vmatpush2.msra.mxu1 %v2829_v33  ;;  %3160 = vmatprep.subr.mxu0 %v2954_v12  ;;  %v2792_v12 = vld [vmem:[%s7028_s7 + $0x138] sm:$0xff] }
 0x284   : > { %v2598_v22 = vld [vmem:[#allocation3 + $0x30] ss:$2 sm:$0xff]  ;;  %v2608_v24 = vld [vmem:[#allocation3 + $0x31] ss:$2 sm:$0xff]  ;;  %3089 = vmatprep.subr.mxu1 %v2826_v48 }
 0x285   : > { %v2625_v10 = vsel %vm624_vm0, %v2619_v55, %v2624_v5  ;;  %v2614_v42 = vmax.f32 %v2598_v22, %v2608_v24  ;;  %3090 = vmatpush2.msra.mxu1 %v2825_v40  ;;  %v2815_v48 = vld [vmem:[%s7028_s7 + $0x1f0] sm:$0xff]  ;;  %v2726_v40 = vunpack.c.l.s4 %v4943_v2  ;;  %v2912_v2 = vld [vmem:[%s7028_s7 + $0x4f8] sm:$0xff] }
 0x286   : > { %v2627_v63 = vmax.f32 %v2612_v16, %v2625_v10  ;;  %3091 = vmatprep.subr.mxu1 %v2822_v56  ;;  %v2953_v16 = vld [vmem:[%s7028_s7 + $0x640] sm:$0xff] }
 0x287   : > { %v2629_v49 = vrot.slane %v2614_v42, 5  ;;  %3092 = vmatpush2.msra.mxu1 %v2821_v59  ;;  %3161 = vmatpush2.msra.mxu0 %v2953_v16  ;;  %v2727_v61 = vunpack.c.0.s8 %v2726_v40  ;;  %v6361_v59 = vshrl.u32 %v2728_v29, 7  ;;  %v2791_v16 = vld [vmem:[%s7028_s7 + $0x130] sm:$0xff]  ;;  %v2764_v40 = vld [vmem:[%s7028_s7 + $0x58] sm:$0xff] }
 0x288   : > { %v2638_v19 = vrot.slane %v2627_v63, 6  ;;  %3093 = vmatprep.subr.mxu1 %v2818_v38  ;;  %3162 = vmatprep.subr.mxu0 %v2950_v37  ;;  %v2936_v37 = vld [vmem:[%s7028_s7 + $0x5b8] sm:$0xff]  ;;  %v2911_v29 = vld [vmem:[%s7028_s7 + $0x4f0] sm:$0xff] }
 0x289   : > { %v2600_v45 = vld [vmem:[#allocation3 + $0x40] ss:$2 sm:$0x7f]  ;;  %v2610_v32 = vld [vmem:[#allocation3 + $0x41] ss:$2 sm:$0x7f]  ;;  %v2631_v18 = vmax.f32 %v6197_v35, %v2629_v49  ;;  %3094 = vmatpush2.msra.mxu1 %v2817_v0  ;;  %3163 = vmatpush2.msra.mxu0 %v2949_v20 }
 0x28a   : > { %v6249_v28 = vsel %vm1901_vm5, %v2622_v3, %v2638_v19  ;;  %v2615_v54 = vmax.f32 %v2600_v45, %v2610_v32  ;;  %3173 = vmatprep.subr.mxu1 %v2816_v23  ;;  %v2945_v35 = vld [vmem:[%s7028_s7 + $0x600] sm:$0xff]  ;;  %3164 = vmatprep.subr.mxu0 %v2946_v15  ;;  %v2812_v49 = vld [vmem:[%s7028_s7 + $0x1d8] sm:$0xff]  ;;  %v2811_v45 = vld [vmem:[%s7028_s7 + $0x1d0] sm:$0xff] }
 0x28b   : > { %v2670_v6 = vrot.slane %v6249_v28, 6  ;;  %v2666_v31 = vrot.slane %v6249_v28, 5  ;;  %v2656_v57 = vrot.slane %v6249_v28, 2  ;;  %v2652_v50 = vrot.slane %v6249_v28, 1  ;;  %3165 = vmatpush2.msra.mxu0 %v2945_v35  ;;  %v2808_v32 = vld [vmem:[%s7028_s7 + $0x1b8] sm:$0xff]  ;;  %v2935_v20 = vld [vmem:[%s7028_s7 + $0x5b0] sm:$0xff] }
 0x28c   : > { %v2633_v26 = vrot.slane %v2615_v54, 5  ;;  %v2641_v47 = vrot.slane %v2631_v18, 4  ;;  %v2674_v53 = vrot.slane %v6249_v28, 7  ;;  %v2660_v55 = vrot.slane %v6249_v28, 3  ;;  %3244 = vmatprep.subr.mxu0 %v2944_v13  ;;  %v2796_v23 = vld [vmem:[%s7028_s7 + $0x158] sm:$0xff]  ;;  %v2787_v15 = vld [vmem:[%s7028_s7 + $0x110] sm:$0xff] }
 0x28d   : > { %2671 = vrot.lane.b32.xlu1 %v2670_v6, %s4940_s21  ;;  %2667 = vrot.lane.b32.xlu0 %v2666_v31, %s4941_s15  ;;  %v2664_v52 = vrot.slane %v6249_v28, 4  ;;  %v2804_v31 = vld [vmem:[%s7028_s7 + $0x198] sm:$0xff] }
 0x28e   : > { %v2635_v58 = vmax.f32 %v2614_v42, %v2633_v26  ;;  %v2636_v21 = vmax.f32 %v2615_v54, %v2633_v26  ;;  %v2807_v54 = vld [vmem:[%s7028_s7 + $0x1b0] sm:$0xff]  ;;  %v2800_v26 = vld [vmem:[%s7028_s7 + $0x178] sm:$0xff] }
 0x290   : > { %v2645_v43 = vrot.slane %v2635_v58, 2  ;;  %v2646_v7 = vrot.slane %v2636_v21, 2  ;;  %v2730_v58 = vsub.s32 %v2727_v61, %v6361_v59  ;;  %v2903_v61 = vld [vmem:[%s7028_s7 + $0x4b0] sm:$0xff] }
 0x291   : > { %2657 = vrot.lane.b32.xlu1 %v2656_v57, %s4940_s21  ;;  %2653 = vrot.lane.b32.xlu0 %v2652_v50, %s4941_s15 }
 0x292   : > { %v2647_v46 = vsel %vm1431_vm6, %v2645_v43, %v2646_v7  ;;  %v2795_v7 = vld [vmem:[%s7028_s7 + $0x150] sm:$0xff] }
 0x293   : > { %v6305_v30 = vsel %vm1901_vm5, %v2641_v47, %v2647_v46  ;;  %v2939_v46 = vld [vmem:[%s7028_s7 + $0x5d0] sm:$0xff] }
 0x294   : > { %v2693_v27 = vrot.slane %v6305_v30, 5  ;;  %v2679_v8 = vrot.slane %v6305_v30, 1  ;;  %v2697_v4 = vrot.slane %v6305_v30, 6  ;;  %v2683_v25 = vrot.slane %v6305_v30, 2 }
 0x295   : > { %2675 = vrot.lane.b32.xlu0 %v2674_v53, %s4942_s27  ;;  %v2701_v60 = vrot.slane %v6305_v30, 7  ;;  %v2687_v11 = vrot.slane %v6305_v30, 3  ;;  %v2691_v56 = vrot.slane %v6305_v30, 4 }
 0x296   : > { %2694 = vrot.lane.b32.xlu1 %v2693_v27, %s4941_s15  ;;  %v2788_v27 = vld [vmem:[%s7028_s7 + $0x118] sm:$0xff] }
 0x299   : > { %2661 = vrot.lane.b32.xlu0 %v2660_v55, %s4942_s27  ;;  %v2932_v55 = vld [vmem:[%s7028_s7 + $0x598] sm:$0xff] }
 0x29a   : > { %2680 = vrot.lane.b32.xlu1 %v2679_v8, %s4941_s15  ;;  %v2784_v8 = vld [vmem:[%s7028_s7 + $0xf8] sm:$0xff]  ;;  %s474_s15 = sand.u32 1, %s4926_s30  }
 0x29b   : > { %s4093_s28 = scalar_lea.sflag [#allocation6], %s474_s15 }
 0x29d   : > { %2698 = vrot.lane.b32.xlu0 %v2697_v4, %s4940_s21  ;;  %v2931_v4 = vld [vmem:[%s7028_s7 + $0x590] sm:$0xff] }
 0x29e   : > { %2684 = vrot.lane.b32.xlu1 %v2683_v25, %s4940_s21  ;;  %v2783_v25 = vld [vmem:[%s7028_s7 + $0xf0] sm:$0xff] }
 0x2a1   : > { %2702 = vrot.lane.b32.xlu0 %v2701_v60, %s4942_s27  ;;  %v2928_v60 = vld [vmem:[%s7028_s7 + $0x578] sm:$0xff] }
 0x2a2   : > { %2688 = vrot.lane.b32.xlu1 %v2687_v11, %s4942_s27  ;;  %v2780_v11 = vld [vmem:[%s7028_s7 + $0xd8] sm:$0xff] }
 0x2ff   : > { %v2672_v41 = vpop.permute.xlu1 %2671  ;;  %v2668_v5 = vpop.permute.xlu0 %2667 }
 0x300   : > { %v2710_v1 = vsel %vm2580_vm9, %v2664_v52, %v2668_v5  ;;  %v2779_v5 = vld [vmem:[%s7028_s7 + $0xd0] sm:$0xff]  ;;  %v2924_v52 = vld [vmem:[%s7028_s7 + $0x558] sm:$0xff] }
 0x301   : > { %v2711_v10 = vsel %vm2706_vm11, %v2710_v1, %v2672_v41  ;;  %v2927_v41 = vld [vmem:[%s7028_s7 + $0x570] sm:$0xff] }
 0x302   : > { %v2775_v1 = vld [vmem:[%s7028_s7 + $0xb0] sm:$0xff] }
 0x303   : > { %v2658_v22 = vpop.permute.xlu1 %2657  ;;  %v2654_v24 = vpop.permute.xlu0 %2653 }
 0x304   : > { %v2705_v42 = vsel %vm2580_vm9, %v6249_v28, %v2654_v24  ;;  %v2923_v24 = vld [vmem:[%s7028_s7 + $0x550] sm:$0xff] }
 0x305   : > { %v2707_v34 = vsel %vm2706_vm11, %v2705_v42, %v2658_v22  ;;  %v2776_v22 = vld [vmem:[%s7028_s7 + $0xb8] sm:$0xff]  ;;  %v2919_v42 = vld [vmem:[%s7028_s7 + $0x530] sm:$0xff] }
 0x307   : > { %v2676_v39 = vpop.permute.xlu0 %2675 }
 0x308   : > { %v2695_v36 = vpop.permute.xlu1 %2694  ;;  %v2712_v33 = vsel %vm2708_vm12, %v2711_v10, %v2676_v39  ;;  %v2920_v39 = vld [vmem:[%s7028_s7 + $0x538] sm:$0xff] }
 0x309   : > { %3095 = vmatprep.mubr.f32.mxu1 %v2712_v33  ;;  %v2716_v38 = vsel %vm2580_vm9, %v2691_v56, %v2695_v36  ;;  %v2772_v10 = vld [vmem:[%s7028_s7 + $0x98] sm:$0xff]  ;;  %v2771_v36 = vld [vmem:[%s7028_s7 + $0x90] sm:$0xff] }
 0x30a   : > { %v2756_v56 = vld [vmem:[%s7028_s7 + $0x18] sm:$0xff] }
 0x30b   : > { %v2662_v63 = vpop.permute.xlu0 %2661 }
 0x30c   : > { %v6344_v3 = vsel %vm2708_vm12, %v2707_v34, %v2662_v63  ;;  %v2681_v19 = vpop.permute.xlu1 %2680  ;;  %v2768_v34 = vld [vmem:[%s7028_s7 + $0x78] sm:$0xff]  ;;  %v2915_v63 = vld [vmem:[%s7028_s7 + $0x510] sm:$0xff] }
 0x30d   : > { %3096 = vmatmul.mubr.f32.vlgmr.msra.gmra.mxu1 %v6344_v3  ;;  %v2713_v62 = vsel %vm2580_vm9, %v6305_v30, %v2681_v19  ;;  %v2723_v21 = vcombine.low %v6344_v3, %v2712_v33  ;;  %v2763_v19 = vld [vmem:[%s7028_s7 + $0x50] sm:$0xff] }
 0x30e   : > { %3174 = vmatpush1.msra.mxu1 %v2815_v48  ;;  %3237 = vmatprep.mubr.f32.mxu1 %v2712_v33  ;;  %v2916_v33 = vld [vmem:[%s7028_s7 + $0x518] sm:$0xff]  ;;  %v2767_v48 = vld [vmem:[%s7028_s7 + $0x70] sm:$0xff] }
 0x30f   : > { %3175 = vmatprep.subr.mxu1 %v2812_v49  ;;  %v2699_v28 = vpop.permute.xlu0 %2698  ;;  %v2731_v53 = vrot.slane %v2723_v21, %v2730_v58  ;;  %v2908_v49 = vld [vmem:[%s7028_s7 + $0x4d8] sm:$0xff] }
 0x310   : > { %3176 = vmatpush1.msra.mxu1 %v2811_v45  ;;  %v2685_v6 = vpop.permute.xlu1 %2684  ;;  %v2717_v0 = vsel %vm2706_vm11, %v2716_v38, %v2699_v28  ;;  %v2760_v45 = vld [vmem:[%s7028_s7 + $0x38] sm:$0xff]  ;;  %v2759_v28 = vld [vmem:[%s7028_s7 + $0x30] sm:$0xff] }
 0x311   : > { %3177 = vmatprep.subr.mxu1 %v2808_v32  ;;  %v2714_v57 = vsel %vm2706_vm11, %v2713_v62, %v2685_v6  ;;  %v2907_v32 = vld [vmem:[%s7028_s7 + $0x4d0] sm:$0xff]  ;;  %v2896_v62 = vld [vmem:[%s7028_s7 + $0x478] sm:$0xff] }
 0x312   : > { %3178 = vmatpush1.msra.mxu1 %v2807_v54  ;;  %v2904_v54 = vld [vmem:[%s7028_s7 + $0x4b8] sm:$0xff]  ;;  %v2755_v6 = vld [vmem:[%s7028_s7 + $0x10] sm:$0xff] }
 0x313   : > { %3179 = vmatprep.subr.mxu1 %v2804_v31  ;;  %v2703_v18 = vpop.permute.xlu0 %2702  ;;  %v2900_v31 = vld [vmem:[%s7028_s7 + $0x498] sm:$0xff]  ;;  %v2899_v38 = vld [vmem:[%s7028_s7 + $0x490] sm:$0xff] }
 0x314   : > { %3180 = vmatpush1.msra.mxu1 %v2803_v44  ;;  %v2689_v50 = vpop.permute.xlu1 %2688  ;;  %v2718_v14 = vsel %vm2708_vm12, %v2717_v0, %v2703_v18  ;;  %v2880_v44 = vld [vmem:[%s7028_s7 + $0x3f8] sm:$0xff]  ;;  %v2895_v18 = vld [vmem:[%s7028_s7 + $0x470] sm:$0xff] }
 0x315   : > { %v6390_v43 = vsel %vm2708_vm12, %v2714_v57, %v2689_v50  ;;  %3181 = vmatprep.subr.mxu1 %v2800_v26  ;;  %3166 = vmatprep.mubr.f32.mxu0 %v2718_v14  ;;  %v2879_v26 = vld [vmem:[%s7028_s7 + $0x3f0] sm:$0xff]  ;;  %v2876_v0 = vld [vmem:[%s7028_s7 + $0x3d8] sm:$0xff] }
 0x316   : > { %v2724_v47 = vcombine.low %v6390_v43, %v2718_v14  ;;  %3182 = vmatpush1.msra.mxu1 %v2799_v51  ;;  %3167 = vmatmul.mubr.f32.vlgmr.msra.gmra.mxu0 %v6390_v43  ;;  %v2875_v51 = vld [vmem:[%s7028_s7 + $0x3d0] sm:$0xff]  ;;  %v2872_v21 = vld [vmem:[%s7028_s7 + $0x3b8] sm:$0xff] }
 0x317   : > { %3183 = vmatprep.subr.mxu1 %v2796_v23  ;;  %3245 = vmatpush1.msra.mxu0 %v2943_v9  ;;  %v2891_v57 = vld [vmem:[%s7028_s7 + $0x450] sm:$0xff]  ;;  %v2868_v23 = vld [vmem:[%s7028_s7 + $0x398] sm:$0xff] }
 0x318   : > { %v2738_v30 = vrot.slane %v2724_v47, %v2730_v58  ;;  %3184 = vmatpush1.msra.mxu1 %v2795_v7  ;;  %3246 = vmatprep.subr.mxu0 %v2940_v17  ;;  %v2871_v50 = vld [vmem:[%s7028_s7 + $0x3b0] sm:$0xff]  ;;  %v2884_v17 = vld [vmem:[%s7028_s7 + $0x418] sm:$0xff] }
 0x319   : > { %3308 = vmatprep.mubr.f32.mxu0 %v2718_v14  ;;  %3185 = vmatprep.subr.mxu1 %v2792_v12  ;;  %v2888_v14 = vld [vmem:[%s7028_s7 + $0x438] sm:$0xff]  ;;  %v2887_v9 = vld [vmem:[%s7028_s7 + $0x430] sm:$0xff] }
 0x31a   : > { %v2739_v35 = vcombine.low %v2731_v53, %v2738_v30  ;;  %3247 = vmatpush1.msra.mxu0 %v2939_v46  ;;  %3186 = vmatpush1.msra.mxu1 %v2791_v16  ;;  %v2867_v7 = vld [vmem:[%s7028_s7 + $0x390] sm:$0xff]  ;;  %v2864_v47 = vld [vmem:[%s7028_s7 + $0x378] sm:$0xff] }
 0x31b   : > { %3248 = vmatprep.subr.mxu0 %v2936_v37  ;;  %3187 = vmatprep.subr.mxu1 %v2788_v27  ;;  %v2883_v12 = vld [vmem:[%s7028_s7 + $0x410] sm:$0xff]  ;;  %v3008_v16 = vld [vmem:[%s7028_s7 + $0x7f8] sm:$0xff] }
 0x31c   : > { %v2746_v13 = vrot.slane %v2739_v35, %v2730_v58  ;;  %3249 = vmatpush1.msra.mxu0 %v2935_v20  ;;  %3188 = vmatpush1.msra.mxu1 %v2787_v15  ;;  %v2892_v58 = vld [vmem:[%s7028_s7 + $0x458] sm:$0xff]  ;;  %v2863_v46 = vld [vmem:[%s7028_s7 + $0x370] sm:$0xff] }
 0x31d   : > { %3250 = vmatprep.subr.mxu0 %v2932_v55  ;;  %3189 = vmatprep.subr.mxu1 %v2784_v8  ;;  %v2860_v53 = vld [vmem:[%s7028_s7 + $0x358] sm:$0xff]  ;;  %v3007_v30 = vld [vmem:[%s7028_s7 + $0x7f0] sm:$0xff] }
 0x31e   : > { %2752 = vst.msk [vmem:[%s490_s18] sm:$0xf] %vm2750_vm13, %v2746_v13  ;;  %3251 = vmatpush1.msra.mxu0 %v2931_v4  ;;  %3190 = vmatpush1.msra.mxu1 %v2783_v25  ;;  %v2859_v37 = vld [vmem:[%s7028_s7 + $0x350] sm:$0xff]  ;;  %v3004_v27 = vld [vmem:[%s7028_s7 + $0x7d8] sm:$0xff]  ;;  %s475_s18 = scalar_lea.vmem [#allocation7], %s474_s15 }
 0x31f   : > { %3252 = vmatprep.subr.mxu0 %v2928_v60  ;;  %3191 = vmatprep.subr.mxu1 %v2780_v11  ;;  %v2856_v20 = vld [vmem:[%s7028_s7 + $0x338] sm:$0xff]  ;;  %v3003_v15 = vld [vmem:[%s7028_s7 + $0x7d0] sm:$0xff]  ;;  %s4109_s0 = sshll.u32 %s475_s18, 4  ;;  %s4110_s0 = int_to_ptr.vmem [resolvable:$true] %s4109_s0 }
 0x320   : > { %3253 = vmatpush1.msra.mxu0 %v2927_v41  ;;  %3192 = vmatpush1.msra.mxu1 %v2779_v5  ;;  %v2855_v35 = vld [vmem:[%s7028_s7 + $0x330] sm:$0xff]  ;;  %v3000_v55 = vld [vmem:[%s7028_s7 + $0x7b8] sm:$0xff]  ;;  %s4870_s21 = scalar_lea.vmem %s4110_s0, 16  ;;  %p4877_p11 = scmp.lt.s32.totalorder %s4110_s0, %s4875_s17 }
 0x321   : > { %3254 = vmatprep.subr.mxu0 %v2924_v52  ;;  %3193 = vmatprep.subr.mxu1 %v2776_v22  ;;  %v2852_v8 = vld [vmem:[%s7028_s7 + $0x318] sm:$0xff]  ;;  %v2999_v4 = vld [vmem:[%s7028_s7 + $0x7b0] sm:$0xff]  ;;  %p4871_p6 = scmp.ne.s32.totalorder %s4110_s0, %s4870_s21  ;;  %p4878_p12 = scmp.lt.s32.totalorder %s4876_s22, %s4870_s21 }
 0x322   : > { %3255 = vmatpush1.msra.mxu0 %v2923_v24  ;;  %3194 = vmatpush1.msra.mxu1 %v2775_v1  ;;  %v2851_v25 = vld [vmem:[%s7028_s7 + $0x310] sm:$0xff]  ;;  %v2996_v13 = vld [vmem:[%s7028_s7 + $0x798] sm:$0xff] }
 0x323   : > { %3256 = vmatprep.subr.mxu0 %v2920_v39  ;;  %3195 = vmatprep.subr.mxu1 %v2772_v10  ;;  %v2848_v60 = vld [vmem:[%s7028_s7 + $0x2f8] sm:$0xff]  ;;  %v2995_v11 = vld [vmem:[%s7028_s7 + $0x790] sm:$0xff]  ;;  %p4872_p9 = pnand %p4871_p6, %p5058_p5  ;;  %p4879_p13 = por %p4878_p12, %p4877_p11 }
 0x324   : > { %3257 = vmatpush1.msra.mxu0 %v2919_v42  ;;  %3196 = vmatpush1.msra.mxu1 %v2771_v36  ;;  %v2847_v41 = vld [vmem:[%s7028_s7 + $0x2f0] sm:$0xff]  ;;  %v2992_v5 = vld [vmem:[%s7028_s7 + $0x778] sm:$0xff] }
 0x325   : > { %3258 = vmatprep.subr.mxu0 %v2916_v33  ;;  %3197 = vmatprep.subr.mxu1 %v2768_v34  ;;  %v2844_v52 = vld [vmem:[%s7028_s7 + $0x2d8] sm:$0xff]  ;;  %v2991_v22 = vld [vmem:[%s7028_s7 + $0x770] sm:$0xff]  ;;  %p4873_p10 = pneg %p4872_p9 }
 0x326   : > { %3259 = vmatpush1.msra.mxu0 %v2915_v63  ;;  %3198 = vmatpush1.msra.mxu1 %v2767_v48  ;;  %v2843_v24 = vld [vmem:[%s7028_s7 + $0x2d0] sm:$0xff]  ;;  %v2988_v1 = vld [vmem:[%s7028_s7 + $0x758] sm:$0xff] }
 0x327   : > { %3260 = vmatprep.subr.mxu0 %v2912_v2  ;;  %3199 = vmatprep.subr.mxu1 %v2764_v40  ;;  %v2840_v39 = vld [vmem:[%s7028_s7 + $0x2b8] sm:$0xff]  ;;  %v2987_v10 = vld [vmem:[%s7028_s7 + $0x750] sm:$0xff]  ;;  %p4880_p0 = pnand %p4879_p13, %p4873_p10 }
 0x328   : > { %3261 = vmatpush1.msra.mxu0 %v2911_v29  ;;  %3200 = vmatpush1.msra.mxu1 %v2763_v19  ;;  %v2839_v42 = vld [vmem:[%s7028_s7 + $0x2b0] sm:$0xff]  ;;  %v2984_v36 = vld [vmem:[%s7028_s7 + $0x738] sm:$0xff] }
 0x329   : > { %3262 = vmatprep.subr.mxu0 %v2908_v49  ;;  %3201 = vmatprep.subr.mxu1 %v2760_v45  ;;  %v2836_v33 = vld [vmem:[%s7028_s7 + $0x298] sm:$0xff]  ;;  %v2983_v34 = vld [vmem:[%s7028_s7 + $0x730] sm:$0xff] }
 0x32a   : > { %3263 = vmatpush1.msra.mxu0 %v2907_v32  ;;  %3202 = vmatpush1.msra.mxu1 %v2759_v28  ;;  %v2835_v63 = vld [vmem:[%s7028_s7 + $0x290] sm:$0xff]  ;;  %v2980_v48 = vld [vmem:[%s7028_s7 + $0x718] sm:$0xff] }
 0x32b   : > { %3264 = vmatprep.subr.mxu0 %v2904_v54  ;;  %3203 = vmatprep.subr.mxu1 %v2756_v56  ;;  %v2832_v2 = vld [vmem:[%s7028_s7 + $0x278] sm:$0xff]  ;;  %v2979_v40 = vld [vmem:[%s7028_s7 + $0x710] sm:$0xff] }
 0x32c   : > { %3265 = vmatpush1.msra.mxu0 %v2903_v61  ;;  %3204 = vmatpush1.msra.mxu1 %v2755_v6  ;;  %v2831_v29 = vld [vmem:[%s7028_s7 + $0x270] sm:$0xff]  ;;  %v2976_v19 = vld [vmem:[%s7028_s7 + $0x6f8] sm:$0xff] }
 0x32d   : > { %3266 = vmatprep.subr.mxu0 %v2900_v31  ;;  %3205 = vmatprep.subr.mxu1 %v2880_v44  ;;  %v2828_v49 = vld [vmem:[%s7028_s7 + $0x258] sm:$0xff]  ;;  %v2975_v45 = vld [vmem:[%s7028_s7 + $0x6f0] sm:$0xff] }
 0x32e   : > { %3267 = vmatpush1.msra.mxu0 %v2899_v38  ;;  %3206 = vmatpush2.msra.mxu1 %v2879_v26  ;;  %v2827_v32 = vld [vmem:[%s7028_s7 + $0x250] sm:$0xff]  ;;  %v2972_v28 = vld [vmem:[%s7028_s7 + $0x6d8] sm:$0xff] }
 0x32f   : > { %3268 = vmatprep.subr.mxu0 %v2896_v62  ;;  %3207 = vmatprep.subr.mxu1 %v2876_v0  ;;  %v2824_v54 = vld [vmem:[%s7028_s7 + $0x238] sm:$0xff]  ;;  %v2971_v56 = vld [vmem:[%s7028_s7 + $0x6d0] sm:$0xff] }
 0x330   : > { %3269 = vmatpush1.msra.mxu0 %v2895_v18  ;;  %3208 = vmatpush2.msra.mxu1 %v2875_v51  ;;  %v2823_v61 = vld [vmem:[%s7028_s7 + $0x230] sm:$0xff]  ;;  %v2968_v6 = vld [vmem:[%s7028_s7 + $0x6b8] sm:$0xff] }
 0x331   : > { %3270 = vmatprep.subr.mxu0 %v2892_v58  ;;  %3209 = vmatprep.subr.mxu1 %v2872_v21  ;;  %v2820_v31 = vld [vmem:[%s7028_s7 + $0x218] sm:$0xff]  ;;  %v2967_v44 = vld [vmem:[%s7028_s7 + $0x6b0] sm:$0xff] }
 0x332   : > { %3271 = vmatpush1.msra.mxu0 %v2891_v57  ;;  %3210 = vmatpush2.msra.mxu1 %v2871_v50  ;;  %v2819_v38 = vld [vmem:[%s7028_s7 + $0x210] sm:$0xff]  ;;  %v2964_v26 = vld [vmem:[%s7028_s7 + $0x698] sm:$0xff] }
 0x333   : > { %3272 = vmatprep.subr.mxu0 %v2888_v14  ;;  %3211 = vmatprep.subr.mxu1 %v2868_v23  ;;  %v2963_v62 = vld [vmem:[%s7028_s7 + $0x690] sm:$0xff]  ;;  %v3380_v0 = vld [vmem:[#allocation4 + $0x1e8] sm:$0xff] }
 0x334   : > { %3273 = vmatpush1.msra.mxu0 %v2887_v9  ;;  %3212 = vmatpush2.msra.mxu1 %v2867_v7  ;;  %v2960_v18 = vld [vmem:[%s7028_s7 + $0x678] sm:$0xff]  ;;  %v3379_v51 = vld [vmem:[#allocation4 + $0x1e0] sm:$0xff] }
 0x335   : > { %3274 = vmatprep.subr.mxu0 %v2884_v17  ;;  %3213 = vmatprep.subr.mxu1 %v2864_v47  ;;  %v2959_v58 = vld [vmem:[%s7028_s7 + $0x670] sm:$0xff]  ;;  %v3376_v21 = vld [vmem:[#allocation4 + $0x1c8] sm:$0xff] }
 0x336   : > { %3275 = vmatpush1.msra.mxu0 %v2883_v12  ;;  %3214 = vmatpush2.msra.mxu1 %v2863_v46  ;;  %v2956_v57 = vld [vmem:[%s7028_s7 + $0x658] sm:$0xff]  ;;  %v3375_v50 = vld [vmem:[#allocation4 + $0x1c0] sm:$0xff] }
 0x337   : > { %3276 = vmatprep.subr.mxu0 %v3008_v16  ;;  %3215 = vmatprep.subr.mxu1 %v2860_v53  ;;  %v2955_v14 = vld [vmem:[%s7028_s7 + $0x650] sm:$0xff]  ;;  %v3372_v23 = vld [vmem:[#allocation4 + $0x1a8] sm:$0xff] }
 0x338   : > { %3277 = vmatpush2.msra.mxu0 %v3007_v30  ;;  %3216 = vmatpush2.msra.mxu1 %v2859_v37  ;;  %v3371_v9 = vld [vmem:[#allocation4 + $0x1a0] sm:$0xff]  ;;  %v3368_v17 = vld [vmem:[#allocation4 + $0x188] sm:$0xff] }
 0x339   : > { %3278 = vmatprep.subr.mxu0 %v3004_v27  ;;  %3217 = vmatprep.subr.mxu1 %v2856_v20  ;;  %v2951_v7 = vld [vmem:[%s7028_s7 + $0x630] sm:$0xff]  ;;  %v2948_v47 = vld [vmem:[%s7028_s7 + $0x618] sm:$0xff] }
 0x33a   : > { %3279 = vmatpush2.msra.mxu0 %v3003_v15  ;;  %3218 = vmatpush2.msra.mxu1 %v2855_v35  ;;  %v3367_v12 = vld [vmem:[#allocation4 + $0x180] sm:$0xff]  ;;  %v3364_v16 = vld [vmem:[#allocation4 + $0x168] sm:$0xff] }
 0x33b   : > { %3280 = vmatprep.subr.mxu0 %v3000_v55  ;;  %3219 = vmatprep.subr.mxu1 %v2852_v8  ;;  %v2947_v46 = vld [vmem:[%s7028_s7 + $0x610] sm:$0xff]  ;;  %v3360_v30 = vld [vmem:[#allocation4 + $0x148] sm:$0xff] }
 0x33c   : > { %3281 = vmatpush2.msra.mxu0 %v2999_v4  ;;  %3220 = vmatpush2.msra.mxu1 %v2851_v25  ;;  %v3363_v53 = vld [vmem:[#allocation4 + $0x160] sm:$0xff]  ;;  %v3356_v27 = vld [vmem:[#allocation4 + $0x128] sm:$0xff] }
 0x33d   : > { %3282 = vmatprep.subr.mxu0 %v2996_v13  ;;  %3221 = vmatprep.subr.mxu1 %v2848_v60  ;;  %v3359_v37 = vld [vmem:[#allocation4 + $0x140] sm:$0xff]  ;;  %v3352_v15 = vld [vmem:[#allocation4 + $0x108] sm:$0xff] }
 0x33e   : > { %3283 = vmatpush2.msra.mxu0 %v2995_v11  ;;  %3222 = vmatpush2.msra.mxu1 %v2847_v41  ;;  %v3355_v20 = vld [vmem:[#allocation4 + $0x120] sm:$0xff]  ;;  %v3348_v55 = vld [vmem:[#allocation4 + $0xe8] sm:$0xff] }
 0x33f   : > { %3284 = vmatprep.subr.mxu0 %v2992_v5  ;;  %3223 = vmatprep.subr.mxu1 %v2844_v52  ;;  %v3351_v35 = vld [vmem:[#allocation4 + $0x100] sm:$0xff]  ;;  %v3508_v4 = vld [vmem:[#allocation4 + $0x5e8] sm:$0xff] }
 0x340   : > { %3285 = vmatpush2.msra.mxu0 %v2991_v22  ;;  %3224 = vmatpush2.msra.mxu1 %v2843_v24  ;;  %v3347_v8 = vld [vmem:[#allocation4 + $0xe0] sm:$0xff]  ;;  %v3344_v25 = vld [vmem:[#allocation4 + $0xc8] sm:$0xff] }
 0x341   : > { %3286 = vmatprep.subr.mxu0 %v2988_v1  ;;  %3225 = vmatprep.subr.mxu1 %v2840_v39  ;;  %v3507_v13 = vld [vmem:[#allocation4 + $0x5e0] sm:$0xff]  ;;  %v3340_v11 = vld [vmem:[#allocation4 + $0xa8] sm:$0xff] }
 0x342   : > { %3287 = vmatpush2.msra.mxu0 %v2987_v10  ;;  %3226 = vmatpush2.msra.mxu1 %v2839_v42  ;;  %v3343_v60 = vld [vmem:[#allocation4 + $0xc0] sm:$0xff]  ;;  %v3500_v52 = vld [vmem:[#allocation4 + $0x5a8] sm:$0xff] }
 0x343   : > { %3288 = vmatprep.subr.mxu0 %v2984_v36  ;;  %3227 = vmatprep.subr.mxu1 %v2836_v33  ;;  %v3503_v41 = vld [vmem:[#allocation4 + $0x5c0] sm:$0xff]  ;;  %v3336_v22 = vld [vmem:[#allocation4 + $0x88] sm:$0xff] }
 0x344   : > { %3289 = vmatpush2.msra.mxu0 %v2983_v34  ;;  %3228 = vmatpush2.msra.mxu1 %v2835_v63  ;;  %v3339_v5 = vld [vmem:[#allocation4 + $0xa0] sm:$0xff]  ;;  %v3496_v39 = vld [vmem:[#allocation4 + $0x588] sm:$0xff] }
 0x345   : > { %3290 = vmatprep.subr.mxu0 %v2980_v48  ;;  %3229 = vmatprep.subr.mxu1 %v2832_v2  ;;  %v3499_v24 = vld [vmem:[#allocation4 + $0x5a0] sm:$0xff]  ;;  %v3332_v10 = vld [vmem:[#allocation4 + $0x68] sm:$0xff] }
 0x346   : > { %3291 = vmatpush2.msra.mxu0 %v2979_v40  ;;  %3230 = vmatpush2.msra.mxu1 %v2831_v29  ;;  %v3335_v1 = vld [vmem:[#allocation4 + $0x80] sm:$0xff]  ;;  %v3492_v33 = vld [vmem:[#allocation4 + $0x568] sm:$0xff] }
 0x347   : > { %3292 = vmatprep.subr.mxu0 %v2976_v19  ;;  %3231 = vmatprep.subr.mxu1 %v2828_v49  ;;  %v3495_v42 = vld [vmem:[#allocation4 + $0x580] sm:$0xff]  ;;  %v3328_v34 = vld [vmem:[#allocation4 + $0x48] sm:$0xff] }
 0x348   : > { %3293 = vmatpush2.msra.mxu0 %v2975_v45  ;;  %3232 = vmatpush2.msra.mxu1 %v2827_v32  ;;  %v3331_v36 = vld [vmem:[#allocation4 + $0x60] sm:$0xff]  ;;  %v3488_v2 = vld [vmem:[#allocation4 + $0x548] sm:$0xff] }
 0x349   : > { %3294 = vmatprep.subr.mxu0 %v2972_v28  ;;  %3233 = vmatprep.subr.mxu1 %v2824_v54  ;;  %v3491_v63 = vld [vmem:[#allocation4 + $0x560] sm:$0xff]  ;;  %v3324_v40 = vld [vmem:[#allocation4 + $0x28] sm:$0xff] }
 0x34a   : > { %3295 = vmatpush2.msra.mxu0 %v2971_v56  ;;  %3234 = vmatpush2.msra.mxu1 %v2823_v61  ;;  %v3327_v48 = vld [vmem:[#allocation4 + $0x40] sm:$0xff]  ;;  %v3484_v49 = vld [vmem:[#allocation4 + $0x528] sm:$0xff] }
 0x34b   : > { %3296 = vmatprep.subr.mxu0 %v2968_v6  ;;  %3235 = vmatprep.subr.mxu1 %v2820_v31  ;;  %v3487_v29 = vld [vmem:[#allocation4 + $0x540] sm:$0xff]  ;;  %v3320_v45 = vld [vmem:[#allocation4 + $0x8] sm:$0xff] }
 0x34c   : > { %3297 = vmatpush2.msra.mxu0 %v2967_v44  ;;  %3236 = vmatpush2.msra.mxu1 %v2819_v38  ;;  %v3323_v19 = vld [vmem:[#allocation4 + $0x20] sm:$0xff]  ;;  %v3480_v54 = vld [vmem:[#allocation4 + $0x508] sm:$0xff] }
 0x34d   : > { %3298 = vmatprep.subr.mxu0 %v2964_v26  ;;  %3238 = vmatmul.mubr.f32.vlgmr.msra.gmra.mxu1 %v6344_v3  ;;  %v2952_v3 = vld [vmem:[%s7028_s7 + $0x638] sm:$0xff]  ;;  %v3483_v32 = vld [vmem:[#allocation4 + $0x520] sm:$0xff] }
 0x34e   : > { %3299 = vmatpush2.msra.mxu0 %v2963_v62  ;;  %3597 = vmatprep.subr.mxu1 %v3380_v0  ;;  %v3319_v28 = vld [vmem:[#allocation4] sm:$0xff]  ;;  %v3444_v56 = vld [vmem:[#allocation4 + $0x3e8] sm:$0xff] }
 0x34f   : > { %3300 = vmatprep.subr.mxu0 %v2960_v18  ;;  %3598 = vmatpush1.msra.mxu1 %v3379_v51  ;;  %v3479_v61 = vld [vmem:[#allocation4 + $0x500] sm:$0xff]  ;;  %v3476_v31 = vld [vmem:[#allocation4 + $0x4e8] sm:$0xff] }
 0x350   : > { %3301 = vmatpush2.msra.mxu0 %v2959_v58  ;;  %3599 = vmatprep.subr.mxu1 %v3376_v21  ;;  %v3443_v6 = vld [vmem:[#allocation4 + $0x3e0] sm:$0xff]  ;;  %v3440_v44 = vld [vmem:[#allocation4 + $0x3c8] sm:$0xff] }
 0x351   : > { %3302 = vmatprep.subr.mxu0 %v2956_v57  ;;  %3600 = vmatpush1.msra.mxu1 %v3375_v50  ;;  %v3475_v38 = vld [vmem:[#allocation4 + $0x4e0] sm:$0xff]  ;;  %v3472_v62 = vld [vmem:[#allocation4 + $0x4c8] sm:$0xff] }
 0x352   : > { %3303 = vmatpush2.msra.mxu0 %v2955_v14  ;;  %3601 = vmatprep.subr.mxu1 %v3372_v23  ;;  %v3439_v26 = vld [vmem:[#allocation4 + $0x3c0] sm:$0xff]  ;;  %v3436_v0 = vld [vmem:[#allocation4 + $0x3a8] sm:$0xff] }
 0x353   : > { %3304 = vmatprep.subr.mxu0 %v2952_v3  ;;  %3602 = vmatpush1.msra.mxu1 %v3371_v9  ;;  %v3471_v18 = vld [vmem:[#allocation4 + $0x4c0] sm:$0xff]  ;;  %v3468_v58 = vld [vmem:[#allocation4 + $0x4a8] sm:$0xff] }
 0x354   : > { %3305 = vmatpush2.msra.mxu0 %v2951_v7  ;;  %3603 = vmatprep.subr.mxu1 %v3368_v17  ;;  %v3435_v51 = vld [vmem:[#allocation4 + $0x3a0] sm:$0xff]  ;;  %v3432_v21 = vld [vmem:[#allocation4 + $0x388] sm:$0xff] }
 0x355   : > { %3306 = vmatprep.subr.mxu0 %v2948_v47  ;;  %3604 = vmatpush1.msra.mxu1 %v3367_v12  ;;  %v3467_v57 = vld [vmem:[#allocation4 + $0x4a0] sm:$0xff]  ;;  %v3464_v14 = vld [vmem:[#allocation4 + $0x488] sm:$0xff] }
 0x356   : > { %3307 = vmatpush2.msra.mxu0 %v2947_v46  ;;  %3605 = vmatprep.subr.mxu1 %v3364_v16  ;;  %v3431_v50 = vld [vmem:[#allocation4 + $0x380] sm:$0xff]  ;;  %v3428_v23 = vld [vmem:[#allocation4 + $0x368] sm:$0xff] }
 0x357   : > { %3309 = vmatmul.mubr.f32.vlgmr.msra.gmra.mxu0 %v6390_v43  ;;  %3606 = vmatpush1.msra.mxu1 %v3363_v53  ;;  %v3504_v43 = vld [vmem:[#allocation4 + $0x5c8] sm:$0xff]  ;;  %v3463_v3 = vld [vmem:[#allocation4 + $0x480] sm:$0xff] }
 0x358   : > { %3607 = vmatprep.subr.mxu1 %v3360_v30  ;;  %3668 = vmatprep.subr.mxu0 %v3508_v4  ;;  %v3427_v9 = vld [vmem:[#allocation4 + $0x360] sm:$0xff]  ;;  %v3460_v7 = vld [vmem:[#allocation4 + $0x468] sm:$0xff] }
 0x359   : > { %3608 = vmatpush1.msra.mxu1 %v3359_v37  ;;  %3669 = vmatpush1.msra.mxu0 %v3507_v13  ;;  %v3424_v17 = vld [vmem:[#allocation4 + $0x348] sm:$0xff]  ;;  %v3459_v47 = vld [vmem:[#allocation4 + $0x460] sm:$0xff] }
 0x35a   : > { %3609 = vmatprep.subr.mxu1 %v3356_v27  ;;  %3670 = vmatprep.subr.mxu0 %v3504_v43  ;;  %v3423_v12 = vld [vmem:[#allocation4 + $0x340] sm:$0xff]  ;;  %v3456_v46 = vld [vmem:[#allocation4 + $0x448] sm:$0xff] }
 0x35b   : > { %3610 = vmatpush1.msra.mxu1 %v3355_v20  ;;  %3671 = vmatpush1.msra.mxu0 %v3503_v41  ;;  %v3420_v16 = vld [vmem:[#allocation4 + $0x328] sm:$0xff]  ;;  %v3455_v53 = vld [vmem:[#allocation4 + $0x440] sm:$0xff] }
 0x35c   : > { %3611 = vmatprep.subr.mxu1 %v3352_v15  ;;  %3672 = vmatprep.subr.mxu0 %v3500_v52  ;;  %v3419_v30 = vld [vmem:[#allocation4 + $0x320] sm:$0xff]  ;;  %v3452_v37 = vld [vmem:[#allocation4 + $0x428] sm:$0xff] }
 0x35d   : > { %3612 = vmatpush1.msra.mxu1 %v3351_v35  ;;  %3673 = vmatpush1.msra.mxu0 %v3499_v24  ;;  %v3416_v27 = vld [vmem:[#allocation4 + $0x308] sm:$0xff]  ;;  %v3451_v20 = vld [vmem:[#allocation4 + $0x420] sm:$0xff] }
 0x35e   : > { %3613 = vmatprep.subr.mxu1 %v3348_v55  ;;  %3674 = vmatprep.subr.mxu0 %v3496_v39  ;;  %v3415_v15 = vld [vmem:[#allocation4 + $0x300] sm:$0xff]  ;;  %v3448_v35 = vld [vmem:[#allocation4 + $0x408] sm:$0xff] }
 0x35f   : > { %3614 = vmatpush1.msra.mxu1 %v3347_v8  ;;  %3675 = vmatpush1.msra.mxu0 %v3495_v42  ;;  %v3412_v55 = vld [vmem:[#allocation4 + $0x2e8] sm:$0xff]  ;;  %v3447_v8 = vld [vmem:[#allocation4 + $0x400] sm:$0xff] }
 0x360   : > { %3615 = vmatprep.subr.mxu1 %v3344_v25  ;;  %3676 = vmatprep.subr.mxu0 %v3492_v33  ;;  %v3411_v4 = vld [vmem:[#allocation4 + $0x2e0] sm:$0xff]  ;;  %v3572_v25 = vld [vmem:[#allocation4 + $0x7e8] sm:$0xff] }
 0x361   : > { %3616 = vmatpush1.msra.mxu1 %v3343_v60  ;;  %3677 = vmatpush1.msra.mxu0 %v3491_v63  ;;  %v3408_v13 = vld [vmem:[#allocation4 + $0x2c8] sm:$0xff]  ;;  %v3571_v60 = vld [vmem:[#allocation4 + $0x7e0] sm:$0xff] }
 0x362   : > { %3617 = vmatprep.subr.mxu1 %v3340_v11  ;;  %3678 = vmatprep.subr.mxu0 %v3488_v2  ;;  %v3407_v43 = vld [vmem:[#allocation4 + $0x2c0] sm:$0xff]  ;;  %v3568_v11 = vld [vmem:[#allocation4 + $0x7c8] sm:$0xff] }
 0x363   : > { %3618 = vmatpush1.msra.mxu1 %v3339_v5  ;;  %3679 = vmatpush1.msra.mxu0 %v3487_v29  ;;  %v3404_v41 = vld [vmem:[#allocation4 + $0x2a8] sm:$0xff]  ;;  %v3567_v5 = vld [vmem:[#allocation4 + $0x7c0] sm:$0xff] }
 0x364   : > { %3619 = vmatprep.subr.mxu1 %v3336_v22  ;;  %3680 = vmatprep.subr.mxu0 %v3484_v49  ;;  %v3403_v52 = vld [vmem:[#allocation4 + $0x2a0] sm:$0xff]  ;;  %v3564_v22 = vld [vmem:[#allocation4 + $0x7a8] sm:$0xff] }
 0x365   : > { %3620 = vmatpush1.msra.mxu1 %v3335_v1  ;;  %3681 = vmatpush1.msra.mxu0 %v3483_v32  ;;  %v3400_v24 = vld [vmem:[#allocation4 + $0x288] sm:$0xff]  ;;  %v3563_v1 = vld [vmem:[#allocation4 + $0x7a0] sm:$0xff] }
 0x366   : > { %3621 = vmatprep.subr.mxu1 %v3332_v10  ;;  %3682 = vmatprep.subr.mxu0 %v3480_v54  ;;  %v3399_v39 = vld [vmem:[#allocation4 + $0x280] sm:$0xff]  ;;  %v3560_v10 = vld [vmem:[#allocation4 + $0x788] sm:$0xff] }
 0x367   : > { %3622 = vmatpush1.msra.mxu1 %v3331_v36  ;;  %3683 = vmatpush1.msra.mxu0 %v3479_v61  ;;  %v3396_v42 = vld [vmem:[#allocation4 + $0x268] sm:$0xff]  ;;  %v3559_v36 = vld [vmem:[#allocation4 + $0x780] sm:$0xff]  ;;  %v3382_v61 = vld [vmem:[#allocation4 + $0x1f8] sm:$0xff] }
 0x368   : > { %3623 = vmatprep.subr.mxu1 %v3328_v34  ;;  %3684 = vmatprep.subr.mxu0 %v3476_v31  ;;  %v3395_v33 = vld [vmem:[#allocation4 + $0x260] sm:$0xff]  ;;  %v3556_v34 = vld [vmem:[#allocation4 + $0x768] sm:$0xff] }
 0x369   : > { %3624 = vmatpush1.msra.mxu1 %v3327_v48  ;;  %3685 = vmatpush1.msra.mxu0 %v3475_v38  ;;  %v3392_v63 = vld [vmem:[#allocation4 + $0x248] sm:$0xff]  ;;  %v3555_v48 = vld [vmem:[#allocation4 + $0x760] sm:$0xff] }
 0x36a   : > { %3625 = vmatprep.subr.mxu1 %v3324_v40  ;;  %3686 = vmatprep.subr.mxu0 %v3472_v62  ;;  %v3391_v2 = vld [vmem:[#allocation4 + $0x240] sm:$0xff]  ;;  %v3552_v40 = vld [vmem:[#allocation4 + $0x748] sm:$0xff] }
 0x36b   : > { %3626 = vmatpush1.msra.mxu1 %v3323_v19  ;;  %3687 = vmatpush1.msra.mxu0 %v3471_v18  ;;  %v3388_v29 = vld [vmem:[#allocation4 + $0x228] sm:$0xff]  ;;  %v3551_v19 = vld [vmem:[#allocation4 + $0x740] sm:$0xff] }
 0x36c   : > { %3627 = vmatprep.subr.mxu1 %v3320_v45  ;;  %3688 = vmatprep.subr.mxu0 %v3468_v58  ;;  %v3387_v49 = vld [vmem:[#allocation4 + $0x220] sm:$0xff]  ;;  %v3548_v45 = vld [vmem:[#allocation4 + $0x728] sm:$0xff] }
 0x36d   : > { %3628 = vmatpush1.msra.mxu1 %v3319_v28  ;;  %3689 = vmatpush1.msra.mxu0 %v3467_v57  ;;  %v3384_v32 = vld [vmem:[#allocation4 + $0x208] sm:$0xff]  ;;  %v3547_v28 = vld [vmem:[#allocation4 + $0x720] sm:$0xff] }
 0x36e   : > { %3629 = vmatprep.subr.mxu1 %v3444_v56  ;;  %3690 = vmatprep.subr.mxu0 %v3464_v14  ;;  %v3383_v54 = vld [vmem:[#allocation4 + $0x200] sm:$0xff]  ;;  %v3544_v56 = vld [vmem:[#allocation4 + $0x708] sm:$0xff] }
 0x36f   : > { %3630 = vmatpush2.msra.mxu1 %v3443_v6  ;;  %3691 = vmatpush1.msra.mxu0 %v3463_v3  ;;  %v3543_v6 = vld [vmem:[#allocation4 + $0x700] sm:$0xff]  ;;  %v3540_v31 = vld [vmem:[#allocation4 + $0x6e8] sm:$0xff] }
 0x370   : > { %3631 = vmatprep.subr.mxu1 %v3440_v44  ;;  %3692 = vmatprep.subr.mxu0 %v3460_v7  ;;  %v3539_v44 = vld [vmem:[#allocation4 + $0x6e0] sm:$0xff]  ;;  %v3536_v38 = vld [vmem:[#allocation4 + $0x6c8] sm:$0xff]  ;;  %v3510_v7 = vld [vmem:[#allocation4 + $0x5f8] sm:$0xff] }
 0x371   : > { %3632 = vmatpush2.msra.mxu1 %v3439_v26  ;;  %3693 = vmatpush1.msra.mxu0 %v3459_v47  ;;  %v3535_v26 = vld [vmem:[#allocation4 + $0x6c0] sm:$0xff]  ;;  %v3532_v62 = vld [vmem:[#allocation4 + $0x6a8] sm:$0xff]  ;;  %v6750_v47 = vld [vmem:[%s7029_s8] sm:$0xf] }
 0x372   : > { %3633 = vmatprep.subr.mxu1 %v3436_v0  ;;  %3694 = vmatprep.subr.mxu0 %v3456_v46  ;;  %v3531_v0 = vld [vmem:[#allocation4 + $0x6a0] sm:$0xff]  ;;  %v3528_v18 = vld [vmem:[#allocation4 + $0x688] sm:$0xff] }
 0x373   : > { %3634 = vmatpush2.msra.mxu1 %v3435_v51  ;;  %3695 = vmatpush1.msra.mxu0 %v3455_v53  ;;  %v3527_v51 = vld [vmem:[#allocation4 + $0x680] sm:$0xff]  ;;  %v3524_v58 = vld [vmem:[#allocation4 + $0x668] sm:$0xff] }
 0x374   : > { %3635 = vmatprep.subr.mxu1 %v3432_v21  ;;  %3696 = vmatprep.subr.mxu0 %v3452_v37  ;;  %v3523_v21 = vld [vmem:[#allocation4 + $0x660] sm:$0xff]  ;;  %v3520_v57 = vld [vmem:[#allocation4 + $0x648] sm:$0xff] }
 0x375   : > { %3636 = vmatpush2.msra.mxu1 %v3431_v50  ;;  %3697 = vmatpush1.msra.mxu0 %v3451_v20  ;;  %v3519_v50 = vld [vmem:[#allocation4 + $0x640] sm:$0xff]  ;;  %v3516_v14 = vld [vmem:[#allocation4 + $0x628] sm:$0xff] }
 0x376   : > { %3637 = vmatprep.subr.mxu1 %v3428_v23  ;;  %3698 = vmatprep.subr.mxu0 %v3448_v35  ;;  %v3515_v23 = vld [vmem:[#allocation4 + $0x620] sm:$0xff]  ;;  %v3512_v3 = vld [vmem:[#allocation4 + $0x608] sm:$0xff] }
 0x377   : > { %3638 = vmatpush2.msra.mxu1 %v3427_v9  ;;  %3699 = vmatpush1.msra.mxu0 %v3447_v8  ;;  %v3511_v9 = vld [vmem:[#allocation4 + $0x600] sm:$0xff] }
 0x378   : > { %3639 = vmatprep.subr.mxu1 %v3424_v17  ;;  %3700 = vmatprep.subr.mxu0 %v3572_v25  ;;  %v3013_v17 = vsub.s32 0, %v6361_v59  ;;  %v3381_v25 = vld [vmem:[#allocation4 + $0x1f0] sm:$0xff] }
 0x379   : > { %3640 = vmatpush2.msra.mxu1 %v3423_v12  ;;  %3701 = vmatpush2.msra.mxu0 %v3571_v60  ;;  %v3017_v12 = vsub.s32 1, %v6361_v59  ;;  %v3377_v60 = vld [vmem:[#allocation4 + $0x1d0] sm:$0xff] }
 0x37a   : > { %3641 = vmatprep.subr.mxu1 %v3420_v16  ;;  %3702 = vmatprep.subr.mxu0 %v3568_v11  ;;  %v3014_v16 = vrot.slane %v6750_v47, %v3013_v17  ;;  %v3373_v11 = vld [vmem:[#allocation4 + $0x1b0] sm:$0xff] }
 0x37b   : > { %3642 = vmatpush2.msra.mxu1 %v3419_v30  ;;  %3703 = vmatpush2.msra.mxu0 %v3567_v5  ;;  %v3018_v53 = vrot.slane %v6750_v47, %v3017_v12  ;;  %v3369_v5 = vld [vmem:[#allocation4 + $0x190] sm:$0xff] }
 0x37c   : > { %3643 = vmatprep.subr.mxu1 %v3416_v27  ;;  %3704 = vmatprep.subr.mxu0 %v3564_v22  ;;  %v3365_v22 = vld [vmem:[#allocation4 + $0x170] sm:$0xff] }
 0x37d   : > { %3644 = vmatpush2.msra.mxu1 %v3415_v15  ;;  %3705 = vmatpush2.msra.mxu0 %v3563_v1  ;;  %v3361_v1 = vld [vmem:[#allocation4 + $0x150] sm:$0xff] }
 0x37e   : > { %3645 = vmatprep.subr.mxu1 %v3412_v55  ;;  %3706 = vmatprep.subr.mxu0 %v3560_v10  ;;  %v3357_v10 = vld [vmem:[#allocation4 + $0x130] sm:$0xff] }
 0x37f   : > { %3646 = vmatpush2.msra.mxu1 %v3411_v4  ;;  %3707 = vmatpush2.msra.mxu0 %v3559_v36  ;;  %v3353_v36 = vld [vmem:[#allocation4 + $0x110] sm:$0xff] }
 0x380   : > { %3647 = vmatprep.subr.mxu1 %v3408_v13  ;;  %3708 = vmatprep.subr.mxu0 %v3556_v34  ;;  %v3378_v13 = vld [vmem:[#allocation4 + $0x1d8] sm:$0xff]  ;;  %v3349_v34 = vld [vmem:[#allocation4 + $0xf0] sm:$0xff] }
 0x381   : > { %3648 = vmatpush2.msra.mxu1 %v3407_v43  ;;  %3709 = vmatpush2.msra.mxu0 %v3555_v48  ;;  %v3374_v43 = vld [vmem:[#allocation4 + $0x1b8] sm:$0xff]  ;;  %v3345_v48 = vld [vmem:[#allocation4 + $0xd0] sm:$0xff] }
 0x382   : > { %3649 = vmatprep.subr.mxu1 %v3404_v41  ;;  %3710 = vmatprep.subr.mxu0 %v3552_v40  ;;  %v3370_v41 = vld [vmem:[#allocation4 + $0x198] sm:$0xff]  ;;  %v3341_v40 = vld [vmem:[#allocation4 + $0xb0] sm:$0xff] }
 0x383   : > { %3650 = vmatpush2.msra.mxu1 %v3403_v52  ;;  %3711 = vmatpush2.msra.mxu0 %v3551_v19  ;;  %v3366_v52 = vld [vmem:[#allocation4 + $0x178] sm:$0xff]  ;;  %v3337_v19 = vld [vmem:[#allocation4 + $0x90] sm:$0xff] }
 0x384   : > { %3651 = vmatprep.subr.mxu1 %v3400_v24  ;;  %3712 = vmatprep.subr.mxu0 %v3548_v45  ;;  %v3362_v24 = vld [vmem:[#allocation4 + $0x158] sm:$0xff]  ;;  %v3333_v45 = vld [vmem:[#allocation4 + $0x70] sm:$0xff] }
 0x385   : > { %3652 = vmatpush2.msra.mxu1 %v3399_v39  ;;  %3713 = vmatpush2.msra.mxu0 %v3547_v28  ;;  %v3358_v39 = vld [vmem:[#allocation4 + $0x138] sm:$0xff]  ;;  %v3329_v28 = vld [vmem:[#allocation4 + $0x50] sm:$0xff] }
 0x386   : > { %3653 = vmatprep.subr.mxu1 %v3396_v42  ;;  %3714 = vmatprep.subr.mxu0 %v3544_v56  ;;  %v3354_v42 = vld [vmem:[#allocation4 + $0x118] sm:$0xff]  ;;  %v3325_v56 = vld [vmem:[#allocation4 + $0x30] sm:$0xff] }
 0x387   : > { %3654 = vmatpush2.msra.mxu1 %v3395_v33  ;;  %3715 = vmatpush2.msra.mxu0 %v3543_v6  ;;  %v3350_v33 = vld [vmem:[#allocation4 + $0xf8] sm:$0xff]  ;;  %v3321_v6 = vld [vmem:[#allocation4 + $0x10] sm:$0xff] }
 0x388   : > { %3655 = vmatprep.subr.mxu1 %v3392_v63  ;;  %3716 = vmatprep.subr.mxu0 %v3540_v31  ;;  %v3346_v63 = vld [vmem:[#allocation4 + $0xd8] sm:$0xff] }
 0x389   : > { %3656 = vmatpush2.msra.mxu1 %v3391_v2  ;;  %3717 = vmatpush2.msra.mxu0 %v3539_v44  ;;  %v3342_v2 = vld [vmem:[#allocation4 + $0xb8] sm:$0xff]  ;;  %v3445_v44 = vld [vmem:[#allocation4 + $0x3f0] sm:$0xff] }
 0x38a   : > { %3657 = vmatprep.subr.mxu1 %v3388_v29  ;;  %3718 = vmatprep.subr.mxu0 %v3536_v38  ;;  %v3338_v29 = vld [vmem:[#allocation4 + $0x98] sm:$0xff] }
 0x38b   : > { %3658 = vmatpush2.msra.mxu1 %v3387_v49  ;;  %3719 = vmatpush2.msra.mxu0 %v3535_v26  ;;  %v3334_v49 = vld [vmem:[#allocation4 + $0x78] sm:$0xff]  ;;  %v3441_v26 = vld [vmem:[#allocation4 + $0x3d0] sm:$0xff] }
 0x38c   : > { %3659 = vmatprep.subr.mxu1 %v3384_v32  ;;  %3720 = vmatprep.subr.mxu0 %v3532_v62  ;;  %v3330_v32 = vld [vmem:[#allocation4 + $0x58] sm:$0xff] }
 0x38d   : > { %3660 = vmatpush2.msra.mxu1 %v3383_v54  ;;  %3721 = vmatpush2.msra.mxu0 %v3531_v0  ;;  %v3326_v54 = vld [vmem:[#allocation4 + $0x38] sm:$0xff]  ;;  %v3437_v0 = vld [vmem:[#allocation4 + $0x3b0] sm:$0xff] }
 0x38e   : > { %3739 = vmatprep.subr.mxu1 %v3382_v61  ;;  %3722 = vmatprep.subr.mxu0 %v3528_v18  ;;  %v3322_v61 = vld [vmem:[#allocation4 + $0x18] sm:$0xff] }
 0x38f   : > { %3723 = vmatpush2.msra.mxu0 %v3527_v51  ;;  %v3446_v31 = vld [vmem:[#allocation4 + $0x3f8] sm:$0xff]  ;;  %v3433_v51 = vld [vmem:[#allocation4 + $0x390] sm:$0xff] }
 0x390   : > { %3724 = vmatprep.subr.mxu0 %v3524_v58  ;;  %v3442_v38 = vld [vmem:[#allocation4 + $0x3d8] sm:$0xff] }
 0x391   : > { %3725 = vmatpush2.msra.mxu0 %v3523_v21  ;;  %v3438_v62 = vld [vmem:[#allocation4 + $0x3b8] sm:$0xff]  ;;  %v3429_v21 = vld [vmem:[#allocation4 + $0x370] sm:$0xff] }
 0x392   : > { %3726 = vmatprep.subr.mxu0 %v3520_v57  ;;  %v3434_v18 = vld [vmem:[#allocation4 + $0x398] sm:$0xff] }
 0x393   : > { %3727 = vmatpush2.msra.mxu0 %v3519_v50  ;;  %v3430_v58 = vld [vmem:[#allocation4 + $0x378] sm:$0xff]  ;;  %v3425_v50 = vld [vmem:[#allocation4 + $0x350] sm:$0xff] }
 0x394   : > { %3728 = vmatprep.subr.mxu0 %v3516_v14  ;;  %v3426_v57 = vld [vmem:[#allocation4 + $0x358] sm:$0xff] }
 0x395   : > { %3729 = vmatpush2.msra.mxu0 %v3515_v23  ;;  %v3422_v14 = vld [vmem:[#allocation4 + $0x338] sm:$0xff]  ;;  %v3421_v23 = vld [vmem:[#allocation4 + $0x330] sm:$0xff] }
 0x396   : > { %3730 = vmatprep.subr.mxu0 %v3512_v3  ;;  %v3418_v3 = vld [vmem:[#allocation4 + $0x318] sm:$0xff] }
 0x397   : > { %3731 = vmatpush2.msra.mxu0 %v3511_v9  ;;  %v3417_v9 = vld [vmem:[#allocation4 + $0x310] sm:$0xff] }
 0x398   : > { %3810 = vmatprep.subr.mxu0 %v3510_v7  ;;  %v3414_v7 = vld [vmem:[#allocation4 + $0x2f8] sm:$0xff] }
 0x3cd   : > { %v3097_v46 = vpop.f32.mrf.mxu1 }
 0x3ce   : > { %v3098_v37 = vadd.f32 %v3097_v46, %v3014_v16  ;;  %v3413_v46 = vld [vmem:[#allocation4 + $0x2f0] sm:$0xff]  ;;  %v3410_v16 = vld [vmem:[#allocation4 + $0x2d8] sm:$0xff] }
 0x3cf   : > { %v3099_v30 = vpop.f32.mrf.mxu1 }
 0x3d0   : > { %v3100_v20 = vadd.f32 %v3099_v30, %v3018_v53  ;;  %v3409_v53 = vld [vmem:[#allocation4 + $0x2d0] sm:$0xff]  ;;  %v3021_v30 = vsub.s32 2, %v6361_v59 }
 0x3d6   : > { %v3168_v27 = vpop.f32.mrf.mxu0 }
 0x3d7   : > { %v6759_v15 = vadd.f32 %v3168_v27, %v3098_v37  ;;  %v3406_v37 = vld [vmem:[#allocation4 + $0x2b8] sm:$0xff]  ;;  %v3025_v27 = vsub.s32 3, %v6361_v59  ;;  %v3949_v59 = vld [vmem:[%s7033_s12] sm:$0x1] }
 0x3d8   : > { %v3170_v35 = vpop.f32.mrf.mxu0 }
 0x3d9   : > { %v3171_v55 = vadd.f32 %v3170_v35, %v3100_v20  ;;  %v3315_v4 = vmax.f32 %v6759_v15, 0.0  ;;  %v3405_v20 = vld [vmem:[#allocation4 + $0x2b0] sm:$0xff]  ;;  %v3915_v15 = vld [vmem:[%s7032_s11 + $0xf0] sm:$0xff] }
 0x3db   : > { %v3316_v8 = vmax.f32 %v3171_v55, 0.0  ;;  %v3402_v55 = vld [vmem:[#allocation4 + $0x298] sm:$0xff] }
 0x3dd   : > { %3661 = vmatprep.mubr.f32.mxu1 %v3316_v8 }
 0x3de   : > { %3662 = vmatmul.mubr.f32.vlgmr.msra.gmra.mxu1 %v3315_v4 }
 0x3df   : > { %3740 = vmatpush1.msra.mxu1 %v3381_v25  ;;  %3803 = vmatprep.mubr.f32.mxu1 %v3316_v8  ;;  %v3401_v8 = vld [vmem:[#allocation4 + $0x290] sm:$0xff]  ;;  %v3022_v25 = vrot.slane %v6750_v47, %v3021_v30 }
 0x3e0   : > { %3741 = vmatprep.subr.mxu1 %v3378_v13  ;;  %v3398_v13 = vld [vmem:[#allocation4 + $0x278] sm:$0xff] }
 0x3e1   : > { %3742 = vmatpush1.msra.mxu1 %v3377_v60  ;;  %v3026_v60 = vrot.slane %v6750_v47, %v3025_v27 }
 0x3e2   : > { %3743 = vmatprep.subr.mxu1 %v3374_v43  ;;  %v3397_v43 = vld [vmem:[#allocation4 + $0x270] sm:$0xff] }
 0x3e3   : > { %3744 = vmatpush1.msra.mxu1 %v3373_v11 }
 0x3e4   : > { %3745 = vmatprep.subr.mxu1 %v3370_v41  ;;  %v3394_v41 = vld [vmem:[#allocation4 + $0x258] sm:$0xff] }
 0x3e5   : > { %3746 = vmatpush1.msra.mxu1 %v3369_v5  ;;  %v3393_v5 = vld [vmem:[#allocation4 + $0x250] sm:$0xff] }
 0x3e6   : > { %3747 = vmatprep.subr.mxu1 %v3366_v52 }
 0x3e7   : > { %3748 = vmatpush1.msra.mxu1 %v3365_v22 }
 0x3e8   : > { %3749 = vmatprep.subr.mxu1 %v3362_v24  ;;  %v3390_v24 = vld [vmem:[#allocation4 + $0x238] sm:$0xff] }
 0x3e9   : > { %3750 = vmatpush1.msra.mxu1 %v3361_v1 }
 0x3ea   : > { %3751 = vmatprep.subr.mxu1 %v3358_v39  ;;  %v3389_v39 = vld [vmem:[#allocation4 + $0x230] sm:$0xff] }
 0x3eb   : > { %3752 = vmatpush1.msra.mxu1 %v3357_v10 }
 0x3ec   : > { %3753 = vmatprep.subr.mxu1 %v3354_v42 }
 0x3ed   : > { %3754 = vmatpush1.msra.mxu1 %v3353_v36  ;;  %v3386_v36 = vld [vmem:[#allocation4 + $0x218] sm:$0xff] }
 0x3ee   : > { %3755 = vmatprep.subr.mxu1 %v3350_v33  ;;  %v3385_v33 = vld [vmem:[#allocation4 + $0x210] sm:$0xff] }
 0x3ef   : > { %3756 = vmatpush1.msra.mxu1 %v3349_v34 }
 0x3f0   : > { %3757 = vmatprep.subr.mxu1 %v3346_v63 }
 0x3f1   : > { %3758 = vmatpush1.msra.mxu1 %v3345_v48  ;;  %v3509_v48 = vld [vmem:[#allocation4 + $0x5f0] sm:$0xff] }
 0x3f2   : > { %3759 = vmatprep.subr.mxu1 %v3342_v2  ;;  %v3506_v2 = vld [vmem:[#allocation4 + $0x5d8] sm:$0xff] }
 0x3f3   : > { %3760 = vmatpush1.msra.mxu1 %v3341_v40  ;;  %v3505_v40 = vld [vmem:[#allocation4 + $0x5d0] sm:$0xff] }
 0x3f4   : > { %3761 = vmatprep.subr.mxu1 %v3338_v29  ;;  %v3502_v29 = vld [vmem:[#allocation4 + $0x5b8] sm:$0xff] }
 0x3f5   : > { %3762 = vmatpush1.msra.mxu1 %v3337_v19  ;;  %v3501_v19 = vld [vmem:[#allocation4 + $0x5b0] sm:$0xff] }
 0x3f6   : > { %3763 = vmatprep.subr.mxu1 %v3334_v49  ;;  %v3916_v49 = vld [vmem:[%s7032_s11 + $0xf8] sm:$0xff] }
 0x3f7   : > { %3764 = vmatpush1.msra.mxu1 %v3333_v45  ;;  %v3900_v45 = vld [vmem:[%s7032_s11 + $0x78] sm:$0xff] }
 0x3f8   : > { %3765 = vmatprep.subr.mxu1 %v3330_v32  ;;  %v3899_v32 = vld [vmem:[%s7032_s11 + $0x70] sm:$0xff] }
 0x3f9   : > { %3766 = vmatpush1.msra.mxu1 %v3329_v28  ;;  %v3497_v28 = vld [vmem:[#allocation4 + $0x590] sm:$0xff] }
 0x3fa   : > { %3767 = vmatprep.subr.mxu1 %v3326_v54  ;;  %v3914_v54 = vld [vmem:[%s7032_s11 + $0xe8] sm:$0xff] }
 0x3fb   : > { %3768 = vmatpush1.msra.mxu1 %v3325_v56  ;;  %v3494_v56 = vld [vmem:[#allocation4 + $0x578] sm:$0xff] }
 0x3fc   : > { %3769 = vmatprep.subr.mxu1 %v3322_v61  ;;  %v3898_v61 = vld [vmem:[%s7032_s11 + $0x68] sm:$0xff] }
 0x3fd   : > { %3770 = vmatpush1.msra.mxu1 %v3321_v6  ;;  %v3493_v6 = vld [vmem:[#allocation4 + $0x570] sm:$0xff] }
 0x3fe   : > { %3771 = vmatprep.subr.mxu1 %v3446_v31  ;;  %v3913_v31 = vld [vmem:[%s7032_s11 + $0xe0] sm:$0xff] }
 0x3ff   : > { %3772 = vmatpush2.msra.mxu1 %v3445_v44  ;;  %v3490_v44 = vld [vmem:[#allocation4 + $0x558] sm:$0xff] }
 0x400   : > { %3773 = vmatprep.subr.mxu1 %v3442_v38  ;;  %v3897_v38 = vld [vmem:[%s7032_s11 + $0x60] sm:$0xff] }
 0x401   : > { %3774 = vmatpush2.msra.mxu1 %v3441_v26  ;;  %v3489_v26 = vld [vmem:[#allocation4 + $0x550] sm:$0xff] }
 0x402   : > { %3775 = vmatprep.subr.mxu1 %v3438_v62  ;;  %v3912_v62 = vld [vmem:[%s7032_s11 + $0xd8] sm:$0xff] }
 0x403   : > { %3776 = vmatpush2.msra.mxu1 %v3437_v0  ;;  %v3486_v0 = vld [vmem:[#allocation4 + $0x538] sm:$0xff] }
 0x404   : > { %3777 = vmatprep.subr.mxu1 %v3434_v18  ;;  %v3896_v18 = vld [vmem:[%s7032_s11 + $0x58] sm:$0xff] }
 0x405   : > { %3778 = vmatpush2.msra.mxu1 %v3433_v51  ;;  %v3485_v51 = vld [vmem:[#allocation4 + $0x530] sm:$0xff] }
 0x406   : > { %3779 = vmatprep.subr.mxu1 %v3430_v58  ;;  %v3911_v58 = vld [vmem:[%s7032_s11 + $0xd0] sm:$0xff] }
 0x407   : > { %3780 = vmatpush2.msra.mxu1 %v3429_v21  ;;  %v3482_v21 = vld [vmem:[#allocation4 + $0x518] sm:$0xff] }
 0x408   : > { %3781 = vmatprep.subr.mxu1 %v3426_v57  ;;  %v3895_v57 = vld [vmem:[%s7032_s11 + $0x50] sm:$0xff] }
 0x409   : > { %3782 = vmatpush2.msra.mxu1 %v3425_v50  ;;  %v3481_v50 = vld [vmem:[#allocation4 + $0x510] sm:$0xff] }
 0x40a   : > { %3783 = vmatprep.subr.mxu1 %v3422_v14  ;;  %v3910_v14 = vld [vmem:[%s7032_s11 + $0xc8] sm:$0xff] }
 0x40b   : > { %3784 = vmatpush2.msra.mxu1 %v3421_v23  ;;  %v3478_v23 = vld [vmem:[#allocation4 + $0x4f8] sm:$0xff] }
 0x40c   : > { %3785 = vmatprep.subr.mxu1 %v3418_v3  ;;  %v3894_v3 = vld [vmem:[%s7032_s11 + $0x48] sm:$0xff] }
 0x40d   : > { %3786 = vmatpush2.msra.mxu1 %v3417_v9  ;;  %v3239_v35 = vpop.f32.mrf.mxu1  ;;  %v3477_v9 = vld [vmem:[#allocation4 + $0x4f0] sm:$0xff] }
 0x40e   : > { %3787 = vmatprep.subr.mxu1 %v3414_v7  ;;  %v3240_v52 = vadd.f32 %v3239_v35, %v3022_v25  ;;  %v3909_v7 = vld [vmem:[%s7032_s11 + $0xc0] sm:$0xff]  ;;  %v3892_v35 = vld [vmem:[%s7032_s11 + $0x38] sm:$0xff]  ;;  %v3466_v25 = vld [vmem:[#allocation4 + $0x498] sm:$0xff] }
 0x40f   : > { %3788 = vmatpush2.msra.mxu1 %v3413_v46  ;;  %v3241_v11 = vpop.f32.mrf.mxu1  ;;  %v3474_v46 = vld [vmem:[#allocation4 + $0x4d8] sm:$0xff] }
 0x410   : > { %3789 = vmatprep.subr.mxu1 %v3410_v16  ;;  %v3242_v1 = vadd.f32 %v3241_v11, %v3026_v60  ;;  %v3893_v16 = vld [vmem:[%s7032_s11 + $0x40] sm:$0xff]  ;;  %v3462_v11 = vld [vmem:[#allocation4 + $0x478] sm:$0xff] }
 0x411   : > { %3790 = vmatpush2.msra.mxu1 %v3409_v53  ;;  %v3473_v53 = vld [vmem:[#allocation4 + $0x4d0] sm:$0xff] }
 0x412   : > { %3791 = vmatprep.subr.mxu1 %v3406_v37  ;;  %v3908_v37 = vld [vmem:[%s7032_s11 + $0xb8] sm:$0xff]  ;;  %v3465_v60 = vld [vmem:[#allocation4 + $0x490] sm:$0xff] }
 0x413   : > { %3792 = vmatpush2.msra.mxu1 %v3405_v20  ;;  %v3470_v20 = vld [vmem:[#allocation4 + $0x4b8] sm:$0xff] }
 0x414   : > { %3793 = vmatprep.subr.mxu1 %v3402_v55  ;;  %v3469_v55 = vld [vmem:[#allocation4 + $0x4b0] sm:$0xff] }
 0x415   : > { %3794 = vmatpush2.msra.mxu1 %v3401_v8  ;;  %v3907_v8 = vld [vmem:[%s7032_s11 + $0xb0] sm:$0xff] }
 0x416   : > { %3795 = vmatprep.subr.mxu1 %v3398_v13  ;;  %v3891_v13 = vld [vmem:[%s7032_s11 + $0x30] sm:$0xff] }
 0x417   : > { %v3310_v22 = vpop.f32.mrf.mxu0  ;;  %3796 = vmatpush2.msra.mxu1 %v3397_v43  ;;  %v3906_v43 = vld [vmem:[%s7032_s11 + $0xa8] sm:$0xff] }
 0x418   : > { %3797 = vmatprep.subr.mxu1 %v3394_v41  ;;  %v6772_v10 = vadd.f32 %v3310_v22, %v3240_v52  ;;  %v3890_v41 = vld [vmem:[%s7032_s11 + $0x28] sm:$0xff]  ;;  %v3905_v52 = vld [vmem:[%s7032_s11 + $0xa0] sm:$0xff] }
 0x419   : > { %v3312_v42 = vpop.f32.mrf.mxu0  ;;  %3798 = vmatpush2.msra.mxu1 %v3393_v5  ;;  %v3461_v5 = vld [vmem:[#allocation4 + $0x470] sm:$0xff]  ;;  %v3458_v22 = vld [vmem:[#allocation4 + $0x458] sm:$0xff] }
 0x41a   : > { %v3313_v47 = vadd.f32 %v3312_v42, %v3242_v1  ;;  %3799 = vmatprep.subr.mxu1 %v3390_v24  ;;  %v3317_v63 = vmax.f32 %v6772_v10, 0.0  ;;  %v3889_v24 = vld [vmem:[%s7032_s11 + $0x20] sm:$0xff]  ;;  %v3902_v10 = vld [vmem:[%s7032_s11 + $0x88] sm:$0xff] }
 0x41b   : > { %3800 = vmatpush2.msra.mxu1 %v3389_v39  ;;  %v3457_v1 = vld [vmem:[#allocation4 + $0x450] sm:$0xff]  ;;  %v3454_v39 = vld [vmem:[#allocation4 + $0x438] sm:$0xff] }
 0x41c   : > { %v3318_v34 = vmax.f32 %v3313_v47, 0.0  ;;  %3801 = vmatprep.subr.mxu1 %v3386_v36  ;;  %v3453_v42 = vld [vmem:[#allocation4 + $0x430] sm:$0xff]  ;;  %v3450_v36 = vld [vmem:[#allocation4 + $0x418] sm:$0xff] }
 0x41d   : > { %3802 = vmatpush2.msra.mxu1 %v3385_v33  ;;  %v3449_v47 = vld [vmem:[#allocation4 + $0x410] sm:$0xff]  ;;  %v3574_v33 = vld [vmem:[#allocation4 + $0x7f8] sm:$0xff] }
 0x41e   : > { %3732 = vmatprep.mubr.f32.mxu0 %v3318_v34  ;;  %3804 = vmatmul.mubr.f32.vlgmr.msra.gmra.mxu1 %v3315_v4  ;;  %v3498_v4 = vld [vmem:[#allocation4 + $0x598] sm:$0xff] }
 0x41f   : > { %3733 = vmatmul.mubr.f32.vlgmr.msra.gmra.mxu0 %v3317_v63  ;;  %4486 = vmatprep.subr.mxu1 %v3916_v49  ;;  %v3561_v49 = vld [vmem:[#allocation4 + $0x790] sm:$0xff] }
 0x420   : > { %3811 = vmatpush1.msra.mxu0 %v3509_v48  ;;  %3874 = vmatprep.mubr.f32.mxu0 %v3318_v34  ;;  %v3573_v34 = vld [vmem:[#allocation4 + $0x7f0] sm:$0xff]  ;;  %v3570_v48 = vld [vmem:[#allocation4 + $0x7d8] sm:$0xff] }
 0x421   : > { %3812 = vmatprep.subr.mxu0 %v3506_v2  ;;  %4487 = vmatpush3.msra.mxu1 %v3900_v45  ;;  %v3569_v2 = vld [vmem:[#allocation4 + $0x7d0] sm:$0xff]  ;;  %v3558_v45 = vld [vmem:[#allocation4 + $0x778] sm:$0xff] }
 0x422   : > { %3813 = vmatpush1.msra.mxu0 %v3505_v40  ;;  %4488 = vmatprep.subr.mxu1 %v3915_v15  ;;  %v3566_v40 = vld [vmem:[#allocation4 + $0x7b8] sm:$0xff]  ;;  %v3557_v15 = vld [vmem:[#allocation4 + $0x770] sm:$0xff] }
 0x423   : > { %3814 = vmatprep.subr.mxu0 %v3502_v29  ;;  %4489 = vmatpush3.msra.mxu1 %v3899_v32  ;;  %v3565_v29 = vld [vmem:[#allocation4 + $0x7b0] sm:$0xff] }
 0x424   : > { %3815 = vmatpush1.msra.mxu0 %v3501_v19  ;;  %4490 = vmatprep.subr.mxu1 %v3914_v54  ;;  %v3562_v19 = vld [vmem:[#allocation4 + $0x798] sm:$0xff]  ;;  %v3553_v32 = vld [vmem:[#allocation4 + $0x750] sm:$0xff] }
 0x425   : > { %3816 = vmatprep.subr.mxu0 %v3498_v4  ;;  %4491 = vmatpush3.msra.mxu1 %v3898_v61  ;;  %v3554_v4 = vld [vmem:[#allocation4 + $0x758] sm:$0xff]  ;;  %v3549_v54 = vld [vmem:[#allocation4 + $0x730] sm:$0xff] }
 0x426   : > { %3817 = vmatpush1.msra.mxu0 %v3497_v28  ;;  %4492 = vmatprep.subr.mxu1 %v3913_v31  ;;  %v3550_v28 = vld [vmem:[#allocation4 + $0x738] sm:$0xff]  ;;  %v3545_v61 = vld [vmem:[#allocation4 + $0x710] sm:$0xff] }
 0x427   : > { %3818 = vmatprep.subr.mxu0 %v3494_v56  ;;  %4493 = vmatpush3.msra.mxu1 %v3897_v38  ;;  %v3546_v56 = vld [vmem:[#allocation4 + $0x718] sm:$0xff]  ;;  %v3541_v31 = vld [vmem:[#allocation4 + $0x6f0] sm:$0xff] }
 0x428   : > { %3819 = vmatpush1.msra.mxu0 %v3493_v6  ;;  %4494 = vmatprep.subr.mxu1 %v3912_v62  ;;  %v3542_v6 = vld [vmem:[#allocation4 + $0x6f8] sm:$0xff]  ;;  %v3537_v38 = vld [vmem:[#allocation4 + $0x6d0] sm:$0xff] }
 0x429   : > { %3820 = vmatprep.subr.mxu0 %v3490_v44  ;;  %4495 = vmatpush3.msra.mxu1 %v3896_v18  ;;  %v3538_v44 = vld [vmem:[#allocation4 + $0x6d8] sm:$0xff]  ;;  %v3533_v62 = vld [vmem:[#allocation4 + $0x6b0] sm:$0xff] }
 0x42a   : > { %3821 = vmatpush1.msra.mxu0 %v3489_v26  ;;  %4496 = vmatprep.subr.mxu1 %v3911_v58  ;;  %v3534_v26 = vld [vmem:[#allocation4 + $0x6b8] sm:$0xff]  ;;  %v3529_v18 = vld [vmem:[#allocation4 + $0x690] sm:$0xff] }
 0x42b   : > { %3822 = vmatprep.subr.mxu0 %v3486_v0  ;;  %4497 = vmatpush3.msra.mxu1 %v3895_v57  ;;  %v3530_v0 = vld [vmem:[#allocation4 + $0x698] sm:$0xff]  ;;  %v3525_v58 = vld [vmem:[#allocation4 + $0x670] sm:$0xff] }
 0x42c   : > { %3823 = vmatpush1.msra.mxu0 %v3485_v51  ;;  %4498 = vmatprep.subr.mxu1 %v3910_v14  ;;  %v3526_v51 = vld [vmem:[#allocation4 + $0x678] sm:$0xff]  ;;  %v3521_v57 = vld [vmem:[#allocation4 + $0x650] sm:$0xff] }
 0x42d   : > { %3824 = vmatprep.subr.mxu0 %v3482_v21  ;;  %4499 = vmatpush3.msra.mxu1 %v3894_v3  ;;  %v3522_v21 = vld [vmem:[#allocation4 + $0x658] sm:$0xff]  ;;  %v3517_v14 = vld [vmem:[#allocation4 + $0x630] sm:$0xff] }
 0x42e   : > { %3825 = vmatpush1.msra.mxu0 %v3481_v50  ;;  %4500 = vmatprep.subr.mxu1 %v3909_v7  ;;  %v3518_v50 = vld [vmem:[#allocation4 + $0x638] sm:$0xff]  ;;  %v3513_v3 = vld [vmem:[#allocation4 + $0x610] sm:$0xff]  ;;  %v3888_v7 = vld [vmem:[%s7032_s11 + $0x18] sm:$0xff] }
 0x42f   : > { %3826 = vmatprep.subr.mxu0 %v3478_v23  ;;  %4501 = vmatpush3.msra.mxu1 %v3893_v16  ;;  %v3514_v23 = vld [vmem:[#allocation4 + $0x618] sm:$0xff]  ;;  %v3887_v16 = vld [vmem:[%s7032_s11 + $0x10] sm:$0xff] }
 0x430   : > { %3827 = vmatpush1.msra.mxu0 %v3477_v9  ;;  %4502 = vmatprep.subr.mxu1 %v3908_v37  ;;  %v3904_v9 = vld [vmem:[%s7032_s11 + $0x98] sm:$0xff]  ;;  %v3885_v37 = vld [vmem:[%s7032_s11] sm:$0xff] }
 0x431   : > { %3828 = vmatprep.subr.mxu0 %v3474_v46  ;;  %4503 = vmatpush3.msra.mxu1 %v3892_v35  ;;  %v3903_v46 = vld [vmem:[%s7032_s11 + $0x90] sm:$0xff]  ;;  %v3932_v35 = vld [vmem:[%s7032_s11 + $0x178] sm:$0xff] }
 0x432   : > { %3829 = vmatpush1.msra.mxu0 %v3473_v53  ;;  %4504 = vmatprep.subr.mxu1 %v3907_v8  ;;  %v3901_v53 = vld [vmem:[%s7032_s11 + $0x80] sm:$0xff]  ;;  %v3931_v8 = vld [vmem:[%s7032_s11 + $0x170] sm:$0xff] }
 0x433   : > { %3830 = vmatprep.subr.mxu0 %v3470_v20  ;;  %4505 = vmatpush3.msra.mxu1 %v3891_v13  ;;  %v3948_v20 = vld [vmem:[%s7032_s11 + $0x1f8] sm:$0xff]  ;;  %v3930_v13 = vld [vmem:[%s7032_s11 + $0x168] sm:$0xff] }
 0x434   : > { %3831 = vmatpush1.msra.mxu0 %v3469_v55  ;;  %4506 = vmatprep.subr.mxu1 %v3906_v43  ;;  %v3947_v55 = vld [vmem:[%s7032_s11 + $0x1f0] sm:$0xff]  ;;  %v3929_v43 = vld [vmem:[%s7032_s11 + $0x160] sm:$0xff] }
 0x435   : > { %3832 = vmatprep.subr.mxu0 %v3466_v25  ;;  %4507 = vmatpush3.msra.mxu1 %v3890_v41  ;;  %v3946_v25 = vld [vmem:[%s7032_s11 + $0x1e8] sm:$0xff]  ;;  %v3928_v41 = vld [vmem:[%s7032_s11 + $0x158] sm:$0xff] }
 0x436   : > { %3833 = vmatpush1.msra.mxu0 %v3465_v60  ;;  %4508 = vmatprep.subr.mxu1 %v3905_v52  ;;  %v3945_v60 = vld [vmem:[%s7032_s11 + $0x1e0] sm:$0xff]  ;;  %v3927_v52 = vld [vmem:[%s7032_s11 + $0x150] sm:$0xff] }
 0x437   : > { %3834 = vmatprep.subr.mxu0 %v3462_v11  ;;  %4509 = vmatpush3.msra.mxu1 %v3889_v24  ;;  %v3944_v11 = vld [vmem:[%s7032_s11 + $0x1d8] sm:$0xff]  ;;  %v3926_v24 = vld [vmem:[%s7032_s11 + $0x148] sm:$0xff] }
 0x438   : > { %3835 = vmatpush1.msra.mxu0 %v3461_v5  ;;  %4510 = vmatprep.subr.mxu1 %v3904_v9  ;;  %v3943_v5 = vld [vmem:[%s7032_s11 + $0x1d0] sm:$0xff] }
 0x439   : > { %3836 = vmatprep.subr.mxu0 %v3458_v22  ;;  %4511 = vmatpush3.msra.mxu1 %v3888_v7  ;;  %v3942_v22 = vld [vmem:[%s7032_s11 + $0x1c8] sm:$0xff] }
 0x43a   : > { %3837 = vmatpush1.msra.mxu0 %v3457_v1  ;;  %4512 = vmatprep.subr.mxu1 %v3903_v46  ;;  %v3941_v1 = vld [vmem:[%s7032_s11 + $0x1c0] sm:$0xff] }
 0x43b   : > { %3838 = vmatprep.subr.mxu0 %v3454_v39  ;;  %4513 = vmatpush3.msra.mxu1 %v3887_v16  ;;  %v3925_v39 = vld [vmem:[%s7032_s11 + $0x140] sm:$0xff] }
 0x43c   : > { %3839 = vmatpush1.msra.mxu0 %v3453_v42  ;;  %4514 = vmatprep.subr.mxu1 %v3902_v10  ;;  %v3940_v42 = vld [vmem:[%s7032_s11 + $0x1b8] sm:$0xff] }
 0x43d   : > { %3840 = vmatprep.subr.mxu0 %v3450_v36  ;;  %v3924_v36 = vld [vmem:[%s7032_s11 + $0x138] sm:$0xff] }
 0x43e   : > { %3841 = vmatpush1.msra.mxu0 %v3449_v47  ;;  %v3939_v47 = vld [vmem:[%s7032_s11 + $0x1b0] sm:$0xff] }
 0x43f   : > { %3842 = vmatprep.subr.mxu0 %v3574_v33  ;;  %v3923_v33 = vld [vmem:[%s7032_s11 + $0x130] sm:$0xff] }
 0x440   : > { %3843 = vmatpush2.msra.mxu0 %v3573_v34  ;;  %v3938_v34 = vld [vmem:[%s7032_s11 + $0x1a8] sm:$0xff] }
 0x441   : > { %3844 = vmatprep.subr.mxu0 %v3570_v48  ;;  %v3922_v48 = vld [vmem:[%s7032_s11 + $0x128] sm:$0xff] }
 0x442   : > { %3845 = vmatpush2.msra.mxu0 %v3569_v2  ;;  %v3937_v2 = vld [vmem:[%s7032_s11 + $0x1a0] sm:$0xff] }
 0x443   : > { %3846 = vmatprep.subr.mxu0 %v3566_v40  ;;  %v3921_v40 = vld [vmem:[%s7032_s11 + $0x120] sm:$0xff] }
 0x444   : > { %3847 = vmatpush2.msra.mxu0 %v3565_v29  ;;  %v3936_v29 = vld [vmem:[%s7032_s11 + $0x198] sm:$0xff] }
 0x445   : > { %3848 = vmatprep.subr.mxu0 %v3562_v19  ;;  %v3920_v19 = vld [vmem:[%s7032_s11 + $0x118] sm:$0xff] }
 0x446   : > { %3849 = vmatpush2.msra.mxu0 %v3561_v49  ;;  %v3935_v49 = vld [vmem:[%s7032_s11 + $0x190] sm:$0xff] }
 0x447   : > { %3850 = vmatprep.subr.mxu0 %v3558_v45  ;;  %v3919_v45 = vld [vmem:[%s7032_s11 + $0x110] sm:$0xff] }
 0x448   : > { %3851 = vmatpush2.msra.mxu0 %v3557_v15  ;;  %v3934_v15 = vld [vmem:[%s7032_s11 + $0x188] sm:$0xff] }
 0x449   : > { %3852 = vmatprep.subr.mxu0 %v3554_v4  ;;  %v3918_v4 = vld [vmem:[%s7032_s11 + $0x108] sm:$0xff] }
 0x44a   : > { %3853 = vmatpush2.msra.mxu0 %v3553_v32  ;;  %v3933_v32 = vld [vmem:[%s7032_s11 + $0x180] sm:$0xff] }
 0x44b   : > { %3854 = vmatprep.subr.mxu0 %v3550_v28  ;;  %v3917_v28 = vld [vmem:[%s7032_s11 + $0x100] sm:$0xff] }
 0x44c   : > { %3855 = vmatpush2.msra.mxu0 %v3549_v54  ;;  %v3575_v54 = vld [vmem:[%s7031_s10] sm:$0xf] }
 0x44d   : > { %3856 = vmatprep.subr.mxu0 %v3546_v56 }
 0x44e   : > { %3857 = vmatpush2.msra.mxu0 %v3545_v61  ;;  %v3580_v61 = vrot.slane %v3575_v54, %v3013_v17  ;;  %v3592_v17 = vrot.slane %v3575_v54, %v3025_v27 }
 0x44f   : > { %3858 = vmatprep.subr.mxu0 %v3542_v6  ;;  %v3584_v6 = vrot.slane %v3575_v54, %v3017_v12 }
 0x450   : > { %3859 = vmatpush2.msra.mxu0 %v3541_v31 }
 0x451   : > { %3860 = vmatprep.subr.mxu0 %v3538_v44 }
 0x452   : > { %3861 = vmatpush2.msra.mxu0 %v3537_v38 }
 0x453   : > { %3862 = vmatprep.subr.mxu0 %v3534_v26 }
 0x454   : > { %3863 = vmatpush2.msra.mxu0 %v3533_v62 }
 0x455   : > { %3864 = vmatprep.subr.mxu0 %v3530_v0 }
 0x456   : > { %3865 = vmatpush2.msra.mxu0 %v3529_v18 }
 0x457   : > { %3866 = vmatprep.subr.mxu0 %v3526_v51 }
 0x458   : > { %3867 = vmatpush2.msra.mxu0 %v3525_v58 }
 0x459   : > { %3868 = vmatprep.subr.mxu0 %v3522_v21 }
 0x45a   : > { %3869 = vmatpush2.msra.mxu0 %v3521_v57  ;;  %v3588_v57 = vrot.slane %v3575_v54, %v3021_v30 }
 0x45b   : > { %3870 = vmatprep.subr.mxu0 %v3518_v50 }
 0x45c   : > { %3871 = vmatpush2.msra.mxu0 %v3517_v14 }
 0x45d   : > { %3872 = vmatprep.subr.mxu0 %v3514_v23 }
 0x45e   : > { %3873 = vmatpush2.msra.mxu0 %v3513_v3 }
 0x45f   : > { %3875 = vmatmul.mubr.f32.vlgmr.msra.gmra.mxu0 %v3317_v63  ;;  %v3886_v63 = vld [vmem:[%s7032_s11 + $0x8] sm:$0xff]  ;;  %4521 = vmatprep.subr.mxu0 %v3948_v20 }
 0x460   : > { %4515 = vmatpush3.msra.mxu1 %v3886_v63  ;;  %4522 = vmatpush3.msra.mxu0 %v3932_v35 }
 0x461   : > { %4516 = vmatprep.subr.mxu1 %v3901_v53  ;;  %4523 = vmatprep.subr.mxu0 %v3947_v55 }
 0x462   : > { %4517 = vmatpush3.msra.mxu1 %v3885_v37  ;;  %4524 = vmatpush3.msra.mxu0 %v3931_v8 }
 0x463   : > { %4525 = vmatprep.subr.mxu0 %v3946_v25 }
 0x464   : > { %4526 = vmatpush3.msra.mxu0 %v3930_v13 }
 0x465   : > { %4527 = vmatprep.subr.mxu0 %v3945_v60 }
 0x466   : > { %4528 = vmatpush3.msra.mxu0 %v3929_v43 }
 0x467   : > { %4529 = vmatprep.subr.mxu0 %v3944_v11 }
 0x468   : > { %4530 = vmatpush3.msra.mxu0 %v3928_v41 }
 0x469   : > { %4531 = vmatprep.subr.mxu0 %v3943_v5 }
 0x46a   : > { %4532 = vmatpush3.msra.mxu0 %v3927_v52 }
 0x46b   : > { %4533 = vmatprep.subr.mxu0 %v3942_v22 }
 0x46c   : > { %4534 = vmatpush3.msra.mxu0 %v3926_v24 }
 0x46d   : > { %4535 = vmatprep.subr.mxu0 %v3941_v1 }
 0x46e   : > { %4536 = vmatpush3.msra.mxu0 %v3925_v39 }
 0x46f   : > { %4537 = vmatprep.subr.mxu0 %v3940_v42 }
 0x470   : > { %4538 = vmatpush3.msra.mxu0 %v3924_v36 }
 0x471   : > { %4539 = vmatprep.subr.mxu0 %v3939_v47 }
 0x472   : > { %4540 = vmatpush3.msra.mxu0 %v3923_v33 }
 0x473   : > { %4541 = vmatprep.subr.mxu0 %v3938_v34 }
 0x474   : > { %4542 = vmatpush3.msra.mxu0 %v3922_v48 }
 0x475   : > { %4543 = vmatprep.subr.mxu0 %v3937_v2 }
 0x476   : > { %4544 = vmatpush3.msra.mxu0 %v3921_v40 }
 0x477   : > { %4545 = vmatprep.subr.mxu0 %v3936_v29 }
 0x478   : > { %4546 = vmatpush3.msra.mxu0 %v3920_v19 }
 0x479   : > { %4547 = vmatprep.subr.mxu0 %v3935_v49 }
 0x47a   : > { %4548 = vmatpush3.msra.mxu0 %v3919_v45 }
 0x47b   : > { %4549 = vmatprep.subr.mxu0 %v3934_v15 }
 0x47c   : > { %4550 = vmatpush3.msra.mxu0 %v3918_v4 }
 0x47d   : > { %4551 = vmatprep.subr.mxu0 %v3933_v32 }
 0x47e   : > { %4552 = vmatpush3.msra.mxu0 %v3917_v28 }
 0x49e   : > { %v3663_v56 = vpop.f32.mrf.mxu1 }
 0x49f   : > { %v3664_v44 = vadd.f32 %v3663_v56, %v3580_v61 }
 0x4a0   : > { %v3665_v31 = vpop.f32.mrf.mxu1 }
 0x4a1   : > { %v3666_v26 = vadd.f32 %v3665_v31, %v3584_v6 }
 0x4de   : > { %v3805_v21 = vpop.f32.mrf.mxu1 }
 0x4df   : > { %v3734_v38 = vpop.f32.mrf.mxu0  ;;  %v3806_v50 = vadd.f32 %v3805_v21, %v3588_v57 }
 0x4e0   : > { %v3735_v62 = vadd.f32 %v3734_v38, %v3664_v44  ;;  %v3807_v12 = vpop.f32.mrf.mxu1 }
 0x4e1   : > { %v3736_v0 = vpop.f32.mrf.mxu0  ;;  %v3808_v23 = vadd.f32 %v3807_v12, %v3592_v17 }
 0x4e2   : > { %v3737_v18 = vadd.f32 %v3736_v0, %v3666_v26  ;;  %v3881_v58 = vmax.f32 %v3735_v62, 0.0 }
 0x4e4   : > { %v3882_v51 = vmax.f32 %v3737_v18, 0.0 }
 0x4e6   : > { %4014 = vmatprep.mubr.f32.mxu1 %v3882_v51 }
 0x4e7   : > { %4015 = vmatmul.mubr.f32.vlgmr.msra.gmra.mxu1 %v3881_v58 }
 0x51f   : > { %v3876_v14 = vpop.f32.mrf.mxu0 }
 0x520   : > { %v3877_v3 = vadd.f32 %v3876_v14, %v3806_v50 }
 0x521   : > { %v3878_v9 = vpop.f32.mrf.mxu0 }
 0x522   : > { %v3879_v7 = vadd.f32 %v3878_v9, %v3808_v23  ;;  %v3883_v16 = vmax.f32 %v3877_v3, 0.0 }
 0x524   : > { %v3884_v46 = vmax.f32 %v3879_v7, 0.0 }
 0x526   : > { %4084 = vmatprep.mubr.f32.mxu0 %v3884_v46 }
 0x527   : > { %4085 = vmatmul.mubr.f32.vlgmr.msra.gmra.mxu0 %v3883_v16 }
 0x5a7   : > { %v4518_v10 = vpop.f32.mrf.mxu1 }
 0x5a9   : > { %v4519_v63 = vpop.f32.mrf.mxu1 }
 0x5aa   : > { %v4520_v53 = vadd.f32 %v4519_v63, %v4518_v10 }
 0x5ac   : > { %v4017_v37 = vadd.f32 %v4520_v53, %v3949_v59 }
 0x5e7   : > { %v4553_v30 = vpop.f32.mrf.mxu0 }
 0x5e9   : > { %v4554_v27 = vpop.f32.mrf.mxu0 }
 0x5ea   : > { %v4555_v20 = vadd.f32 %v4554_v27, %v4553_v30 }
 0x5ec   : > { %v4087_v35 = vadd.f32 %v4555_v20, %v4017_v37 }
 0x5ee   : > { %4091 = vst.msk [vmem:[%s475_s18] sm:$0x1] %vm4090_vm14, %v4087_v35 }
 0x5ef   : > { %4883 = shalt.err (!%p4880_p0)
}
 0x5f0   : > { %s4884_s27 = scalar_lea.hbm %s4107_s20, 16  ;;  %s4888_s18 = scalar_lea.hbm %s7034_s13, 32 }
 0x5f1   : > { %p4885_p1 = scmp.ne.s32.totalorder %s4107_s20, %s4884_s27  ;;  %p4889_p4 = scmp.lt.s32.totalorder %s4107_s20, %s7034_s13 }
 0x5f2   : > { %p4890_p7 = scmp.lt.s32.totalorder %s4888_s18, %s4884_s27 }
 0x5f3   : > { %p4886_p2 = pnand %p4885_p1, %p5058_p5 }
 0x5f4   : > { %p4891_p8 = por %p4890_p7, %p4889_p4 }
 0x5f5   : > { %p4887_p3 = pneg %p4886_p2 }
 0x5f7   : > { %p4892_p6 = pnand %p4891_p8, %p4887_p3 }
 0x5f9   : > { %4895 = shalt.err (!%p4892_p6)
}
 0x5fa   : > { %4791 = dma.vmem_to_hbm [thread:$0]  (%p5058_p5), %s4110_s0, 16, %s4107_s20, %s4093_s28  }
 0x5fb PF: > { %p4803_p9 = scmp.ge.s32.totalorder %s4934_s16, 2  ;;  %s4124_s21 = sand.u32 1, %s4922_s29  }
 0x5fc   : > { %p7054_p10 = scmp.ne.s32.totalorder %s7043_s24, 0  ;;  %s4125_s26 = scalar_lea.sflag [#allocation6], %s4124_s21 }
 0x5fe   : > { %p4798_p11 = pnand %p4803_p9, %p7054_p10 }
 0x600   : > { %p4799_p12 = pneg %p4798_p11 }
 0x602   : > { %4917 = dma.done.wait (%p4799_p12), %s4125_s26, 16  }
 0x603   : > { %4919 = vsyncadd (%p4799_p12), %s4125_s26, 4294967280  ;;  %s7055_s17 = sld [smem:[#allocation10_spill]]  ;;  %p26_p13 = scmp.ge.s32.totalorder %s5045_s19, 4  }
 0x604   : > { %s7056_s15 = sld [smem:[#allocation11_spill]]  ;;  %s7057_s29 = smov %s4926_s30 }
 0x605   : > { %s7059_s16 = smov %s5045_s19  ;;  %28 = sbr.rel (!%p26_p13) target bundleno = 8 (0x8), region = 164 }
 0x609   : > { %s7058_s30 = smov %s7055_s17 }
 0x60a   :  { %4136 = vsyncpa [#allocation5], 1 }
 0x60b   :  { %4138 = vsyncpa [#allocation5 + $0x1], 1 }
 0x60c   :  { %4139 = vsyncpa [#allocation6], 1 }
 0x60d   :  { %4141 = vsyncpa [#allocation6 + $0x1], 1 }

</bundles_post_ra>
